<compile_context>
chip_gen: v7x
topology: tpu7x:2x2x1
jax: 0.10.0
libtpu: 0.0.40
codegen_flags: <defaults>
</compile_context>

<pallas_src>
import functools
import math

import jax
import jax.numpy as jnp
from jax.experimental import pallas as pl
from jax.experimental.pallas import tpu as pltpu


_GELU_C = 0.7978845608028654  # sqrt(2 / pi)


def _gelu_tanh(v):
    return 0.5 * v * (1.0 + jnp.tanh(_GELU_C * (v + 0.044715 * v * v * v)))


def _layernorm(v, eps=1e-6):
    mu = jnp.mean(v, axis=-1, keepdims=True)
    vc = v - mu
    var = jnp.mean(vc * vc, axis=-1, keepdims=True)
    return vc * jax.lax.rsqrt(var + eps)


def _softmax_lastdim(s):
    s = s - jnp.max(s, axis=-1, keepdims=True)
    p = jnp.exp(s)
    return p / jnp.sum(p, axis=-1, keepdims=True)


def _dit_layer_kernel(x_ref, c_ref, tada_ref, sst_ref,
                      wqkv1_ref, bqkv1_ref, wo1_ref,
                      wq2_ref, wkv2_ref, bkv2_ref, wo2_ref,
                      wf1v_ref, wf1g_ref, bf1_ref, wf2_ref, bc_ref,
                      o_ref, *, num_heads):
    f32 = jnp.float32
    bf16 = jnp.bfloat16
    B, N, C = x_ref.shape                 # B == 1 per grid step (batch-parallel)
    M = c_ref.shape[1]
    H = num_heads
    Dh = C // H                           # assumed multiple of 128 (lane-aligned)

    def attend(q2, k2, v2, wo_ref, bo):
        # q2: [B*Nq, C] f32 (already carries 1/sqrt(Dh)); k2, v2: [B*Nk, C] f32.
        Nq = q2.shape[0] // B
        Nk = k2.shape[0] // B
        # Hoisted bf16 casts (once, not per head).
        q2 = q2.astype(bf16)
        k2 = k2.astype(bf16)
        v2 = v2.astype(bf16)
        heads = []
        for h in range(H):                              # static unroll over heads
            lo, hi = h * Dh, (h + 1) * Dh               # lane-aligned slices
            qh = q2[:, lo:hi].reshape(B, Nq, Dh)
            kh = k2[:, lo:hi].reshape(B, Nk, Dh)
            vh = v2[:, lo:hi].reshape(B, Nk, Dh)
            s = jnp.einsum('bqd,bkd->bqk', qh, kh, preferred_element_type=f32)
            p = _softmax_lastdim(s)                     # f32 softmax
            oh = jnp.einsum('bqk,bkd->bqd', p.astype(bf16), vh,
                            preferred_element_type=f32)
            heads.append(oh.reshape(B * Nq, Dh))
        # Concatenate heads so the output projection runs with K = C: fills the
        # 256-deep MXU on v6e/v7x (two passes on v5e's 128-wide MXU).
        ocat = jnp.concatenate(heads, axis=-1).astype(bf16)       # [B*Nq, C]
        out = jnp.dot(ocat, wo_ref[...], preferred_element_type=f32) + bo
        return out.reshape(B, Nq, C)

    x = x_ref[...].astype(f32)                                    # [B, N, C]

    # adaLN: (scale_shift_table[None] + t_adaln).chunk(6, dim=1)
    mod = sst_ref[...][None].astype(f32) + tada_ref[...].astype(f32)   # [B,6,C]
    shift_msa, scale_msa, gate_msa = mod[:, 0:1, :], mod[:, 1:2, :], mod[:, 2:3, :]
    shift_mlp, scale_mlp, gate_mlp = mod[:, 3:4, :], mod[:, 4:5, :], mod[:, 5:6, :]

    # --- modulated self-attention (x overwritten, as in the module) ----------
    x = _layernorm(x) * (1.0 + scale_msa) + shift_msa
    qkv = jnp.dot(x.reshape(B * N, C).astype(bf16), wqkv1_ref[...],
                  preferred_element_type=f32) + bqkv1_ref[...]    # [B*N, 3C]
    x = x + gate_msa * attend(qkv[:, 0:C], qkv[:, C:2 * C], qkv[:, 2 * C:3 * C],
                              wo1_ref, bc_ref[0:1, :])

    # --- cross-attention (no extra norm / gate, as in the module) ------------
    q2 = jnp.dot(x.reshape(B * N, C).astype(bf16), wq2_ref[...],
                 preferred_element_type=f32) + bc_ref[1:2, :]
    kv = jnp.dot(c_ref[...].astype(bf16).reshape(B * M, C), wkv2_ref[...],
                 preferred_element_type=f32) + bkv2_ref[...]      # [B*M, 2C]
    x = x + attend(q2, kv[:, 0:C], kv[:, C:2 * C], wo2_ref, bc_ref[2:3, :])

    # --- modulated GEGLU feed-forward (split wf1 -> no [B*N, 2*inner] temp) --
    x = _layernorm(x) * (1.0 + scale_mlp) + shift_mlp
    xb = x.reshape(B * N, C).astype(bf16)
    val = jnp.dot(xb, wf1v_ref[...], preferred_element_type=f32) + bf1_ref[0:1, :]
    gat = jnp.dot(xb, wf1g_ref[...], preferred_element_type=f32) + bf1_ref[1:2, :]
    ff = (val * _gelu_tanh(gat)).astype(bf16)
    ff = (jnp.dot(ff, wf2_ref[...], preferred_element_type=f32)
          + bc_ref[3:4, :]).reshape(B, N, C)
    x = x + gate_mlp * ff

    o_ref[...] = x.astype(o_ref.dtype)


def prepare_params(params, *, num_heads):
    """ONE-TIME parameter prep (do this at checkpoint-load time, not per call):
    bf16 weight cast, QKV / KV fusion, bias packing, GEGLU wf1 split, and the
    1/sqrt(head_dim) softmax scale folded into the q projections."""
    f32 = jnp.float32
    bf16 = jnp.bfloat16
    C = params['wq1'].shape[0]
    inner = params['wf2'].shape[0]
    scale = 1.0 / math.sqrt(C // num_heads)

    def w(name, s=1.0):
        return (params[name].astype(f32) * s).astype(bf16)

    def b(name, s=1.0):
        return (params[name].astype(f32) * s).reshape(1, -1)

    wf1 = params['wf1'].astype(f32)
    bf1 = params['bf1'].astype(f32)
    return {
        'sst': params['scale_shift_table'].astype(f32),
        'wqkv1': jnp.concatenate([w('wq1', scale), w('wk1'), w('wv1')], axis=1),
        'bqkv1': jnp.concatenate([b('bq1', scale), b('bk1'), b('bv1')], axis=1),
        'wo1': w('wo1'),
        'wq2': w('wq2', scale),
        'wkv2': jnp.concatenate([w('wk2'), w('wv2')], axis=1),
        'bkv2': jnp.concatenate([b('bk2'), b('bv2')], axis=1),
        'wo2': w('wo2'),
        'wf1v': wf1[:, :inner].astype(bf16),
        'wf1g': wf1[:, inner:].astype(bf16),
        'bf1': jnp.stack([bf1[:inner], bf1[inner:]], axis=0),        # [2, inner]
        'wf2': w('wf2'),
        'bc': jnp.stack([params['bo1'].astype(f32),
                         params['bq2'].astype(f32) * scale,
                         params['bo2'].astype(f32),
                         params['bf2'].astype(f32)], axis=0),        # [4, C]
    }


def dit_layer(x, c, t_adaln, prepped, *, num_heads):
    """Fused DiTLayer forward.  x: [B,N,C], c: [B,M,C], t_adaln: [B,6,C].
    `prepped` must come from prepare_params() (bf16, fused weights)."""
    B, N, C = x.shape
    M = c.shape[1]
    inner = prepped['wf2'].shape[0]
    p = prepped

    args = (x, c, t_adaln, p['sst'],
            p['wqkv1'], p['bqkv1'], p['wo1'],
            p['wq2'], p['wkv2'], p['bkv2'], p['wo2'],
            p['wf1v'], p['wf1g'], p['bf1'], p['wf2'], p['bc'])

    def batch_spec(a):
        s = a.shape
        return pl.BlockSpec((1,) + s[1:], lambda b: (b,) + (0,) * (len(s) - 1))

    def const_spec(a):
        s = a.shape
        return pl.BlockSpec(s, lambda b: (0,) * len(s))

    in_specs = ([batch_spec(x), batch_spec(c), batch_spec(t_adaln)]
                + [const_spec(a) for a in args[3:]])

    # Advisory cost estimate (whole call) so XLA can schedule around us.
    flops = 2 * B * (N * C * 3 * C + N * C * C            # self-attn qkv + wo
                     + 2 * N * N * C                       # scores + p@v
                     + N * C * C + M * C * 2 * C + N * C * C   # cross q, kv, wo
                     + 2 * N * M * C                       # cross scores + p@v
                     + N * C * 2 * inner + N * inner * C)  # GEGLU FF
    transc = B * (num_heads * (N * N + N * M) + N * inner)
    bytes_acc = sum(int(a.size) * a.dtype.itemsize for a in args) \
        + int(x.size) * x.dtype.itemsize

    # Batch-parallel grid: uses both TensorCores on v7x; weights have constant
    # block indices so they remain VMEM-resident across grid steps.
    # TODO(synk): at production widths (C~1152) also tile N and raise
    #             vmem_limit_bytes so the kernel fits v7x's 64 MiB VMEM.
    return pl.pallas_call(
        functools.partial(_dit_layer_kernel, num_heads=num_heads),
        grid=(B,),
        out_shape=jax.ShapeDtypeStruct((B, N, C), x.dtype),
        in_specs=in_specs,
        out_specs=pl.BlockSpec((1, N, C), lambda b: (b, 0, 0)),
        compiler_params=pltpu.CompilerParams(
            dimension_semantics=("parallel",)),
        cost_estimate=pl.CostEstimate(flops=flops, transcendentals=transc,
                                      bytes_accessed=bytes_acc),
    )(*args)


def _reference(x, c, t_adaln, params, *, num_heads, matmul_dtype=jnp.float32):
    """Pure-JAX reference on the ORIGINAL (unfused, f32) params.  Folds the
    1/sqrt(head_dim) scale into the q projection (like the kernel) so the bf16
    variant quantizes the same tensors the kernel sees."""
    f32 = jnp.float32

    def linear(a, wname, bname, s=1.0):
        w = (params[wname].astype(f32) * s).astype(matmul_dtype)
        return jnp.dot(a.astype(matmul_dtype), w,
                       preferred_element_type=f32) + params[bname].astype(f32) * s

    def mha(q_in, kv_in, tag):
        B_, Nq, C_ = q_in.shape
        Nk = kv_in.shape[1]
        H, Dh = num_heads, C_ // num_heads
        s = 1.0 / math.sqrt(Dh)
        q = linear(q_in.reshape(B_ * Nq, C_), 'wq' + tag, 'bq' + tag, s).reshape(B_, Nq, H, Dh)
        k = linear(kv_in.reshape(B_ * Nk, C_), 'wk' + tag, 'bk' + tag).reshape(B_, Nk, H, Dh)
        v = linear(kv_in.reshape(B_ * Nk, C_), 'wv' + tag, 'bv' + tag).reshape(B_, Nk, H, Dh)
        sc = jnp.einsum('bqhd,bkhd->bhqk', q.astype(matmul_dtype), k.astype(matmul_dtype),
                        preferred_element_type=f32)
        p = _softmax_lastdim(sc)
        o = jnp.einsum('bhqk,bkhd->bqhd', p.astype(matmul_dtype), v.astype(matmul_dtype),
                       preferred_element_type=f32).reshape(B_ * Nq, C_)
        return linear(o, 'wo' + tag, 'bo' + tag).reshape(B_, Nq, C_)

    B, N, C = x.shape
    inner = params['wf2'].shape[0]

    mod = params['scale_shift_table'][None] + t_adaln
    shift_msa, scale_msa, gate_msa, shift_mlp, scale_mlp, gate_mlp = (
        mod[:, i:i + 1, :] for i in range(6))

    h = _layernorm(x)
    h = h * (1.0 + scale_msa) + shift_msa
    h = h + gate_msa * mha(h, h, '1')
    h = h + mha(h, c, '2')
    h = _layernorm(h)
    h = h * (1.0 + scale_mlp) + shift_mlp
    g = linear(h.reshape(B * N, C), 'wf1', 'bf1')
    ff = g[:, :inner] * _gelu_tanh(g[:, inner:])
    ff = linear(ff, 'wf2', 'bf2').reshape(B, N, C)
    return h + gate_mlp * ff


if __name__ == "__main__":
    # Small DiT-ish shapes: batch=2, seq=8, ctx=8, dim=256, heads=2 (head_dim=128).
    B, N, M, C, H = 2, 8, 8, 256, 2
    MULT = 4
    INNER = C * MULT

    keys = iter(jax.random.split(jax.random.PRNGKey(0), 32))

    def nrm(shape, scale=1.0):
        return jax.random.normal(next(keys), shape, dtype=jnp.float32) * scale

    x = nrm((B, N, C))
    c = nrm((B, M, C))
    t_adaln = nrm((B, 6, C), 0.1)

    params = {'scale_shift_table': nrm((6, C), 1.0 / math.sqrt(C))}
    linear_shapes = {
        'q1': (C, C), 'k1': (C, C), 'v1': (C, C), 'o1': (C, C),
        'q2': (C, C), 'k2': (C, C), 'v2': (C, C), 'o2': (C, C),
        'f1': (C, 2 * INNER), 'f2': (INNER, C),
    }
    for name, (fi, fo) in linear_shapes.items():
        params['w' + name] = nrm((fi, fo), 1.0 / math.sqrt(fi))
        params['b' + name] = nrm((fo,), 0.02)

    # One-time parameter prep (bf16 cast + fusion); NOT done per call.
    prepped = prepare_params(params, num_heads=H)

    out = dit_layer(x, c, t_adaln, prepped, num_heads=H)
    jax.block_until_ready(out)
    assert out.shape == (B, N, C)

    # Tight check vs. a pure-JAX reference with the same bf16-matmul /
    # f32-accumulate discipline (and the same q-scale folding) as the kernel.
    ref_bf16 = _reference(x, c, t_adaln, params, num_heads=H,
                          matmul_dtype=jnp.bfloat16)
    assert jnp.allclose(out, ref_bf16, atol=5e-3, rtol=5e-3), (
        f"mismatch vs bf16 reference (max abs err {jnp.max(jnp.abs(out - ref_bf16))})")

    # Loose sanity check vs. full-f32 semantics (headroom = bf16 quantization).
    ref_f32 = _reference(x, c, t_adaln, params, num_heads=H,
                         matmul_dtype=jnp.float32)
    assert jnp.allclose(out, ref_f32, atol=1e-1, rtol=1e-1), (
        f"mismatch vs f32 reference (max abs err {jnp.max(jnp.abs(out - ref_f32))})")

    print("KERNEL_OK")
</pallas_src>

<mosaic_0001>
module attributes {stable_mosaic.version = 11 : i64} {
  func.func @_dit_layer_kernel(%arg0: i32, %arg1: memref<1x8x256xf32, #tpu.memory_space<vmem>>, %arg2: memref<1x8x256xf32, #tpu.memory_space<vmem>>, %arg3: memref<1x6x256xf32, #tpu.memory_space<vmem>>, %arg4: memref<6x256xf32, #tpu.memory_space<vmem>>, %arg5: memref<256x768xbf16, #tpu.memory_space<vmem>>, %arg6: memref<1x768xf32, #tpu.memory_space<vmem>>, %arg7: memref<256x256xbf16, #tpu.memory_space<vmem>>, %arg8: memref<256x256xbf16, #tpu.memory_space<vmem>>, %arg9: memref<256x512xbf16, #tpu.memory_space<vmem>>, %arg10: memref<1x512xf32, #tpu.memory_space<vmem>>, %arg11: memref<256x256xbf16, #tpu.memory_space<vmem>>, %arg12: memref<256x1024xbf16, #tpu.memory_space<vmem>>, %arg13: memref<256x1024xbf16, #tpu.memory_space<vmem>>, %arg14: memref<2x1024xf32, #tpu.memory_space<vmem>>, %arg15: memref<1024x256xbf16, #tpu.memory_space<vmem>>, %arg16: memref<4x256xf32, #tpu.memory_space<vmem>>, %arg17: memref<1x8x256xf32, #tpu.memory_space<vmem>>) attributes {dimension_semantics = [#tpu.dimension_semantics<parallel>], iteration_bounds = array<i64: 2>, scalar_prefetch = 0 : i64, scratch_operands = 0 : i64, tpu.core_type = #tpu.core_type<tc>, window_params = [{transform_indices = @transform_0, window_bounds = array<i64: 1, 8, 256>}, {transform_indices = @transform_1, window_bounds = array<i64: 1, 8, 256>}, {transform_indices = @transform_2, window_bounds = array<i64: 1, 6, 256>}, {pipeline_mode = #tpu.pipeline_mode<synchronous>, transform_indices = @transform_3, window_bounds = array<i64: 6, 256>}, {pipeline_mode = #tpu.pipeline_mode<synchronous>, transform_indices = @transform_4, window_bounds = array<i64: 256, 768>}, {pipeline_mode = #tpu.pipeline_mode<synchronous>, transform_indices = @transform_5, window_bounds = array<i64: 1, 768>}, {pipeline_mode = #tpu.pipeline_mode<synchronous>, transform_indices = @transform_6, window_bounds = array<i64: 256, 256>}, {pipeline_mode = #tpu.pipeline_mode<synchronous>, transform_indices = @transform_7, window_bounds = array<i64: 256, 256>}, {pipeline_mode = #tpu.pipeline_mode<synchronous>, transform_indices = @transform_8, window_bounds = array<i64: 256, 512>}, {pipeline_mode = #tpu.pipeline_mode<synchronous>, transform_indices = @transform_9, window_bounds = array<i64: 1, 512>}, {pipeline_mode = #tpu.pipeline_mode<synchronous>, transform_indices = @transform_10, window_bounds = array<i64: 256, 256>}, {pipeline_mode = #tpu.pipeline_mode<synchronous>, transform_indices = @transform_11, window_bounds = array<i64: 256, 1024>}, {pipeline_mode = #tpu.pipeline_mode<synchronous>, transform_indices = @transform_12, window_bounds = array<i64: 256, 1024>}, {pipeline_mode = #tpu.pipeline_mode<synchronous>, transform_indices = @transform_13, window_bounds = array<i64: 2, 1024>}, {pipeline_mode = #tpu.pipeline_mode<synchronous>, transform_indices = @transform_14, window_bounds = array<i64: 1024, 256>}, {pipeline_mode = #tpu.pipeline_mode<synchronous>, transform_indices = @transform_15, window_bounds = array<i64: 4, 256>}, {transform_indices = @transform_16, window_bounds = array<i64: 1, 8, 256>}]} {
    %c0 = arith.constant 0 : index
    %c0_0 = arith.constant 0 : index
    %c0_1 = arith.constant 0 : index
    %0 = vector.load %arg1[%c0, %c0_0, %c0_1] : memref<1x8x256xf32, #tpu.memory_space<vmem>>, vector<1x8x256xf32>
    %c0_2 = arith.constant 0 : index
    %c0_3 = arith.constant 0 : index
    %1 = vector.load %arg4[%c0_2, %c0_3] : memref<6x256xf32, #tpu.memory_space<vmem>>, vector<6x256xf32>
    %2 = vector.shape_cast %1 : vector<6x256xf32> to vector<1x6x256xf32>
    %c0_4 = arith.constant 0 : index
    %c0_5 = arith.constant 0 : index
    %c0_6 = arith.constant 0 : index
    %3 = vector.load %arg3[%c0_4, %c0_5, %c0_6] : memref<1x6x256xf32, #tpu.memory_space<vmem>>, vector<1x6x256xf32>
    %4 = arith.addf %2, %3 : vector<1x6x256xf32>
    %5 = vector.extract_strided_slice %4 {offsets = [0, 0, 0], sizes = [1, 1, 256], strides = [1, 1, 1]} : vector<1x6x256xf32> to vector<1x1x256xf32>
    %6 = vector.extract_strided_slice %4 {offsets = [0, 1, 0], sizes = [1, 1, 256], strides = [1, 1, 1]} : vector<1x6x256xf32> to vector<1x1x256xf32>
    %7 = vector.extract_strided_slice %4 {offsets = [0, 2, 0], sizes = [1, 1, 256], strides = [1, 1, 1]} : vector<1x6x256xf32> to vector<1x1x256xf32>
    %8 = vector.extract_strided_slice %4 {offsets = [0, 3, 0], sizes = [1, 1, 256], strides = [1, 1, 1]} : vector<1x6x256xf32> to vector<1x1x256xf32>
    %9 = vector.extract_strided_slice %4 {offsets = [0, 4, 0], sizes = [1, 1, 256], strides = [1, 1, 1]} : vector<1x6x256xf32> to vector<1x1x256xf32>
    %10 = vector.extract_strided_slice %4 {offsets = [0, 5, 0], sizes = [1, 1, 256], strides = [1, 1, 1]} : vector<1x6x256xf32> to vector<1x1x256xf32>
    %cst = arith.constant dense<0.000000e+00> : vector<1x8xf32>
    %11 = vector.multi_reduction <add>, %0, %cst [2] : vector<1x8x256xf32> to vector<1x8xf32>
    %12 = vector.shape_cast %11 : vector<1x8xf32> to vector<1x8x1xf32>
    %cst_7 = arith.constant 2.560000e+02 : f32
    %13 = vector.broadcast %cst_7 : f32 to vector<1x8x1xf32>
    %14 = arith.divf %12, %13 : vector<1x8x1xf32>
    %15 = vector.broadcast %14 : vector<1x8x1xf32> to vector<1x8x256xf32>
    %16 = arith.subf %0, %15 : vector<1x8x256xf32>
    %17 = arith.mulf %16, %16 : vector<1x8x256xf32>
    %cst_8 = arith.constant dense<0.000000e+00> : vector<1x8xf32>
    %18 = vector.multi_reduction <add>, %17, %cst_8 [2] : vector<1x8x256xf32> to vector<1x8xf32>
    %19 = vector.shape_cast %18 : vector<1x8xf32> to vector<1x8x1xf32>
    %cst_9 = arith.constant 2.560000e+02 : f32
    %20 = vector.broadcast %cst_9 : f32 to vector<1x8x1xf32>
    %21 = arith.divf %19, %20 : vector<1x8x1xf32>
    %cst_10 = arith.constant 9.99999997E-7 : f32
    %22 = vector.broadcast %cst_10 : f32 to vector<1x8x1xf32>
    %23 = arith.addf %21, %22 : vector<1x8x1xf32>
    %24 = math.rsqrt %23 : vector<1x8x1xf32>
    %25 = vector.broadcast %24 : vector<1x8x1xf32> to vector<1x8x256xf32>
    %26 = arith.mulf %16, %25 : vector<1x8x256xf32>
    %cst_11 = arith.constant 1.000000e+00 : f32
    %27 = vector.broadcast %cst_11 : f32 to vector<1x1x256xf32>
    %28 = arith.addf %27, %6 : vector<1x1x256xf32>
    %29 = vector.broadcast %28 : vector<1x1x256xf32> to vector<1x8x256xf32>
    %30 = arith.mulf %26, %29 : vector<1x8x256xf32>
    %31 = vector.broadcast %5 : vector<1x1x256xf32> to vector<1x8x256xf32>
    %32 = arith.addf %30, %31 : vector<1x8x256xf32>
    %33 = vector.shape_cast %32 : vector<1x8x256xf32> to vector<8x256xf32>
    %34 = arith.truncf %33 : vector<8x256xf32> to vector<8x256xbf16>
    %c0_12 = arith.constant 0 : index
    %c0_13 = arith.constant 0 : index
    %35 = vector.load %arg5[%c0_12, %c0_13] : memref<256x768xbf16, #tpu.memory_space<vmem>>, vector<256x768xbf16>
    %cst_14 = arith.constant dense<0.000000e+00> : vector<8x768xf32>
    %36 = tpu.matmul %34, %35, %cst_14 {dimension_numbers = #tpu.dot_dimension_numbers<[1], [0], [0], [1], [0, 0, 1, 1], [], []>} : vector<8x256xbf16>, vector<256x768xbf16>, vector<8x768xf32> -> vector<8x768xf32>
    %c0_15 = arith.constant 0 : index
    %c0_16 = arith.constant 0 : index
    %37 = vector.load %arg6[%c0_15, %c0_16] : memref<1x768xf32, #tpu.memory_space<vmem>>, vector<1x768xf32>
    %38 = vector.broadcast %37 : vector<1x768xf32> to vector<8x768xf32>
    %39 = arith.addf %36, %38 : vector<8x768xf32>
    %40 = vector.extract_strided_slice %39 {offsets = [0, 0], sizes = [8, 256], strides = [1, 1]} : vector<8x768xf32> to vector<8x256xf32>
    %41 = vector.extract_strided_slice %39 {offsets = [0, 256], sizes = [8, 256], strides = [1, 1]} : vector<8x768xf32> to vector<8x256xf32>
    %42 = vector.extract_strided_slice %39 {offsets = [0, 512], sizes = [8, 256], strides = [1, 1]} : vector<8x768xf32> to vector<8x256xf32>
    %c0_17 = arith.constant 0 : index
    %c0_18 = arith.constant 0 : index
    %43 = vector.load %arg16[%c0_17, %c0_18] : memref<4x256xf32, #tpu.memory_space<vmem>>, vector<1x256xf32>
    %44 = arith.truncf %40 : vector<8x256xf32> to vector<8x256xbf16>
    %45 = arith.truncf %41 : vector<8x256xf32> to vector<8x256xbf16>
    %46 = arith.truncf %42 : vector<8x256xf32> to vector<8x256xbf16>
    %47 = vector.extract_strided_slice %44 {offsets = [0, 0], sizes = [8, 128], strides = [1, 1]} : vector<8x256xbf16> to vector<8x128xbf16>
    %48 = vector.shape_cast %47 : vector<8x128xbf16> to vector<1x8x128xbf16>
    %49 = vector.extract_strided_slice %45 {offsets = [0, 0], sizes = [8, 128], strides = [1, 1]} : vector<8x256xbf16> to vector<8x128xbf16>
    %50 = vector.shape_cast %49 : vector<8x128xbf16> to vector<1x8x128xbf16>
    %51 = vector.extract_strided_slice %46 {offsets = [0, 0], sizes = [8, 128], strides = [1, 1]} : vector<8x256xbf16> to vector<8x128xbf16>
    %52 = vector.shape_cast %51 : vector<8x128xbf16> to vector<1x8x128xbf16>
    "tpu.trace_start"() <{level = 10 : i32, message = "bqd,bkd->bqk"}> : () -> ()
    %cst_19 = arith.constant dense<0.000000e+00> : vector<1x8x8xf32>
    %53 = tpu.matmul %48, %50, %cst_19 {dimension_numbers = #tpu.dot_dimension_numbers<[2], [2], [1], [1], [0, 0, 0, 1, 1, 1], [0], [0]>} : vector<1x8x128xbf16>, vector<1x8x128xbf16>, vector<1x8x8xf32> -> vector<1x8x8xf32>
    "tpu.trace_stop"() : () -> ()
    %cst_20 = arith.constant dense<0xFF800000> : vector<1x8xf32>
    %54 = vector.multi_reduction <maximumf>, %53, %cst_20 [2] : vector<1x8x8xf32> to vector<1x8xf32>
    %55 = vector.shape_cast %54 : vector<1x8xf32> to vector<1x8x1xf32>
    %56 = vector.broadcast %55 : vector<1x8x1xf32> to vector<1x8x8xf32>
    %57 = arith.subf %53, %56 : vector<1x8x8xf32>
    %58 = math.exp %57 : vector<1x8x8xf32>
    %cst_21 = arith.constant dense<0.000000e+00> : vector<1x8xf32>
    %59 = vector.multi_reduction <add>, %58, %cst_21 [2] : vector<1x8x8xf32> to vector<1x8xf32>
    %60 = vector.shape_cast %59 : vector<1x8xf32> to vector<1x8x1xf32>
    %61 = vector.broadcast %60 : vector<1x8x1xf32> to vector<1x8x8xf32>
    %62 = arith.divf %58, %61 : vector<1x8x8xf32>
    %63 = arith.truncf %62 : vector<1x8x8xf32> to vector<1x8x8xbf16>
    "tpu.trace_start"() <{level = 10 : i32, message = "bqk,bkd->bqd"}> : () -> ()
    %cst_22 = arith.constant dense<0.000000e+00> : vector<1x8x128xf32>
    %64 = tpu.matmul %63, %52, %cst_22 {dimension_numbers = #tpu.dot_dimension_numbers<[2], [1], [1], [2], [0, 0, 0, 1, 1, 2], [0], [0]>} : vector<1x8x8xbf16>, vector<1x8x128xbf16>, vector<1x8x128xf32> -> vector<1x8x128xf32>
    "tpu.trace_stop"() : () -> ()
    %65 = vector.shape_cast %64 : vector<1x8x128xf32> to vector<8x128xf32>
    %66 = vector.extract_strided_slice %44 {offsets = [0, 128], sizes = [8, 128], strides = [1, 1]} : vector<8x256xbf16> to vector<8x128xbf16>
    %67 = vector.shape_cast %66 : vector<8x128xbf16> to vector<1x8x128xbf16>
    %68 = vector.extract_strided_slice %45 {offsets = [0, 128], sizes = [8, 128], strides = [1, 1]} : vector<8x256xbf16> to vector<8x128xbf16>
    %69 = vector.shape_cast %68 : vector<8x128xbf16> to vector<1x8x128xbf16>
    %70 = vector.extract_strided_slice %46 {offsets = [0, 128], sizes = [8, 128], strides = [1, 1]} : vector<8x256xbf16> to vector<8x128xbf16>
    %71 = vector.shape_cast %70 : vector<8x128xbf16> to vector<1x8x128xbf16>
    "tpu.trace_start"() <{level = 10 : i32, message = "bqd,bkd->bqk"}> : () -> ()
    %cst_23 = arith.constant dense<0.000000e+00> : vector<1x8x8xf32>
    %72 = tpu.matmul %67, %69, %cst_23 {dimension_numbers = #tpu.dot_dimension_numbers<[2], [2], [1], [1], [0, 0, 0, 1, 1, 1], [0], [0]>} : vector<1x8x128xbf16>, vector<1x8x128xbf16>, vector<1x8x8xf32> -> vector<1x8x8xf32>
    "tpu.trace_stop"() : () -> ()
    %cst_24 = arith.constant dense<0xFF800000> : vector<1x8xf32>
    %73 = vector.multi_reduction <maximumf>, %72, %cst_24 [2] : vector<1x8x8xf32> to vector<1x8xf32>
    %74 = vector.shape_cast %73 : vector<1x8xf32> to vector<1x8x1xf32>
    %75 = vector.broadcast %74 : vector<1x8x1xf32> to vector<1x8x8xf32>
    %76 = arith.subf %72, %75 : vector<1x8x8xf32>
    %77 = math.exp %76 : vector<1x8x8xf32>
    %cst_25 = arith.constant dense<0.000000e+00> : vector<1x8xf32>
    %78 = vector.multi_reduction <add>, %77, %cst_25 [2] : vector<1x8x8xf32> to vector<1x8xf32>
    %79 = vector.shape_cast %78 : vector<1x8xf32> to vector<1x8x1xf32>
    %80 = vector.broadcast %79 : vector<1x8x1xf32> to vector<1x8x8xf32>
    %81 = arith.divf %77, %80 : vector<1x8x8xf32>
    %82 = arith.truncf %81 : vector<1x8x8xf32> to vector<1x8x8xbf16>
    "tpu.trace_start"() <{level = 10 : i32, message = "bqk,bkd->bqd"}> : () -> ()
    %cst_26 = arith.constant dense<0.000000e+00> : vector<1x8x128xf32>
    %83 = tpu.matmul %82, %71, %cst_26 {dimension_numbers = #tpu.dot_dimension_numbers<[2], [1], [1], [2], [0, 0, 0, 1, 1, 2], [0], [0]>} : vector<1x8x8xbf16>, vector<1x8x128xbf16>, vector<1x8x128xf32> -> vector<1x8x128xf32>
    "tpu.trace_stop"() : () -> ()
    %84 = vector.shape_cast %83 : vector<1x8x128xf32> to vector<8x128xf32>
    %85 = tpu.concatenate %65, %84 in 1 : vector<8x128xf32>, vector<8x128xf32> -> vector<8x256xf32>
    %86 = arith.truncf %85 : vector<8x256xf32> to vector<8x256xbf16>
    %c0_27 = arith.constant 0 : index
    %c0_28 = arith.constant 0 : index
    %87 = vector.load %arg7[%c0_27, %c0_28] : memref<256x256xbf16, #tpu.memory_space<vmem>>, vector<256x256xbf16>
    %cst_29 = arith.constant dense<0.000000e+00> : vector<8x256xf32>
    %88 = tpu.matmul %86, %87, %cst_29 {dimension_numbers = #tpu.dot_dimension_numbers<[1], [0], [0], [1], [0, 0, 1, 1], [], []>} : vector<8x256xbf16>, vector<256x256xbf16>, vector<8x256xf32> -> vector<8x256xf32>
    %89 = vector.broadcast %43 : vector<1x256xf32> to vector<8x256xf32>
    %90 = arith.addf %88, %89 : vector<8x256xf32>
    %91 = vector.shape_cast %90 : vector<8x256xf32> to vector<1x8x256xf32>
    %92 = vector.broadcast %7 : vector<1x1x256xf32> to vector<1x8x256xf32>
    %93 = arith.mulf %92, %91 : vector<1x8x256xf32>
    %94 = arith.addf %32, %93 : vector<1x8x256xf32>
    %95 = vector.shape_cast %94 : vector<1x8x256xf32> to vector<8x256xf32>
    %96 = arith.truncf %95 : vector<8x256xf32> to vector<8x256xbf16>
    %c0_30 = arith.constant 0 : index
    %c0_31 = arith.constant 0 : index
    %97 = vector.load %arg8[%c0_30, %c0_31] : memref<256x256xbf16, #tpu.memory_space<vmem>>, vector<256x256xbf16>
    %cst_32 = arith.constant dense<0.000000e+00> : vector<8x256xf32>
    %98 = tpu.matmul %96, %97, %cst_32 {dimension_numbers = #tpu.dot_dimension_numbers<[1], [0], [0], [1], [0, 0, 1, 1], [], []>} : vector<8x256xbf16>, vector<256x256xbf16>, vector<8x256xf32> -> vector<8x256xf32>
    %c1 = arith.constant 1 : index
    %c0_33 = arith.constant 0 : index
    %99 = vector.load %arg16[%c1, %c0_33] : memref<4x256xf32, #tpu.memory_space<vmem>>, vector<1x256xf32>
    %100 = vector.broadcast %99 : vector<1x256xf32> to vector<8x256xf32>
    %101 = arith.addf %98, %100 : vector<8x256xf32>
    %c0_34 = arith.constant 0 : index
    %c0_35 = arith.constant 0 : index
    %c0_36 = arith.constant 0 : index
    %102 = vector.load %arg2[%c0_34, %c0_35, %c0_36] : memref<1x8x256xf32, #tpu.memory_space<vmem>>, vector<1x8x256xf32>
    %103 = arith.truncf %102 : vector<1x8x256xf32> to vector<1x8x256xbf16>
    %104 = vector.shape_cast %103 : vector<1x8x256xbf16> to vector<8x256xbf16>
    %c0_37 = arith.constant 0 : index
    %c0_38 = arith.constant 0 : index
    %105 = vector.load %arg9[%c0_37, %c0_38] : memref<256x512xbf16, #tpu.memory_space<vmem>>, vector<256x512xbf16>
    %cst_39 = arith.constant dense<0.000000e+00> : vector<8x512xf32>
    %106 = tpu.matmul %104, %105, %cst_39 {dimension_numbers = #tpu.dot_dimension_numbers<[1], [0], [0], [1], [0, 0, 1, 1], [], []>} : vector<8x256xbf16>, vector<256x512xbf16>, vector<8x512xf32> -> vector<8x512xf32>
    %c0_40 = arith.constant 0 : index
    %c0_41 = arith.constant 0 : index
    %107 = vector.load %arg10[%c0_40, %c0_41] : memref<1x512xf32, #tpu.memory_space<vmem>>, vector<1x512xf32>
    %108 = vector.broadcast %107 : vector<1x512xf32> to vector<8x512xf32>
    %109 = arith.addf %106, %108 : vector<8x512xf32>
    %110 = vector.extract_strided_slice %109 {offsets = [0, 0], sizes = [8, 256], strides = [1, 1]} : vector<8x512xf32> to vector<8x256xf32>
    %111 = vector.extract_strided_slice %109 {offsets = [0, 256], sizes = [8, 256], strides = [1, 1]} : vector<8x512xf32> to vector<8x256xf32>
    %c2 = arith.constant 2 : index
    %c0_42 = arith.constant 0 : index
    %112 = vector.load %arg16[%c2, %c0_42] : memref<4x256xf32, #tpu.memory_space<vmem>>, vector<1x256xf32>
    %113 = arith.truncf %101 : vector<8x256xf32> to vector<8x256xbf16>
    %114 = arith.truncf %110 : vector<8x256xf32> to vector<8x256xbf16>
    %115 = arith.truncf %111 : vector<8x256xf32> to vector<8x256xbf16>
    %116 = vector.extract_strided_slice %113 {offsets = [0, 0], sizes = [8, 128], strides = [1, 1]} : vector<8x256xbf16> to vector<8x128xbf16>
    %117 = vector.shape_cast %116 : vector<8x128xbf16> to vector<1x8x128xbf16>
    %118 = vector.extract_strided_slice %114 {offsets = [0, 0], sizes = [8, 128], strides = [1, 1]} : vector<8x256xbf16> to vector<8x128xbf16>
    %119 = vector.shape_cast %118 : vector<8x128xbf16> to vector<1x8x128xbf16>
    %120 = vector.extract_strided_slice %115 {offsets = [0, 0], sizes = [8, 128], strides = [1, 1]} : vector<8x256xbf16> to vector<8x128xbf16>
    %121 = vector.shape_cast %120 : vector<8x128xbf16> to vector<1x8x128xbf16>
    "tpu.trace_start"() <{level = 10 : i32, message = "bqd,bkd->bqk"}> : () -> ()
    %cst_43 = arith.constant dense<0.000000e+00> : vector<1x8x8xf32>
    %122 = tpu.matmul %117, %119, %cst_43 {dimension_numbers = #tpu.dot_dimension_numbers<[2], [2], [1], [1], [0, 0, 0, 1, 1, 1], [0], [0]>} : vector<1x8x128xbf16>, vector<1x8x128xbf16>, vector<1x8x8xf32> -> vector<1x8x8xf32>
    "tpu.trace_stop"() : () -> ()
    %cst_44 = arith.constant dense<0xFF800000> : vector<1x8xf32>
    %123 = vector.multi_reduction <maximumf>, %122, %cst_44 [2] : vector<1x8x8xf32> to vector<1x8xf32>
    %124 = vector.shape_cast %123 : vector<1x8xf32> to vector<1x8x1xf32>
    %125 = vector.broadcast %124 : vector<1x8x1xf32> to vector<1x8x8xf32>
    %126 = arith.subf %122, %125 : vector<1x8x8xf32>
    %127 = math.exp %126 : vector<1x8x8xf32>
    %cst_45 = arith.constant dense<0.000000e+00> : vector<1x8xf32>
    %128 = vector.multi_reduction <add>, %127, %cst_45 [2] : vector<1x8x8xf32> to vector<1x8xf32>
    %129 = vector.shape_cast %128 : vector<1x8xf32> to vector<1x8x1xf32>
    %130 = vector.broadcast %129 : vector<1x8x1xf32> to vector<1x8x8xf32>
    %131 = arith.divf %127, %130 : vector<1x8x8xf32>
    %132 = arith.truncf %131 : vector<1x8x8xf32> to vector<1x8x8xbf16>
    "tpu.trace_start"() <{level = 10 : i32, message = "bqk,bkd->bqd"}> : () -> ()
    %cst_46 = arith.constant dense<0.000000e+00> : vector<1x8x128xf32>
    %133 = tpu.matmul %132, %121, %cst_46 {dimension_numbers = #tpu.dot_dimension_numbers<[2], [1], [1], [2], [0, 0, 0, 1, 1, 2], [0], [0]>} : vector<1x8x8xbf16>, vector<1x8x128xbf16>, vector<1x8x128xf32> -> vector<1x8x128xf32>
    "tpu.trace_stop"() : () -> ()
    %134 = vector.shape_cast %133 : vector<1x8x128xf32> to vector<8x128xf32>
    %135 = vector.extract_strided_slice %113 {offsets = [0, 128], sizes = [8, 128], strides = [1, 1]} : vector<8x256xbf16> to vector<8x128xbf16>
    %136 = vector.shape_cast %135 : vector<8x128xbf16> to vector<1x8x128xbf16>
    %137 = vector.extract_strided_slice %114 {offsets = [0, 128], sizes = [8, 128], strides = [1, 1]} : vector<8x256xbf16> to vector<8x128xbf16>
    %138 = vector.shape_cast %137 : vector<8x128xbf16> to vector<1x8x128xbf16>
    %139 = vector.extract_strided_slice %115 {offsets = [0, 128], sizes = [8, 128], strides = [1, 1]} : vector<8x256xbf16> to vector<8x128xbf16>
    %140 = vector.shape_cast %139 : vector<8x128xbf16> to vector<1x8x128xbf16>
    "tpu.trace_start"() <{level = 10 : i32, message = "bqd,bkd->bqk"}> : () -> ()
    %cst_47 = arith.constant dense<0.000000e+00> : vector<1x8x8xf32>
    %141 = tpu.matmul %136, %138, %cst_47 {dimension_numbers = #tpu.dot_dimension_numbers<[2], [2], [1], [1], [0, 0, 0, 1, 1, 1], [0], [0]>} : vector<1x8x128xbf16>, vector<1x8x128xbf16>, vector<1x8x8xf32> -> vector<1x8x8xf32>
    "tpu.trace_stop"() : () -> ()
    %cst_48 = arith.constant dense<0xFF800000> : vector<1x8xf32>
    %142 = vector.multi_reduction <maximumf>, %141, %cst_48 [2] : vector<1x8x8xf32> to vector<1x8xf32>
    %143 = vector.shape_cast %142 : vector<1x8xf32> to vector<1x8x1xf32>
    %144 = vector.broadcast %143 : vector<1x8x1xf32> to vector<1x8x8xf32>
    %145 = arith.subf %141, %144 : vector<1x8x8xf32>
    %146 = math.exp %145 : vector<1x8x8xf32>
    %cst_49 = arith.constant dense<0.000000e+00> : vector<1x8xf32>
    %147 = vector.multi_reduction <add>, %146, %cst_49 [2] : vector<1x8x8xf32> to vector<1x8xf32>
    %148 = vector.shape_cast %147 : vector<1x8xf32> to vector<1x8x1xf32>
    %149 = vector.broadcast %148 : vector<1x8x1xf32> to vector<1x8x8xf32>
    %150 = arith.divf %146, %149 : vector<1x8x8xf32>
    %151 = arith.truncf %150 : vector<1x8x8xf32> to vector<1x8x8xbf16>
    "tpu.trace_start"() <{level = 10 : i32, message = "bqk,bkd->bqd"}> : () -> ()
    %cst_50 = arith.constant dense<0.000000e+00> : vector<1x8x128xf32>
    %152 = tpu.matmul %151, %140, %cst_50 {dimension_numbers = #tpu.dot_dimension_numbers<[2], [1], [1], [2], [0, 0, 0, 1, 1, 2], [0], [0]>} : vector<1x8x8xbf16>, vector<1x8x128xbf16>, vector<1x8x128xf32> -> vector<1x8x128xf32>
    "tpu.trace_stop"() : () -> ()
    %153 = vector.shape_cast %152 : vector<1x8x128xf32> to vector<8x128xf32>
    %154 = tpu.concatenate %134, %153 in 1 : vector<8x128xf32>, vector<8x128xf32> -> vector<8x256xf32>
    %155 = arith.truncf %154 : vector<8x256xf32> to vector<8x256xbf16>
    %c0_51 = arith.constant 0 : index
    %c0_52 = arith.constant 0 : index
    %156 = vector.load %arg11[%c0_51, %c0_52] : memref<256x256xbf16, #tpu.memory_space<vmem>>, vector<256x256xbf16>
    %cst_53 = arith.constant dense<0.000000e+00> : vector<8x256xf32>
    %157 = tpu.matmul %155, %156, %cst_53 {dimension_numbers = #tpu.dot_dimension_numbers<[1], [0], [0], [1], [0, 0, 1, 1], [], []>} : vector<8x256xbf16>, vector<256x256xbf16>, vector<8x256xf32> -> vector<8x256xf32>
    %158 = vector.broadcast %112 : vector<1x256xf32> to vector<8x256xf32>
    %159 = arith.addf %157, %158 : vector<8x256xf32>
    %160 = vector.shape_cast %159 : vector<8x256xf32> to vector<1x8x256xf32>
    %161 = arith.addf %94, %160 : vector<1x8x256xf32>
    %cst_54 = arith.constant dense<0.000000e+00> : vector<1x8xf32>
    %162 = vector.multi_reduction <add>, %161, %cst_54 [2] : vector<1x8x256xf32> to vector<1x8xf32>
    %163 = vector.shape_cast %162 : vector<1x8xf32> to vector<1x8x1xf32>
    %cst_55 = arith.constant 2.560000e+02 : f32
    %164 = vector.broadcast %cst_55 : f32 to vector<1x8x1xf32>
    %165 = arith.divf %163, %164 : vector<1x8x1xf32>
    %166 = vector.broadcast %165 : vector<1x8x1xf32> to vector<1x8x256xf32>
    %167 = arith.subf %161, %166 : vector<1x8x256xf32>
    %168 = arith.mulf %167, %167 : vector<1x8x256xf32>
    %cst_56 = arith.constant dense<0.000000e+00> : vector<1x8xf32>
    %169 = vector.multi_reduction <add>, %168, %cst_56 [2] : vector<1x8x256xf32> to vector<1x8xf32>
    %170 = vector.shape_cast %169 : vector<1x8xf32> to vector<1x8x1xf32>
    %cst_57 = arith.constant 2.560000e+02 : f32
    %171 = vector.broadcast %cst_57 : f32 to vector<1x8x1xf32>
    %172 = arith.divf %170, %171 : vector<1x8x1xf32>
    %cst_58 = arith.constant 9.99999997E-7 : f32
    %173 = vector.broadcast %cst_58 : f32 to vector<1x8x1xf32>
    %174 = arith.addf %172, %173 : vector<1x8x1xf32>
    %175 = math.rsqrt %174 : vector<1x8x1xf32>
    %176 = vector.broadcast %175 : vector<1x8x1xf32> to vector<1x8x256xf32>
    %177 = arith.mulf %167, %176 : vector<1x8x256xf32>
    %cst_59 = arith.constant 1.000000e+00 : f32
    %178 = vector.broadcast %cst_59 : f32 to vector<1x1x256xf32>
    %179 = arith.addf %178, %9 : vector<1x1x256xf32>
    %180 = vector.broadcast %179 : vector<1x1x256xf32> to vector<1x8x256xf32>
    %181 = arith.mulf %177, %180 : vector<1x8x256xf32>
    %182 = vector.broadcast %8 : vector<1x1x256xf32> to vector<1x8x256xf32>
    %183 = arith.addf %181, %182 : vector<1x8x256xf32>
    %184 = vector.shape_cast %183 : vector<1x8x256xf32> to vector<8x256xf32>
    %185 = arith.truncf %184 : vector<8x256xf32> to vector<8x256xbf16>
    %c0_60 = arith.constant 0 : index
    %c0_61 = arith.constant 0 : index
    %186 = vector.load %arg12[%c0_60, %c0_61] : memref<256x1024xbf16, #tpu.memory_space<vmem>>, vector<256x1024xbf16>
    %cst_62 = arith.constant dense<0.000000e+00> : vector<8x1024xf32>
    %187 = tpu.matmul %185, %186, %cst_62 {dimension_numbers = #tpu.dot_dimension_numbers<[1], [0], [0], [1], [0, 0, 1, 1], [], []>} : vector<8x256xbf16>, vector<256x1024xbf16>, vector<8x1024xf32> -> vector<8x1024xf32>
    %c0_63 = arith.constant 0 : index
    %c0_64 = arith.constant 0 : index
    %188 = vector.load %arg14[%c0_63, %c0_64] : memref<2x1024xf32, #tpu.memory_space<vmem>>, vector<1x1024xf32>
    %189 = vector.broadcast %188 : vector<1x1024xf32> to vector<8x1024xf32>
    %190 = arith.addf %187, %189 : vector<8x1024xf32>
    %c0_65 = arith.constant 0 : index
    %c0_66 = arith.constant 0 : index
    %191 = vector.load %arg13[%c0_65, %c0_66] : memref<256x1024xbf16, #tpu.memory_space<vmem>>, vector<256x1024xbf16>
    %cst_67 = arith.constant dense<0.000000e+00> : vector<8x1024xf32>
    %192 = tpu.matmul %185, %191, %cst_67 {dimension_numbers = #tpu.dot_dimension_numbers<[1], [0], [0], [1], [0, 0, 1, 1], [], []>} : vector<8x256xbf16>, vector<256x1024xbf16>, vector<8x1024xf32> -> vector<8x1024xf32>
    %c1_68 = arith.constant 1 : index
    %c0_69 = arith.constant 0 : index
    %193 = vector.load %arg14[%c1_68, %c0_69] : memref<2x1024xf32, #tpu.memory_space<vmem>>, vector<1x1024xf32>
    %194 = vector.broadcast %193 : vector<1x1024xf32> to vector<8x1024xf32>
    %195 = arith.addf %192, %194 : vector<8x1024xf32>
    %cst_70 = arith.constant 5.000000e-01 : f32
    %196 = vector.broadcast %cst_70 : f32 to vector<8x1024xf32>
    %197 = arith.mulf %196, %195 : vector<8x1024xf32>
    %cst_71 = arith.constant 4.471500e-02 : f32
    %198 = vector.broadcast %cst_71 : f32 to vector<8x1024xf32>
    %199 = arith.mulf %198, %195 : vector<8x1024xf32>
    %200 = arith.mulf %199, %195 : vector<8x1024xf32>
    %201 = arith.mulf %200, %195 : vector<8x1024xf32>
    %202 = arith.addf %195, %201 : vector<8x1024xf32>
    %cst_72 = arith.constant 0.797884583 : f32
    %203 = vector.broadcast %cst_72 : f32 to vector<8x1024xf32>
    %204 = arith.mulf %203, %202 : vector<8x1024xf32>
    %205 = math.tanh %204 : vector<8x1024xf32>
    %cst_73 = arith.constant 1.000000e+00 : f32
    %206 = vector.broadcast %cst_73 : f32 to vector<8x1024xf32>
    %207 = arith.addf %206, %205 : vector<8x1024xf32>
    %208 = arith.mulf %197, %207 : vector<8x1024xf32>
    %209 = arith.mulf %190, %208 : vector<8x1024xf32>
    %210 = arith.truncf %209 : vector<8x1024xf32> to vector<8x1024xbf16>
    %c0_74 = arith.constant 0 : index
    %c0_75 = arith.constant 0 : index
    %211 = vector.load %arg15[%c0_74, %c0_75] : memref<1024x256xbf16, #tpu.memory_space<vmem>>, vector<1024x256xbf16>
    %cst_76 = arith.constant dense<0.000000e+00> : vector<8x256xf32>
    %212 = tpu.matmul %210, %211, %cst_76 {dimension_numbers = #tpu.dot_dimension_numbers<[1], [0], [0], [1], [0, 0, 1, 1], [], []>} : vector<8x1024xbf16>, vector<1024x256xbf16>, vector<8x256xf32> -> vector<8x256xf32>
    %c3 = arith.constant 3 : index
    %c0_77 = arith.constant 0 : index
    %213 = vector.load %arg16[%c3, %c0_77] : memref<4x256xf32, #tpu.memory_space<vmem>>, vector<1x256xf32>
    %214 = vector.broadcast %213 : vector<1x256xf32> to vector<8x256xf32>
    %215 = arith.addf %212, %214 : vector<8x256xf32>
    %216 = vector.shape_cast %215 : vector<8x256xf32> to vector<1x8x256xf32>
    %217 = vector.broadcast %10 : vector<1x1x256xf32> to vector<1x8x256xf32>
    %218 = arith.mulf %217, %216 : vector<1x8x256xf32>
    %219 = arith.addf %183, %218 : vector<1x8x256xf32>
    %c0_78 = arith.constant 0 : index
    %c0_79 = arith.constant 0 : index
    %c0_80 = arith.constant 0 : index
    %220 = vector.load %arg17[%c0_78, %c0_79, %c0_80] : memref<1x8x256xf32, #tpu.memory_space<vmem>>, vector<1x8x256xf32>
    tpu.vector_store %arg17[%c0_78, %c0_79, %c0_80], %219 {strides = array<i32>} : memref<1x8x256xf32, #tpu.memory_space<vmem>>, vector<1x8x256xf32>,
    return
  }
  func.func @transform_0(%arg0: i32) -> (i32, i32, i32) {
    %c0_i32 = arith.constant 0 : i32
    %c0_i32_0 = arith.constant 0 : i32
    %c0_i32_1 = arith.constant 0 : i32
    return %arg0, %c0_i32, %c0_i32_0 : i32, i32, i32
  }
  func.func @transform_1(%arg0: i32) -> (i32, i32, i32) {
    %c0_i32 = arith.constant 0 : i32
    %c0_i32_0 = arith.constant 0 : i32
    %c0_i32_1 = arith.constant 0 : i32
    return %arg0, %c0_i32, %c0_i32_0 : i32, i32, i32
  }
  func.func @transform_2(%arg0: i32) -> (i32, i32, i32) {
    %c0_i32 = arith.constant 0 : i32
    %c0_i32_0 = arith.constant 0 : i32
    %c0_i32_1 = arith.constant 0 : i32
    return %arg0, %c0_i32, %c0_i32_0 : i32, i32, i32
  }
  func.func @transform_3(%arg0: i32) -> (i32, i32) {
    %c0_i32 = arith.constant 0 : i32
    %c0_i32_0 = arith.constant 0 : i32
    %c0_i32_1 = arith.constant 0 : i32
    return %c0_i32, %c0_i32_0 : i32, i32
  }
  func.func @transform_4(%arg0: i32) -> (i32, i32) {
    %c0_i32 = arith.constant 0 : i32
    %c0_i32_0 = arith.constant 0 : i32
    %c0_i32_1 = arith.constant 0 : i32
    return %c0_i32, %c0_i32_0 : i32, i32
  }
  func.func @transform_5(%arg0: i32) -> (i32, i32) {
    %c0_i32 = arith.constant 0 : i32
    %c0_i32_0 = arith.constant 0 : i32
    %c0_i32_1 = arith.constant 0 : i32
    return %c0_i32, %c0_i32_0 : i32, i32
  }
  func.func @transform_6(%arg0: i32) -> (i32, i32) {
    %c0_i32 = arith.constant 0 : i32
    %c0_i32_0 = arith.constant 0 : i32
    %c0_i32_1 = arith.constant 0 : i32
    return %c0_i32, %c0_i32_0 : i32, i32
  }
  func.func @transform_7(%arg0: i32) -> (i32, i32) {
    %c0_i32 = arith.constant 0 : i32
    %c0_i32_0 = arith.constant 0 : i32
    %c0_i32_1 = arith.constant 0 : i32
    return %c0_i32, %c0_i32_0 : i32, i32
  }
  func.func @transform_8(%arg0: i32) -> (i32, i32) {
    %c0_i32 = arith.constant 0 : i32
    %c0_i32_0 = arith.constant 0 : i32
    %c0_i32_1 = arith.constant 0 : i32
    return %c0_i32, %c0_i32_0 : i32, i32
  }
  func.func @transform_9(%arg0: i32) -> (i32, i32) {
    %c0_i32 = arith.constant 0 : i32
    %c0_i32_0 = arith.constant 0 : i32
    %c0_i32_1 = arith.constant 0 : i32
    return %c0_i32, %c0_i32_0 : i32, i32
  }
  func.func @transform_10(%arg0: i32) -> (i32, i32) {
    %c0_i32 = arith.constant 0 : i32
    %c0_i32_0 = arith.constant 0 : i32
    %c0_i32_1 = arith.constant 0 : i32
    return %c0_i32, %c0_i32_0 : i32, i32
  }
  func.func @transform_11(%arg0: i32) -> (i32, i32) {
    %c0_i32 = arith.constant 0 : i32
    %c0_i32_0 = arith.constant 0 : i32
    %c0_i32_1 = arith.constant 0 : i32
    return %c0_i32, %c0_i32_0 : i32, i32
  }
  func.func @transform_12(%arg0: i32) -> (i32, i32) {
    %c0_i32 = arith.constant 0 : i32
    %c0_i32_0 = arith.constant 0 : i32
    %c0_i32_1 = arith.constant 0 : i32
    return %c0_i32, %c0_i32_0 : i32, i32
  }
  func.func @transform_13(%arg0: i32) -> (i32, i32) {
    %c0_i32 = arith.constant 0 : i32
    %c0_i32_0 = arith.constant 0 : i32
    %c0_i32_1 = arith.constant 0 : i32
    return %c0_i32, %c0_i32_0 : i32, i32
  }
  func.func @transform_14(%arg0: i32) -> (i32, i32) {
    %c0_i32 = arith.constant 0 : i32
    %c0_i32_0 = arith.constant 0 : i32
    %c0_i32_1 = arith.constant 0 : i32
    return %c0_i32, %c0_i32_0 : i32, i32
  }
  func.func @transform_15(%arg0: i32) -> (i32, i32) {
    %c0_i32 = arith.constant 0 : i32
    %c0_i32_0 = arith.constant 0 : i32
    %c0_i32_1 = arith.constant 0 : i32
    return %c0_i32, %c0_i32_0 : i32, i32
  }
  func.func @transform_16(%arg0: i32) -> (i32, i32, i32) {
    %c0_i32 = arith.constant 0 : i32
    %c0_i32_0 = arith.constant 0 : i32
    %c0_i32_1 = arith.constant 0 : i32
    return %arg0, %c0_i32, %c0_i32_0 : i32, i32, i32
  }
}

</mosaic_0001>

<bundles_post_ra>
// kernel: tpu_custom_call.1
= control target key start
LH: loop header
LB: loop body
LE: loop exit
PB: predicated region body
PF: predicated region fallthrough
CT: control target
= control target key end

     0   :  { %s9163_s0 = inlined_call_operand.vmem [shape: f32[2,8,256], index: 0, kind: input, shape index: {}]   ;;  %s9164_s1 = inlined_call_operand.hbm [shape: f32[2,8,256], index: 1, kind: input, shape index: {}]   ;;  %s9165_s2 = inlined_call_operand.vmem [shape: f32[2,6,256], index: 2, kind: input, shape index: {}]   ;;  %s9166_s3 = inlined_call_operand.vmem [shape: f32[6,256], index: 3, kind: input, shape index: {}]   ;;  %s9167_s4 = inlined_call_operand.hbm [shape: bf16[256,768], index: 4, kind: input, shape index: {}]   ;;  %s9168_s5 = inlined_call_operand.hbm [shape: f32[1,768], index: 5, kind: input, shape index: {}]   ;;  %s9169_s6 = inlined_call_operand.hbm [shape: bf16[256,256], index: 6, kind: input, shape index: {}]   ;;  %s9170_s7 = inlined_call_operand.hbm [shape: bf16[256,256], index: 7, kind: input, shape index: {}]   ;;  %s9171_s8 = inlined_call_operand.hbm [shape: bf16[256,512], index: 8, kind: input, shape index: {}]   ;;  %s9172_s9 = inlined_call_operand.vmem [shape: f32[1,512], index: 9, kind: input, shape index: {}]   ;;  %s9173_s10 = inlined_call_operand.hbm [shape: bf16[256,256], index: 10, kind: input, shape index: {}]   ;;  %s9174_s11 = inlined_call_operand.hbm [shape: bf16[256,1024], index: 11, kind: input, shape index: {}]   ;;  %s9175_s12 = inlined_call_operand.hbm [shape: bf16[256,1024], index: 12, kind: input, shape index: {}]   ;;  %s9176_s13 = inlined_call_operand.vmem [shape: f32[2,1024], index: 13, kind: input, shape index: {}]   ;;  %s9177_s14 = inlined_call_operand.hbm [shape: bf16[1024,256], index: 14, kind: input, shape index: {}]   ;;  %s9178_s15 = inlined_call_operand.vmem [shape: f32[4,256], index: 15, kind: input, shape index: {}]   ;;  %s9179_s16 = inlined_call_operand.hbm [shape: f32[2,8,256], index: 16, kind: output, shape index: {}]  }
   0x1   :  { %9194 = sst [smem:[#allocation28_spill]] %s9163_s0 }
   0x2   :  { %9195 = sst [smem:[#allocation29_spill]] %s9164_s1 }
   0x3   :  { %9196 = sst [smem:[#allocation30_spill]] %s9165_s2 }
   0x4   :  { %9197 = sst [smem:[#allocation31_spill]] %s9166_s3 }
   0x5   :  { %9198 = sst [smem:[#allocation32_spill]] %s9167_s4 }
   0x6   :  { %9199 = sst [smem:[#allocation33_spill]] %s9168_s5 }
   0x7   :  { %9200 = sst [smem:[#allocation34_spill]] %s9172_s9 }
   0x8   :  { %9201 = sst [smem:[#allocation35_spill]] %s9176_s13 }
   0x9   :  { %9202 = sst [smem:[#allocation36_spill]] %s9178_s15 }
   0xa   :  { %9203 = sst [smem:[#allocation37_spill]] %s9179_s16 }
   0xb   :  { %21 = vsyncpa [#allocation3], 0 }
   0xc   :  { %23 = vsyncpa [#allocation3 + $0x1], 0 }
   0xd   :  { %24 = vsyncpa [#allocation6], 0 }
   0xe   :  { %25 = vsyncpa [#allocation9], 0 }
   0xf   :  { %26 = vsyncpa [#allocation12], 0 }
  0x10   :  { %27 = vsyncpa [#allocation15], 0 }
  0x11   :  { %28 = vsyncpa [#allocation18], 0 }
  0x12   :  { %29 = vsyncpa [#allocation4], 0 }
  0x13   :  { %31 = vsyncpa [#allocation4 + $0x1], 0  ;;  %s8373_s21 = smov 0   ;;  %s8375_s22 = smov 0  }
  0x14   :  { %s8377_s23 = smov 0   ;;  %s8379_s24 = smov 0  }
  0x15 LB: > { %s8267_s25 = smov [#allocation5]   ;;  %s8394_s27 = sadd.s32 4294967295, %s8265_s24   ;;  %s8265_s24 = sphi %s8379_s24, %s9245_s24   ;;  %s8261_s23 = sphi %s8377_s23, %s9244_s23   ;;  %s8257_s22 = sphi %s8375_s22, %s9243_s22   ;;  %s8253_s21 = sphi %s8373_s21, %s9242_s21  }
  0x16   : > { %s434_s26 = sshll.u32 %s8267_s25, 4  ;;  %p6373_p0 = scmp.ge.s32.totalorder %s8265_s24, 1  ;;  %s8399_s26 = int_to_ptr.vmem [resolvable:$true] %s434_s26 }
  0x17   : > { %p9185_p1 = scmp.eq.s32.totalorder %s8394_s27, 0  ;;  %p419_p2 = scmp.lt.s32.totalorder %s8265_s24, 3 }
  0x18   : > { %s8268_s29 = smov [#allocation8]   ;;  %s8269_s17 = smov [#allocation11]  }
  0x19   : > { %p8401_p3 = pnand %p6373_p0, %p419_p2  ;;  %s458_s30 = sshll.u32 %s8268_s29, 4  ;;  %s8414_s30 = int_to_ptr.vmem [resolvable:$true] %s458_s30 }
  0x1a   : > { %s8416_s18 = sshll.u32 %s8269_s17, 4  ;;  %s9207_s4 = sld [smem:[#allocation32_spill]]  ;;  %s485_s18 = int_to_ptr.vmem [resolvable:$true] %s8416_s18 }
  0x1b   : > { %s9204_s28 = scalar_select %p8401_p3, 1, 0 }
  0x1c   : > { %p7178_p5 = pneg %p8401_p3 }
  0x1d   : > { %9205 = sst [smem:[#allocation27_spill]] %s9204_s28 }
  0x1e   : > { %p8410_p6 = pnand %p7178_p5, %p9185_p1 }
  0x20   : > { %s7897_s25 = scalar_lea.hbm %s9207_s4, 12288  ;;  %p8426_p8 = pneg %p8410_p6 }
  0x21   : > { %p7898_p7 = scmp.ne.s32.totalorder %s9207_s4, %s7897_s25  ;;  %p7904_p11 = scmp.lt.u32.totalorder %s7897_s25, %s9207_s4 }
  0x23   : > { %p7900_p9 = pnand %p8426_p8, %p7898_p7 }
  0x25   : > { %p7901_p10 = pneg %p7900_p9 }
  0x27   : > { %p7906_p12 = pnand %p7904_p11, %p7901_p10 }
  0x29   : > { %7909 = shalt.err (!%p7906_p12)
}
  0x2a   : > { %s7910_s13 = scalar_lea.vmem %s8399_s26, 12288  ;;  %p7918_p5 = scmp.lt.s32.totalorder %s8399_s26, %s8399_s26 }
  0x2b   : > { %p7911_p13 = scmp.ne.s32.totalorder %s8399_s26, %s7910_s13  ;;  %p7919_p4 = scmp.lt.s32.totalorder %s7910_s13, %s7910_s13 }
  0x2d   : > { %p7913_p0 = pnand %p7911_p13, %p8426_p8  ;;  %p7920_p7 = por %p7919_p4, %p7918_p5 }
  0x2f   : > { %p7914_p2 = pneg %p7913_p0 }
  0x31   : > { %p7921_p9 = pnand %p7920_p7, %p7914_p2 }
  0x33   : > { %7924 = shalt.err (!%p7921_p9)
}
  0x34   : > { %s8270_s16 = smov 384   ;;  %s8271_s9 = smov 24  }
  0x35   : > { %7181 = dma.hbm_to_vmem [thread:$0]  (!%p8410_p6), %s9207_s4, 12288, %s8399_s26, [#allocation6], %s8270_s16, %s8270_s16, %s8271_s9  }
  0x36   : > { %s7925_s15 = scalar_lea.hbm %s9169_s6, 4096 }
  0x37   : > { %p7926_p4 = scmp.ne.s32.totalorder %s9169_s6, %s7925_s15  ;;  %p7932_p12 = scmp.lt.u32.totalorder %s7925_s15, %s9169_s6 }
  0x39   : > { %p7928_p10 = pnand %p7926_p4, %p8426_p8 }
  0x3b   : > { %p7929_p11 = pneg %p7928_p10 }
  0x3d   : > { %p7934_p13 = pnand %p7932_p12, %p7929_p11 }
  0x3f   : > { %7937 = shalt.err (!%p7934_p13)
}
  0x40   : > { %s7938_s26 = scalar_lea.vmem %s8414_s30, 4096  ;;  %p7946_p7 = scmp.lt.s32.totalorder %s8414_s30, %s8414_s30 }
  0x41   : > { %p7939_p0 = scmp.ne.s32.totalorder %s8414_s30, %s7938_s26  ;;  %p7947_p9 = scmp.lt.s32.totalorder %s7938_s26, %s7938_s26 }
  0x43   : > { %p7941_p2 = pnand %p7939_p0, %p8426_p8  ;;  %p7948_p4 = por %p7947_p9, %p7946_p7 }
  0x45   : > { %p7942_p5 = pneg %p7941_p2 }
  0x47   : > { %p7949_p10 = pnand %p7948_p4, %p7942_p5 }
  0x49   : > { %7952 = shalt.err (!%p7949_p10)
}
  0x4a   : > { %s9187_s2 = smov 128   ;;  %s9189_s3 = smov 8  }
  0x4b   : > { %7187 = dma.hbm_to_vmem [thread:$0]  (!%p8410_p6), %s9169_s6, 4096, %s8414_s30, [#allocation9], %s9187_s2, %s9187_s2, %s9189_s3  }
  0x4c   : > { %s7953_s19 = scalar_lea.hbm %s9171_s8, 8192 }
  0x4d   : > { %p7954_p11 = scmp.ne.s32.totalorder %s9171_s8, %s7953_s19  ;;  %p7960_p0 = scmp.lt.u32.totalorder %s7953_s19, %s9171_s8 }
  0x4f   : > { %p7956_p12 = pnand %p7954_p11, %p8426_p8 }
  0x51   : > { %p7957_p13 = pneg %p7956_p12 }
  0x53   : > { %p7962_p2 = pnand %p7960_p0, %p7957_p13 }
  0x55   : > { %7965 = shalt.err (!%p7962_p2)
}
  0x56   : > { %s7966_s26 = scalar_lea.vmem %s485_s18, 8192  ;;  %p7974_p4 = scmp.lt.s32.totalorder %s485_s18, %s485_s18 }
  0x57   : > { %p7967_p5 = scmp.ne.s32.totalorder %s485_s18, %s7966_s26  ;;  %p7975_p10 = scmp.lt.s32.totalorder %s7966_s26, %s7966_s26 }
  0x59   : > { %p7969_p7 = pnand %p7967_p5, %p8426_p8  ;;  %p7976_p1 = por %p7975_p10, %p7974_p4 }
  0x5b   : > { %p7970_p9 = pneg %p7969_p7 }
  0x5d   : > { %p7977_p3 = pnand %p7976_p1, %p7970_p9 }
  0x5f   : > { %7980 = shalt.err (!%p7977_p3)
}
  0x60   : > { %s8274_s30 = smov 256   ;;  %s8275_s15 = smov 16  }
  0x61   : > { %7193 = dma.hbm_to_vmem [thread:$0]  (!%p8410_p6), %s9171_s8, 8192, %s485_s18, [#allocation12], %s8274_s30, %s8274_s30, %s8275_s15  }
  0x62   : > { %s8276_s9 = smov [#allocation14]   ;;  %s7981_s17 = scalar_lea.hbm %s9174_s11, 16384 }
  0x63   : > { %s513_s19 = sshll.u32 %s8276_s9, 4  ;;  %p7982_p1 = scmp.ne.s32.totalorder %s9174_s11, %s7981_s17  ;;  %s514_s19 = int_to_ptr.vmem [resolvable:$true] %s513_s19 }
  0x64   : > { %p7988_p12 = scmp.lt.u32.totalorder %s7981_s17, %s9174_s11 }
  0x65   : > { %p7984_p3 = pnand %p7982_p1, %p8426_p8 }
  0x67   : > { %p7985_p11 = pneg %p7984_p3 }
  0x69   : > { %p7990_p13 = pnand %p7988_p12, %p7985_p11 }
  0x6b   : > { %7993 = shalt.err (!%p7990_p13)
}
  0x6c   : > { %s7994_s18 = scalar_lea.vmem %s514_s19, 16384  ;;  %p8002_p7 = scmp.lt.s32.totalorder %s514_s19, %s514_s19 }
  0x6d   : > { %p7995_p0 = scmp.ne.s32.totalorder %s514_s19, %s7994_s18  ;;  %p8003_p9 = scmp.lt.s32.totalorder %s7994_s18, %s7994_s18 }
  0x6f   : > { %p7997_p2 = pnand %p7995_p0, %p8426_p8  ;;  %p8004_p4 = por %p8003_p9, %p8002_p7 }
  0x71   : > { %p7998_p5 = pneg %p7997_p2 }
  0x73   : > { %p8005_p10 = pnand %p8004_p4, %p7998_p5 }
  0x75   : > { %8008 = shalt.err (!%p8005_p10)
}
  0x76   : > { %s9191_s30 = smov 512   ;;  %s9192_s15 = smov 32  }
  0x77   : > { %7199 = dma.hbm_to_vmem [thread:$0]  (!%p8410_p6), %s9174_s11, 16384, %s514_s19, [#allocation15], %s9191_s30, %s9191_s30, %s9192_s15  }
  0x78   : > { %s8279_s28 = smov [#allocation7]   ;;  %s8280_s9 = smov [#allocation10]  }
  0x79   : > { %s448_s16 = sshll.u32 %s8279_s28, 4  ;;  %s471_s20 = sshll.u32 %s8280_s9, 4  ;;  %s449_s16 = int_to_ptr.vmem [resolvable:$true] %s448_s16  ;;  %s8513_s20 = int_to_ptr.vmem [resolvable:$true] %s471_s20 }
  0x7a   : > { %s9209_s5 = sld [smem:[#allocation33_spill]] }
  0x80   : > { %s8009_s13 = scalar_lea.hbm %s9209_s5, 96 }
  0x81   : > { %p8010_p1 = scmp.ne.s32.totalorder %s9209_s5, %s8009_s13  ;;  %p8016_p12 = scmp.lt.u32.totalorder %s8009_s13, %s9209_s5 }
  0x83   : > { %p8012_p3 = pnand %p8010_p1, %p8426_p8 }
  0x85   : > { %p8013_p11 = pneg %p8012_p3 }
  0x87   : > { %p8018_p13 = pnand %p8016_p12, %p8013_p11 }
  0x89   : > { %8021 = shalt.err (!%p8018_p13)
}
  0x8a   : > { %s8022_s3 = scalar_lea.vmem %s449_s16, 96  ;;  %p8030_p7 = scmp.lt.s32.totalorder %s449_s16, %s449_s16 }
  0x8b   : > { %p8023_p0 = scmp.ne.s32.totalorder %s449_s16, %s8022_s3  ;;  %p8031_p9 = scmp.lt.s32.totalorder %s8022_s3, %s8022_s3 }
  0x8d   : > { %p8025_p2 = pnand %p8023_p0, %p8426_p8  ;;  %p8032_p4 = por %p8031_p9, %p8030_p7 }
  0x8f   : > { %p8026_p5 = pneg %p8025_p2 }
  0x91   : > { %p8033_p10 = pnand %p8032_p4, %p8026_p5 }
  0x93   : > { %8036 = shalt.err (!%p8033_p10)
}
  0x94   : > { %7184 = dma.hbm_to_vmem [thread:$0]  (!%p8410_p6), %s9209_s5, 96, %s449_s16, [#allocation6]  }
  0x95   : > { %s8037_s13 = scalar_lea.hbm %s9170_s7, 4096 }
  0x96   : > { %p8038_p1 = scmp.ne.s32.totalorder %s9170_s7, %s8037_s13  ;;  %p8044_p12 = scmp.lt.u32.totalorder %s8037_s13, %s9170_s7 }
  0x98   : > { %p8040_p3 = pnand %p8038_p1, %p8426_p8 }
  0x9a   : > { %p8041_p11 = pneg %p8040_p3 }
  0x9c   : > { %p8046_p13 = pnand %p8044_p12, %p8041_p11 }
  0x9e   : > { %8049 = shalt.err (!%p8046_p13)
}
  0x9f   : > { %s8050_s16 = scalar_lea.vmem %s8513_s20, 4096  ;;  %p8058_p7 = scmp.lt.s32.totalorder %s8513_s20, %s8513_s20 }
  0xa0   : > { %p8051_p0 = scmp.ne.s32.totalorder %s8513_s20, %s8050_s16  ;;  %p8059_p9 = scmp.lt.s32.totalorder %s8050_s16, %s8050_s16 }
  0xa2   : > { %p8053_p2 = pnand %p8051_p0, %p8426_p8  ;;  %p8060_p4 = por %p8059_p9, %p8058_p7 }
  0xa4   : > { %p8054_p5 = pneg %p8053_p2 }
  0xa6   : > { %p8061_p10 = pnand %p8060_p4, %p8054_p5 }
  0xa8   : > { %8064 = shalt.err (!%p8061_p10)
}
  0xa9   : > { %s9210_s3 = smov 8   ;;  %s9211_s28 = smov 128  }
  0xaa   : > { %7190 = dma.hbm_to_vmem [thread:$0]  (!%p8410_p6), %s9170_s7, 4096, %s8513_s20, [#allocation9], %s9211_s28, %s9211_s28, %s9210_s3  }
  0xab   : > { %s8281_s17 = smov [#allocation13]   ;;  %s8282_s26 = smov [#allocation16]  }
  0xac   : > { %s500_s13 = sshll.u32 %s8281_s17, 4  ;;  %s526_s18 = sshll.u32 %s8282_s26, 4  ;;  %s501_s13 = int_to_ptr.vmem [resolvable:$true] %s500_s13  ;;  %s8559_s18 = int_to_ptr.vmem [resolvable:$true] %s526_s18 }
  0xad   : > { %s8065_s16 = scalar_lea.hbm %s9173_s10, 4096 }
  0xae   : > { %p8066_p1 = scmp.ne.s32.totalorder %s9173_s10, %s8065_s16  ;;  %p8072_p12 = scmp.lt.u32.totalorder %s8065_s16, %s9173_s10 }
  0xb0   : > { %p8068_p3 = pnand %p8066_p1, %p8426_p8 }
  0xb2   : > { %p8069_p11 = pneg %p8068_p3 }
  0xb4   : > { %p8074_p13 = pnand %p8072_p12, %p8069_p11 }
  0xb6   : > { %8077 = shalt.err (!%p8074_p13)
}
  0xb7   : > { %s8078_s25 = scalar_lea.vmem %s501_s13, 4096  ;;  %p8086_p7 = scmp.lt.s32.totalorder %s501_s13, %s501_s13 }
  0xb8   : > { %p8079_p0 = scmp.ne.s32.totalorder %s501_s13, %s8078_s25  ;;  %p8087_p9 = scmp.lt.s32.totalorder %s8078_s25, %s8078_s25 }
  0xba   : > { %p8081_p2 = pnand %p8079_p0, %p8426_p8  ;;  %p8088_p4 = por %p8087_p9, %p8086_p7 }
  0xbc   : > { %p8082_p5 = pneg %p8081_p2 }
  0xbe   : > { %p8089_p10 = pnand %p8088_p4, %p8082_p5 }
  0xc0   : > { %8092 = shalt.err (!%p8089_p10)
}
  0xc1   : > { %7196 = dma.hbm_to_vmem [thread:$0]  (!%p8410_p6), %s9173_s10, 4096, %s501_s13, [#allocation12], %s9211_s28, %s9211_s28, %s9210_s3  }
  0xc2   : > { %s8093_s2 = scalar_lea.hbm %s9175_s12, 16384 }
  0xc3   : > { %p8094_p1 = scmp.ne.s32.totalorder %s9175_s12, %s8093_s2  ;;  %p8100_p12 = scmp.lt.u32.totalorder %s8093_s2, %s9175_s12 }
  0xc5   : > { %p8096_p3 = pnand %p8094_p1, %p8426_p8 }
  0xc7   : > { %p8097_p11 = pneg %p8096_p3 }
  0xc9   : > { %p8102_p13 = pnand %p8100_p12, %p8097_p11 }
  0xcb   : > { %8105 = shalt.err (!%p8102_p13)
}
  0xcc   : > { %s8106_s13 = scalar_lea.vmem %s8559_s18, 16384  ;;  %p8114_p7 = scmp.lt.s32.totalorder %s8559_s18, %s8559_s18 }
  0xcd   : > { %p8107_p0 = scmp.ne.s32.totalorder %s8559_s18, %s8106_s13  ;;  %p8115_p9 = scmp.lt.s32.totalorder %s8106_s13, %s8106_s13 }
  0xcf   : > { %p8109_p2 = pnand %p8107_p0, %p8426_p8  ;;  %p8116_p4 = por %p8115_p9, %p8114_p7 }
  0xd1   : > { %p8110_p5 = pneg %p8109_p2 }
  0xd3   : > { %p8117_p10 = pnand %p8116_p4, %p8110_p5 }
  0xd5   : > { %8120 = shalt.err (!%p8117_p10)
}
  0xd6   : > { %s9212_s25 = smov 32   ;;  %s9213_s30 = smov 512  }
  0xd7   : > { %7202 = dma.hbm_to_vmem [thread:$0]  (!%p8410_p6), %s9175_s12, 16384, %s8559_s18, [#allocation15], %s9213_s30, %s9213_s30, %s9212_s25  }
  0xd8   : > { %s8283_s26 = smov [#allocation17]   ;;  %s8121_s9 = scalar_lea.hbm %s9177_s14, 16384 }
  0xd9   : > { %s542_s2 = sshll.u32 %s8283_s26, 4  ;;  %p8122_p1 = scmp.ne.s32.totalorder %s9177_s14, %s8121_s9  ;;  %s543_s2 = int_to_ptr.vmem [resolvable:$true] %s542_s2 }
  0xda   : > { %p8128_p12 = scmp.lt.u32.totalorder %s8121_s9, %s9177_s14 }
  0xdb   : > { %p8124_p3 = pnand %p8122_p1, %p8426_p8 }
  0xdd   : > { %p8125_p11 = pneg %p8124_p3 }
  0xdf   : > { %p8130_p13 = pnand %p8128_p12, %p8125_p11 }
  0xe1   : > { %8133 = shalt.err (!%p8130_p13)
}
  0xe2   : > { %s8134_s18 = scalar_lea.vmem %s543_s2, 16384  ;;  %p8142_p7 = scmp.lt.s32.totalorder %s543_s2, %s543_s2 }
  0xe3   : > { %p8135_p0 = scmp.ne.s32.totalorder %s543_s2, %s8134_s18  ;;  %p8143_p9 = scmp.lt.s32.totalorder %s8134_s18, %s8134_s18 }
  0xe5   : > { %p8137_p2 = pnand %p8135_p0, %p8426_p8  ;;  %p8144_p4 = por %p8143_p9, %p8142_p7 }
  0xe7   : > { %p8138_p5 = pneg %p8137_p2 }
  0xe9   : > { %p8145_p10 = pnand %p8144_p4, %p8138_p5 }
  0xeb   : > { %8148 = shalt.err (!%p8145_p10)
}
  0xec   : > { %7205 = dma.hbm_to_vmem [thread:$0]  (!%p8410_p6), %s9177_s14, 16384, %s543_s2, [#allocation18], %s9211_s28, %s9211_s28, %s9210_s3  }
  0xed   : > { %s6372_s0 = sadd.s32 4294967294, %s8265_s24   ;;  %s8631_s29 = sadd.s32 1, %s8265_s24  }
  0xee   : > { %s70_s25 = sadd.s32 1, %s8261_s23  ;;  %s67_s30 = ssub.s32 %s8265_s24, %s8631_s29 }
  0xef   : > { %p77_p8 = scmp.ne.s32.totalorder %s8261_s23, %s8257_s22  ;;  %p68_p1 = scmp.eq.s32.totalorder %s67_s30, 0 }
  0xf0   : > { %p78_p3 = scmp.eq.s32.totalorder %s8265_s24, 0  ;;  %p83_p11 = scmp.ne.s32.totalorder %s8257_s22, %s8253_s21 }
  0xf1   : > { %p406_p12 = scmp.eq.s32.totalorder %s8394_s27, 1  ;;  %p9214_p0 = scmp.eq.s32.totalorder %s8394_s27, 0 }
  0xf2   : > { %s8643_s15 = scalar_select %p68_p1, %s8261_s23, %s70_s25  }
  0xf3   : > { %p79_p13 = por %p78_p3, %p77_p8  ;;  %p8647_p2 = por %p9214_p0, %p83_p11 }
  0xf4   : > { %p8651_p6 = por %p406_p12, %p77_p8  ;;  %p412_p5 = scmp.eq.s32.totalorder %s6372_s0, 1 }
  0xf5   : > { %p7223_p7 = scmp.lt.s32.totalorder %s8265_s24, 2  ;;  %s567_s28 = sand.u32 1, %s8261_s23  }
  0xf6   : > { %s9216_s3 = scalar_select %p8651_p6, 1, 0 }
  0xf7   : > { %p8657_p9 = por %p412_p5, %p83_p11  ;;  %s6384_s2 = sshll.u32 %s567_s28, 4 }
  0xf8   : > { %s7056_s19 = sshll.u32 %s8265_s24, 8  ;;  %s9218_s1 = sld [smem:[#allocation29_spill]] }
  0xf9   : > { %s9217_s26 = scalar_select %p8657_p9, 1, 0 }
  0xfa   : > { %s571_s13 = scalar_lea.vmem [#allocation2], %s6384_s2  ;;  %p8667_p4 = pnand %p7223_p7, %p79_p13 }
  0xfb   : > { %s579_s18 = sshll.u32 %s571_s13, 4  ;;  %s568_s5 = scalar_lea.sflag [#allocation3], %s567_s28  ;;  %s8671_s18 = int_to_ptr.vmem [resolvable:$true] %s579_s18 }
  0xfc   : > { %p8151_p8 = pneg %p8667_p4 }
  0xfe   : > { %s8665_s20 = scalar_lea.hbm %s9218_s1, %s7056_s19  ;;  %s8154_s2 = scalar_lea.hbm %s9218_s1, 512 }
  0xff   : > { %s8149_s0 = scalar_lea.hbm %s8665_s20, 256  ;;  %p8155_p11 = scmp.lt.u32.totalorder %s8665_s20, %s9218_s1 }
 0x100   : > { %p8150_p10 = scmp.ne.s32.totalorder %s8665_s20, %s8149_s0  ;;  %p8156_p12 = scmp.lt.u32.totalorder %s8154_s2, %s8149_s0 }
 0x101   : > { %p8158_p0 = scmp.lt.u32.totalorder %s8149_s0, %s8665_s20 }
 0x102   : > { %p8152_p1 = pnand %p8151_p8, %p8150_p10  ;;  %p8157_p13 = por %p8156_p12, %p8155_p11 }
 0x104   : > { %p8153_p3 = pneg %p8152_p1  ;;  %p8159_p5 = por %p8158_p0, %p8157_p13 }
 0x106   : > { %p8160_p7 = pnand %p8159_p5, %p8153_p3 }
 0x108   : > { %8163 = shalt.err (!%p8160_p7)
}
 0x109   : > { %s8164_s28 = scalar_lea.vmem %s8671_s18, 256  ;;  %s8284_s9 = smov [#allocation2]  }
 0x10a   : > { %p8165_p10 = scmp.ne.s32.totalorder %s8671_s18, %s8164_s28  ;;  %s8169_s13 = sshll.u32 %s8284_s9, 4  ;;  %s8170_s13 = int_to_ptr.vmem [resolvable:$false] %s8169_s13 }
 0x10b   : > { %s8171_s25 = scalar_lea.vmem %s8170_s13, 512  ;;  %p8172_p6 = scmp.lt.s32.totalorder %s8671_s18, %s8170_s13 }
 0x10c   : > { %p8167_p1 = pnand %p8165_p10, %p8151_p8  ;;  %p8173_p11 = scmp.lt.s32.totalorder %s8171_s25, %s8164_s28 }
 0x10e   : > { %p8168_p9 = pneg %p8167_p1  ;;  %p8174_p12 = por %p8173_p11, %p8172_p6 }
 0x110   : > { %p8175_p13 = pnand %p8174_p12, %p8168_p9 }
 0x112   : > { %8178 = shalt.err (!%p8175_p13)
}
 0x113   : > { %7209 = dma.hbm_to_vmem [thread:$0]  (!%p8667_p4), %s8665_s20, 256, %s8671_s18, %s568_s5  }
 0x114   : > { %s9220_s0 = sld [smem:[#allocation27_spill]] }
 0x11a   : > { %p9221_p3 = scmp.ne.s32.totalorder %s9220_s0, 0 }
 0x11b   : > { %s8701_s30 = sand.u32 (!%p9221_p3), 1, %s8257_s22  }
 0x11c   : > { %596 = sbr.rel (%p9221_p3) target bundleno = 5250 (0x1482), region = 84  ;;  %s6388_s2 = sshll.u32 (!%p9221_p3), %s8701_s30, 4 }
 0x11d   : > { %s599_s19 = scalar_lea.sflag (!%p9221_p3), [#allocation3], %s8701_s30  ;;  %s8707_s16 = scalar_lea.vmem (!%p9221_p3), [#allocation2], %s6388_s2 }
 0x123   : > { %8224 = dma.done.wait (%p8647_p2), %s599_s19, 256  }
 0x124   : > { %8226 = vsyncadd (%p8647_p2), %s599_s19, 4294967040  ;;  %p9222_p6 = scmp.eq.s32.totalorder %s8394_s27, 0 }
 0x126   : > { %8228 = dma.done.wait (%p9222_p6), [#allocation6], 12384   ;;  %p9223_p9 = pmov %p9222_p6 }
 0x127   : > { %p9224_p4 = pmov %p9222_p6 }
 0x128   : > { %8230 = vsyncadd (%p9223_p9), [#allocation6], 4294954912 }
 0x129   : > { %8232 = dma.done.wait (%p9224_p4), [#allocation9], 8192   ;;  %p9225_p8 = pmov %p9224_p4 }
 0x12a   : > { %p9226_p0 = pmov %p9224_p4 }
 0x12b   : > { %8234 = vsyncadd (%p9225_p8), [#allocation9], 4294959104 }
 0x12c   : > { %8236 = dma.done.wait (%p9226_p0), [#allocation12], 12288   ;;  %p9227_p5 = pmov %p9226_p0 }
 0x12d   : > { %p9228_p2 = pmov %p9226_p0 }
 0x12e   : > { %8238 = vsyncadd (%p9227_p5), [#allocation12], 4294955008 }
 0x12f   : > { %8240 = dma.done.wait (%p9228_p2), [#allocation15], 32768   ;;  %p9229_p7 = pmov %p9226_p0 }
 0x130   : > { %p9230_p10 = pmov %p9226_p0 }
 0x131   : > { %8242 = vsyncadd (%p9229_p7), [#allocation15], 4294934528 }
 0x132   : > { %8244 = dma.done.wait (%p9230_p10), [#allocation18], 16384   ;;  %p9231_p1 = pmov %p9226_p0 }
 0x133   : > { %p697_p11 = scmp.lt.s32.totalorder %s8394_s27, 1  ;;  %s9232_s5 = sld [smem:[#allocation28_spill]]  ;;  %v7285_v3 = vld [vmem:[#allocation5 + $0x4] ss:$24 sps:$4 sm:$0xff]   ;;  %v7287_v4 = vld [vmem:[#allocation5] ss:$24 sps:$4 sm:$0xff]   ;;  %v735_v47 = vlaneseq }
 0x134   : > { %8246 = vsyncadd (%p9231_p1), [#allocation18], 4294950912  ;;  %v7288_v5 = vld [vmem:[#allocation5 + $0x34] ss:$24 sps:$4 sm:$0xff]   ;;  %1365 = vmatprep.subr.bf16.mxu0 %v7285_v3  ;;  %v7290_v6 = vld [vmem:[#allocation5 + $0x30] ss:$24 sps:$4 sm:$0xff]  }
 0x135   : > { %s8735_s17 = scalar_select %p697_p11, %s8394_s27, 1  ;;  %1366 = vmatpush1.bf16.msra.mxu0 %v7287_v4  ;;  %v7291_v7 = vld [vmem:[#allocation5 + $0x64] ss:$24 sps:$4 sm:$0xff]   ;;  %v7293_v8 = vld [vmem:[#allocation5 + $0x60] ss:$24 sps:$4 sm:$0xff]   ;;  %v8758_v53 = vshrl.u32 %v735_v47, 7 }
 0x136   : > { %1367 = vmatprep.subr.bf16.mxu0 %v7288_v5  ;;  %v7294_v9 = vld [vmem:[#allocation5 + $0x94] ss:$24 sps:$4 sm:$0xff]   ;;  %v7296_v10 = vld [vmem:[#allocation5 + $0x90] ss:$24 sps:$4 sm:$0xff]   ;;  %v7297_v11 = vld [vmem:[#allocation5 + $0xc4] ss:$24 sps:$4 sm:$0xff]  }
 0x137   : > { %s7057_s20 = sshll.u32 %s8735_s17, 4  ;;  %v7299_v12 = vld [vmem:[#allocation5 + $0xc0] ss:$24 sps:$4 sm:$0xff]   ;;  %v7300_v13 = vld [vmem:[#allocation5 + $0xf4] ss:$24 sps:$4 sm:$0xff]   ;;  %s9233_s25 = sld [smem:[#allocation30_spill]] }
 0x138   : > { %v7302_v14 = vld [vmem:[#allocation5 + $0xf0] ss:$24 sps:$4 sm:$0xff]   ;;  %v7303_v15 = vld [vmem:[#allocation5 + $0x124] ss:$24 sps:$4 sm:$0xff]   ;;  %v7305_v16 = vld [vmem:[#allocation5 + $0x120] ss:$24 sps:$4 sm:$0xff]  }
 0x139   : > { %s701_s28 = scalar_lea.vmem %s9232_s5, %s7057_s20  ;;  %1368 = vmatpush1.bf16.msra.mxu0 %v7290_v6  ;;  %v7306_v17 = vld [vmem:[#allocation5 + $0x154] ss:$24 sps:$4 sm:$0xff]   ;;  %v7308_v18 = vld [vmem:[#allocation5 + $0x150] ss:$24 sps:$4 sm:$0xff]   ;;  %v7309_v19 = vld [vmem:[#allocation5 + $0x184] ss:$24 sps:$4 sm:$0xff]  }
 0x13a   : > { %v708_v0 = vld [vmem:[%s701_s28] sm:$0xff]  ;;  %v709_v1 = vld [vmem:[%s701_s28 + $0x8] sm:$0xff]  ;;  %1369 = vmatprep.subr.bf16.mxu0 %v7291_v7  ;;  %s9234_s4 = sld [smem:[#allocation31_spill]]  ;;  %v8764_v55 = vsub.s32 1, %v8758_v53  ;;  %v8770_v57 = vsub.s32 0, %v8758_v53  ;;  %vm8286_vm0 = vmmov 0  }
 0x13b   : > { %v716_v2 = vadd.f32 %v709_v1, %v708_v0  ;;  %v7311_v20 = vld [vmem:[#allocation5 + $0x180] ss:$24 sps:$4 sm:$0xff]   ;;  %v7312_v21 = vld [vmem:[#allocation5 + $0x1b4] ss:$24 sps:$4 sm:$0xff]   ;;  %v7314_v22 = vld [vmem:[#allocation5 + $0x1b0] ss:$24 sps:$4 sm:$0xff]  }
 0x13c   : > { %v7315_v23 = vld [vmem:[#allocation5 + $0x1e4] ss:$24 sps:$4 sm:$0xff]   ;;  %v7317_v31 = vld [vmem:[#allocation5 + $0x1e0] ss:$24 sps:$4 sm:$0xff]   ;;  %v7318_v32 = vld [vmem:[#allocation5 + $0x214] ss:$24 sps:$4 sm:$0xff]  }
 0x13d   : > { %717 = vadd.xlane.f32.xlu0 %v716_v2  ;;  %1370 = vmatpush1.bf16.msra.mxu0 %v7293_v8  ;;  %v7320_v33 = vld [vmem:[#allocation5 + $0x210] ss:$24 sps:$4 sm:$0xff]   ;;  %v7321_v34 = vld [vmem:[#allocation5 + $0x244] ss:$24 sps:$4 sm:$0xff]   ;;  %v7323_v35 = vld [vmem:[#allocation5 + $0x240] ss:$24 sps:$4 sm:$0xff]   ;;  %s706_s0 = scalar_lea.vmem %s9233_s25, %s7057_s20 }
 0x13e   : > { %1371 = vmatprep.subr.bf16.mxu0 %v7294_v9  ;;  %v7324_v36 = vld [vmem:[#allocation5 + $0x274] ss:$24 sps:$4 sm:$0xff]   ;;  %v7326_v37 = vld [vmem:[#allocation5 + $0x270] ss:$24 sps:$4 sm:$0xff]   ;;  %v7327_v38 = vld [vmem:[#allocation5 + $0x2a4] ss:$24 sps:$4 sm:$0xff]  }
 0x13f   : > { %v7329_v39 = vld [vmem:[#allocation5 + $0x2a0] ss:$24 sps:$4 sm:$0xff]   ;;  %v7330_v40 = vld [vmem:[#allocation5 + $0x2d4] ss:$24 sps:$4 sm:$0xff]   ;;  %v7332_v41 = vld [vmem:[#allocation5 + $0x2d0] ss:$24 sps:$4 sm:$0xff]  }
 0x140   : > { %v7335_v42 = vld [vmem:[#allocation5 + $0xc] ss:$24 sps:$4 sm:$0xff]   ;;  %v7333_v6 = vld [vmem:[#allocation5 + $0x8] ss:$24 sps:$4 sm:$0xff]   ;;  %v7338_v8 = vld [vmem:[#allocation5 + $0x3c] ss:$24 sps:$4 sm:$0xff]  }
 0x141   : > { %1372 = vmatpush1.bf16.msra.mxu0 %v7296_v10  ;;  %v710_v45 = vld [vmem:[%s9234_s4] sm:$0x3f]  ;;  %v711_v46 = vld [vmem:[%s9234_s4 + $0x8] sm:$0x3f]  ;;  %v7336_v9 = vld [vmem:[#allocation5 + $0x38] ss:$24 sps:$4 sm:$0xff]  }
 0x142   : > { %1373 = vmatprep.subr.bf16.mxu0 %v7297_v11  ;;  %v712_v48 = vld [vmem:[%s706_s0] sm:$0x3f]  ;;  %v713_v49 = vld [vmem:[%s706_s0 + $0x8] sm:$0x3f]  ;;  %vm1551_vm1 = vcmask 1043456   ;;  %vm1535_vm2 = vcmask 64512  }
 0x143   : > { %v8754_v51 = vadd.f32 %v712_v48, %v710_v45  ;;  %v8756_v52 = vadd.f32 %v713_v49, %v711_v46  ;;  %v7341_v10 = vld [vmem:[#allocation5 + $0x6c] ss:$24 sps:$4 sm:$0xff]   ;;  %v7339_v11 = vld [vmem:[#allocation5 + $0x68] ss:$24 sps:$4 sm:$0xff]   ;;  %s9235_s9 = sld [smem:[#allocation36_spill]]  ;;  %s9236_s25 = sld [smem:[#allocation34_spill]] }
 0x144   : > { %v7390_v45 = vld [vmem:[#allocation5 + $0xa0] ss:$24 sps:$4 sm:$0xff]   ;;  %v7395_v46 = vld [vmem:[#allocation5 + $0xd4] ss:$24 sps:$4 sm:$0xff]   ;;  %v7393_v47 = vld [vmem:[#allocation5 + $0xd0] ss:$24 sps:$4 sm:$0xff]  }
 0x145   : > { %1374 = vmatpush1.bf16.msra.mxu0 %v7299_v12  ;;  %v8761_v54 = vadd.f32 1.0, %v8756_v52  ;;  %v8767_v56 = vadd.f32 1.0, %v8754_v51  ;;  %v752_v62 = vrot.slane %v8756_v52, %v8770_v57  ;;  %v7344_v12 = vld [vmem:[#allocation5 + $0x9c] ss:$24 sps:$4 sm:$0xff]   ;;  %v7396_v49 = vld [vmem:[#allocation5 + $0x100] ss:$24 sps:$4 sm:$0xff]  }
 0x146   : > { %1375 = vmatprep.subr.bf16.mxu0 %v7300_v13  ;;  %v7342_v13 = vld [vmem:[#allocation5 + $0x98] ss:$24 sps:$4 sm:$0xff]   ;;  %v7398_v48 = vld [vmem:[#allocation5 + $0x104] ss:$24 sps:$4 sm:$0xff]   ;;  %s9237_s20 = sld [smem:[#allocation35_spill]]  ;;  %s7059_s19 = sshll.u32 %s8394_s27, 8 }
 0x147   : > { %v742_v58 = vrot.slane %v8761_v54, %v8764_v55  ;;  %v738_v59 = vrot.slane %v8767_v56, %v8764_v55  ;;  %s696_s18 = scalar_lea.vmem [#allocation19], %s6388_s2  ;;  %s6178_s27 = scalar_lea.sflag [#allocation4], %s8701_s30 }
 0x148   : > { %s6192_s5 = sshll.u32 %s696_s18, 4  ;;  %p9239_p13 = scmp.ne.s32.totalorder %s9216_s3, 0  ;;  %s9121_s5 = int_to_ptr.vmem [resolvable:$true] %s6192_s5 }
 0x149   : > { %1376 = vmatpush1.bf16.msra.mxu0 %v7302_v14  ;;  %v7347_v14 = vld [vmem:[#allocation5 + $0xcc] ss:$24 sps:$4 sm:$0xff]   ;;  %s8179_s2 = scalar_lea.vmem %s9121_s5, 256 }
 0x14a   : > { %1377 = vmatprep.subr.bf16.mxu0 %v7303_v15  ;;  %v7345_v15 = vld [vmem:[#allocation5 + $0xc8] ss:$24 sps:$4 sm:$0xff]   ;;  %p8180_p12 = scmp.ne.s32.totalorder %s9121_s5, %s8179_s2 }
 0x14c   : > { %p8181_p3 = pnand %p8180_p12, %p9239_p13 }
 0x14d   : > { %1378 = vmatpush1.bf16.msra.mxu0 %v7305_v16  ;;  %v7350_v16 = vld [vmem:[#allocation5 + $0xfc] ss:$24 sps:$4 sm:$0xff]  }
 0x14e   : > { %1379 = vmatprep.subr.bf16.mxu0 %v7306_v17  ;;  %v7348_v17 = vld [vmem:[#allocation5 + $0xf8] ss:$24 sps:$4 sm:$0xff]   ;;  %p8182_p6 = pneg %p8181_p3 }
 0x151   : > { %1380 = vmatpush1.bf16.msra.mxu0 %v7308_v18  ;;  %v7353_v18 = vld [vmem:[#allocation5 + $0x12c] ss:$24 sps:$4 sm:$0xff]  }
 0x152   : > { %1381 = vmatprep.subr.bf16.mxu0 %v7309_v19  ;;  %v7351_v19 = vld [vmem:[#allocation5 + $0x128] ss:$24 sps:$4 sm:$0xff]  }
 0x155   : > { %1382 = vmatpush1.bf16.msra.mxu0 %v7311_v20  ;;  %v7356_v20 = vld [vmem:[#allocation5 + $0x15c] ss:$24 sps:$4 sm:$0xff]  }
 0x156   : > { %1383 = vmatprep.subr.bf16.mxu0 %v7312_v21  ;;  %v7354_v21 = vld [vmem:[#allocation5 + $0x158] ss:$24 sps:$4 sm:$0xff]  }
 0x159   : > { %1384 = vmatpush1.bf16.msra.mxu0 %v7314_v22  ;;  %v7359_v22 = vld [vmem:[#allocation5 + $0x18c] ss:$24 sps:$4 sm:$0xff]  }
 0x15a   : > { %1385 = vmatprep.subr.bf16.mxu0 %v7315_v23  ;;  %v7357_v23 = vld [vmem:[#allocation5 + $0x188] ss:$24 sps:$4 sm:$0xff]  }
 0x15d   : > { %1386 = vmatpush1.bf16.msra.mxu0 %v7317_v31  ;;  %v7369_v31 = vld [vmem:[#allocation5 + $0x248] ss:$24 sps:$4 sm:$0xff]  }
 0x15e   : > { %1387 = vmatprep.subr.bf16.mxu0 %v7318_v32  ;;  %v7374_v32 = vld [vmem:[#allocation5 + $0x27c] ss:$24 sps:$4 sm:$0xff]  }
 0x161   : > { %1388 = vmatpush1.bf16.msra.mxu0 %v7320_v33  ;;  %v7372_v33 = vld [vmem:[#allocation5 + $0x278] ss:$24 sps:$4 sm:$0xff]  }
 0x162   : > { %1389 = vmatprep.subr.bf16.mxu0 %v7321_v34  ;;  %v7377_v34 = vld [vmem:[#allocation5 + $0x2ac] ss:$24 sps:$4 sm:$0xff]  }
 0x165   : > { %1390 = vmatpush1.bf16.msra.mxu0 %v7323_v35  ;;  %v7375_v35 = vld [vmem:[#allocation5 + $0x2a8] ss:$24 sps:$4 sm:$0xff]  }
 0x166   : > { %1391 = vmatprep.subr.bf16.mxu0 %v7324_v36  ;;  %v7380_v36 = vld [vmem:[#allocation5 + $0x2dc] ss:$24 sps:$4 sm:$0xff]  }
 0x169   : > { %1392 = vmatpush1.bf16.msra.mxu0 %v7326_v37  ;;  %v7378_v37 = vld [vmem:[#allocation5 + $0x2d8] ss:$24 sps:$4 sm:$0xff]  }
 0x16a   : > { %1393 = vmatprep.subr.bf16.mxu0 %v7327_v38  ;;  %v7383_v38 = vld [vmem:[#allocation5 + $0x14] ss:$24 sps:$4 sm:$0xff]  }
 0x16d   : > { %1394 = vmatpush1.bf16.msra.mxu0 %v7329_v39  ;;  %v7381_v39 = vld [vmem:[#allocation5 + $0x10] ss:$24 sps:$4 sm:$0xff]  }
 0x16e   : > { %1395 = vmatprep.subr.bf16.mxu0 %v7330_v40  ;;  %v7386_v40 = vld [vmem:[#allocation5 + $0x44] ss:$24 sps:$4 sm:$0xff]  }
 0x171   : > { %1396 = vmatpush1.bf16.msra.mxu0 %v7332_v41  ;;  %v7384_v41 = vld [vmem:[#allocation5 + $0x40] ss:$24 sps:$4 sm:$0xff]  }
 0x172   : > { %1406 = vmatprep.subr.bf16.mxu0 %v7335_v42  ;;  %v7389_v42 = vld [vmem:[#allocation5 + $0x74] ss:$24 sps:$4 sm:$0xff]  }
 0x1ca   : > { %v718_v24 = vpop.xlane.xlu0 %717 }
 0x1cb   : > { %v720_v25 = vmul.f32 0.00390625, %v718_v24  ;;  %v7362_v24 = vld [vmem:[#allocation5 + $0x1bc] ss:$24 sps:$4 sm:$0xff]  }
 0x1cd   : > { %v721_v26 = vsub.f32 %v708_v0, %v720_v25  ;;  %v722_v27 = vsub.f32 %v709_v1, %v720_v25  ;;  %v748_v0 = vrot.slane %v8754_v51, %v8770_v57  ;;  %v7360_v25 = vld [vmem:[#allocation5 + $0x1b8] ss:$24 sps:$4 sm:$0xff]  }
 0x1cf   : > { %v723_v28 = vmul.f32 %v721_v26, %v721_v26  ;;  %v724_v29 = vmul.f32 %v722_v27, %v722_v27 }
 0x1d1   : > { %v725_v30 = vadd.f32 %v724_v29, %v723_v28  ;;  %v7368_v28 = vld [vmem:[#allocation5 + $0x21c] ss:$24 sps:$4 sm:$0xff]   ;;  %v7366_v29 = vld [vmem:[#allocation5 + $0x218] ss:$24 sps:$4 sm:$0xff]  }
 0x1d3   : > { %726 = vadd.xlane.f32.xlu0 %v725_v30  ;;  %v7371_v30 = vld [vmem:[#allocation5 + $0x24c] ss:$24 sps:$4 sm:$0xff]  }
 0x260   : > { %v727_v43 = vpop.xlane.xlu0 %726 }
 0x261   : > { %v728_v44 = vmul.f32 0.00390625, %v727_v43  ;;  %v7387_v43 = vld [vmem:[#allocation5 + $0x70] ss:$24 sps:$4 sm:$0xff]  }
 0x263   : > { %v729_v50 = vadd.f32 1e-06, %v728_v44  ;;  %v7392_v44 = vld [vmem:[#allocation5 + $0xa4] ss:$24 sps:$4 sm:$0xff]  }
 0x265   : > { %7861 = vrsqrt.f32 %v729_v50  ;;  %v7401_v50 = vld [vmem:[#allocation5 + $0x134] ss:$24 sps:$4 sm:$0xff]  }
 0x26f   : > { %v7862_v60 = vpop.eup %7861 }
 0x270   : > { %v732_v61 = vmul.f32 %v7862_v60, %v722_v27  ;;  %v731_v63 = vmul.f32 %v7862_v60, %v721_v26  ;;  %v7365_v26 = vld [vmem:[#allocation5 + $0x1ec] ss:$24 sps:$4 sm:$0xff]   ;;  %v7363_v27 = vld [vmem:[#allocation5 + $0x1e8] ss:$24 sps:$4 sm:$0xff]  }
 0x271   : > { %v7402_v60 = vld [vmem:[#allocation5 + $0x160] ss:$24 sps:$4 sm:$0xff]  }
 0x272   : > { %v744_v1 = vmul.f32 %v742_v58, %v732_v61  ;;  %v743_v2 = vmul.f32 %v738_v59, %v731_v63  ;;  %v7399_v58 = vld [vmem:[#allocation5 + $0x130] ss:$24 sps:$4 sm:$0xff]   ;;  %v7404_v59 = vld [vmem:[#allocation5 + $0x164] ss:$24 sps:$4 sm:$0xff]   ;;  %v7407_v61 = vld [vmem:[#allocation5 + $0x194] ss:$24 sps:$4 sm:$0xff]  }
 0x273   : > { %v7410_v63 = vld [vmem:[#allocation5 + $0x1c4] ss:$24 sps:$4 sm:$0xff]  }
 0x274   : > { %v8780_v3 = vadd.f32 %v752_v62, %v744_v1  ;;  %v8782_v4 = vadd.f32 %v748_v0, %v743_v2  ;;  %v7405_v62 = vld [vmem:[#allocation5 + $0x190] ss:$24 sps:$4 sm:$0xff]   ;;  %v7408_v0 = vld [vmem:[#allocation5 + $0x1c0] ss:$24 sps:$4 sm:$0xff]   ;;  %v7413_v1 = vld [vmem:[#allocation5 + $0x1f4] ss:$24 sps:$4 sm:$0xff]  }
 0x275   : > { %v7411_v2 = vld [vmem:[#allocation5 + $0x1f0] ss:$24 sps:$4 sm:$0xff]  }
 0x276   : > { %v8786_v5 = vpack.c.bf16 %v8780_v3, %v8780_v3  ;;  %v8790_v7 = vpack.c.bf16 %v8782_v4, %v8782_v4 }
 0x278   : > { %1397 = vmatprep.mubr.bf16.mxu0 %v8786_v5 }
 0x279   : > { %1398 = vmatmul.mubr.bf16.vlgmr.msra.gmra.mrb[0].mxu0 %v8790_v7 }
 0x27a   : > { %1407 = vmatpush1.bf16.msra.mxu0 %v7333_v6  ;;  %1438 = vmatprep.mubr.bf16.mxu0 %v8786_v5  ;;  %v7414_v6 = vld [vmem:[#allocation5 + $0x220] ss:$24 sps:$4 sm:$0xff]  }
 0x27b   : > { %1408 = vmatprep.subr.bf16.mxu0 %v7338_v8  ;;  %v7419_v8 = vld [vmem:[#allocation5 + $0x254] ss:$24 sps:$4 sm:$0xff]  }
 0x27e   : > { %1409 = vmatpush1.bf16.msra.mxu0 %v7336_v9  ;;  %v7417_v9 = vld [vmem:[#allocation5 + $0x250] ss:$24 sps:$4 sm:$0xff]  }
 0x27f   : > { %1410 = vmatprep.subr.bf16.mxu0 %v7341_v10  ;;  %v7422_v10 = vld [vmem:[#allocation5 + $0x284] ss:$24 sps:$4 sm:$0xff]  }
 0x282   : > { %1411 = vmatpush1.bf16.msra.mxu0 %v7339_v11  ;;  %v7420_v11 = vld [vmem:[#allocation5 + $0x280] ss:$24 sps:$4 sm:$0xff]  }
 0x283   : > { %1412 = vmatprep.subr.bf16.mxu0 %v7344_v12  ;;  %v7425_v12 = vld [vmem:[#allocation5 + $0x2b4] ss:$24 sps:$4 sm:$0xff]  }
 0x286   : > { %1413 = vmatpush1.bf16.msra.mxu0 %v7342_v13  ;;  %v7423_v13 = vld [vmem:[#allocation5 + $0x2b0] ss:$24 sps:$4 sm:$0xff]  }
 0x287   : > { %1414 = vmatprep.subr.bf16.mxu0 %v7347_v14  ;;  %v7428_v14 = vld [vmem:[#allocation5 + $0x2e4] ss:$24 sps:$4 sm:$0xff]  }
 0x28a   : > { %1415 = vmatpush1.bf16.msra.mxu0 %v7345_v15  ;;  %v7426_v15 = vld [vmem:[#allocation5 + $0x2e0] ss:$24 sps:$4 sm:$0xff]  }
 0x28b   : > { %1416 = vmatprep.subr.bf16.mxu0 %v7350_v16  ;;  %v8285_v16 = vmov 0.0  }
 0x28e   : > { %1417 = vmatpush1.bf16.msra.mxu0 %v7348_v17 }
 0x28f   : > { %1418 = vmatprep.subr.bf16.mxu0 %v7353_v18 }
 0x292   : > { %1419 = vmatpush1.bf16.msra.mxu0 %v7351_v19 }
 0x293   : > { %1420 = vmatprep.subr.bf16.mxu0 %v7356_v20 }
 0x296   : > { %1421 = vmatpush1.bf16.msra.mxu0 %v7354_v21  ;;  %v8802_v21 = vsub.s32 2, %v8758_v53 }
 0x297   : > { %1422 = vmatprep.subr.bf16.mxu0 %v7359_v22  ;;  %v853_v22 = vld [vmem:[#allocation7] sm:$0x3f] }
 0x29a   : > { %1423 = vmatpush1.bf16.msra.mxu0 %v7357_v23  ;;  %v866_v23 = vrot.slane %v853_v22, %v8802_v21 }
 0x29b   : > { %1424 = vmatprep.subr.bf16.mxu0 %v7362_v24 }
 0x29e   : > { %1425 = vmatpush1.bf16.msra.mxu0 %v7360_v25 }
 0x29f   : > { %1426 = vmatprep.subr.bf16.mxu0 %v7365_v26  ;;  %v858_v26 = vrot.slane %v853_v22, %v8770_v57 }
 0x2a2   : > { %1427 = vmatpush1.bf16.msra.mxu0 %v7363_v27 }
 0x2a3   : > { %1428 = vmatprep.subr.bf16.mxu0 %v7368_v28 }
 0x2a6   : > { %1429 = vmatpush1.bf16.msra.mxu0 %v7366_v29 }
 0x2a7   : > { %1430 = vmatprep.subr.bf16.mxu0 %v7371_v30 }
 0x2aa   : > { %1431 = vmatpush1.bf16.msra.mxu0 %v7369_v31 }
 0x2ab   : > { %1432 = vmatprep.subr.bf16.mxu0 %v7374_v32  ;;  %v8810_v32 = vsub.s32 4, %v8758_v53 }
 0x2ae   : > { %1433 = vmatpush1.bf16.msra.mxu0 %v7372_v33  ;;  %v874_v33 = vrot.slane %v853_v22, %v8810_v32 }
 0x2af   : > { %1434 = vmatprep.subr.bf16.mxu0 %v7377_v34 }
 0x2b2   : > { %1435 = vmatpush1.bf16.msra.mxu0 %v7375_v35 }
 0x2b3   : > { %1436 = vmatprep.subr.bf16.mxu0 %v7380_v36 }
 0x2b6   : > { %1437 = vmatpush1.bf16.msra.mxu0 %v7378_v37 }
 0x2b7   : > { %1447 = vmatprep.subr.bf16.mxu0 %v7383_v38 }
 0x2b9   : > { %1439 = vmatmul.mubr.bf16.vlgmr.msra.gmra.mrb[4].mxu0 %v8790_v7 }
 0x2ba   : > { %1448 = vmatpush1.bf16.msra.mxu0 %v7381_v39  ;;  %1479 = vmatprep.mubr.bf16.mxu0 %v8786_v5  ;;  %v7416_v5 = vld [vmem:[#allocation5 + $0x224] ss:$24 sps:$4 sm:$0xff]  }
 0x2bb   : > { %1449 = vmatprep.subr.bf16.mxu0 %v7386_v40 }
 0x2be   : > { %1450 = vmatpush1.bf16.msra.mxu0 %v7384_v41 }
 0x2bf   : > { %1451 = vmatprep.subr.bf16.mxu0 %v7389_v42 }
 0x2c2   : > { %1452 = vmatpush1.bf16.msra.mxu0 %v7387_v43 }
 0x2c3   : > { %1453 = vmatprep.subr.bf16.mxu0 %v7392_v44 }
 0x2c6   : > { %1454 = vmatpush1.bf16.msra.mxu0 %v7390_v45 }
 0x2c7   : > { %1455 = vmatprep.subr.bf16.mxu0 %v7395_v46 }
 0x2ca   : > { %1456 = vmatpush1.bf16.msra.mxu0 %v7393_v47 }
 0x2cb   : > { %1457 = vmatprep.subr.bf16.mxu0 %v7398_v48 }
 0x2ce   : > { %1458 = vmatpush1.bf16.msra.mxu0 %v7396_v49 }
 0x2cf   : > { %1459 = vmatprep.subr.bf16.mxu0 %v7401_v50 }
 0x2d2   : > { %1460 = vmatpush1.bf16.msra.mxu0 %v7399_v58 }
 0x2d3   : > { %1461 = vmatprep.subr.bf16.mxu0 %v7404_v59  ;;  %v8818_v59 = vsub.s32 3, %v8758_v53 }
 0x2d6   : > { %1462 = vmatpush1.bf16.msra.mxu0 %v7402_v60  ;;  %v870_v60 = vrot.slane %v853_v22, %v8818_v59 }
 0x2d7   : > { %1463 = vmatprep.subr.bf16.mxu0 %v7407_v61  ;;  %v8822_v61 = vsub.s32 5, %v8758_v53 }
 0x2da   : > { %1464 = vmatpush1.bf16.msra.mxu0 %v7405_v62 }
 0x2db   : > { %1465 = vmatprep.subr.bf16.mxu0 %v7410_v63 }
 0x2de   : > { %1466 = vmatpush1.bf16.msra.mxu0 %v7408_v0  ;;  %v878_v0 = vrot.slane %v853_v22, %v8822_v61 }
 0x2df   : > { %1467 = vmatprep.subr.bf16.mxu0 %v7413_v1 }
 0x2e2   : > { %1468 = vmatpush1.bf16.msra.mxu0 %v7411_v2  ;;  %v862_v2 = vrot.slane %v853_v22, %v8764_v55 }
 0x2e3   : > { %1469 = vmatprep.subr.bf16.mxu0 %v7416_v5 }
 0x2e6   : > { %1470 = vmatpush1.bf16.msra.mxu0 %v7414_v6 }
 0x2e7   : > { %1471 = vmatprep.subr.bf16.mxu0 %v7419_v8 }
 0x2ea   : > { %1472 = vmatpush1.bf16.msra.mxu0 %v7417_v9 }
 0x2eb   : > { %1473 = vmatprep.subr.bf16.mxu0 %v7422_v10 }
 0x2ee   : > { %1474 = vmatpush1.bf16.msra.mxu0 %v7420_v11 }
 0x2ef   : > { %1475 = vmatprep.subr.bf16.mxu0 %v7425_v12 }
 0x2f2   : > { %1476 = vmatpush1.bf16.msra.mxu0 %v7423_v13 }
 0x2f3   : > { %1477 = vmatprep.subr.bf16.mxu0 %v7428_v14 }
 0x2f6   : > { %1478 = vmatpush1.bf16.msra.mxu0 %v7426_v15 }
 0x2f7   : > { %7076 = vmatprep.subr.bf16.mxu0 %v8285_v16 }
 0x2f9   : > { %1480 = vmatmul.mubr.bf16.vlgmr.msra.gmra.mrb[8].mxu0 %v8790_v7 }
 0x2fa   : > { %7078 = vmatprep.mubr.msk.bf16.mxu0 %vm8286_vm0, %v8285_v16 }
 0x34c   : > { %v1399_v17 = vpop.f32.mrb[0].mxu0 }
 0x34d   : > { %v1401_v18 = vpop.f32.mrb[1].mxu0  ;;  %v1400_v30 = vadd.f32 %v1399_v17, %v858_v26 }
 0x34e   : > { %v1403_v19 = vpop.f32.mrb[2].mxu0  ;;  %v1402_v9 = vadd.f32 %v1401_v18, %v862_v2  ;;  %v7471_v2 = vld [vmem:[#allocation8 + $0xe4] ss:$8 sps:$4 sm:$0xff]  }
 0x34f   : > { %v1404_v20 = vpop.f32.mrb[3].mxu0  ;;  %v1489_v31 = vpack.c.bf16 %v1400_v30, %v1400_v30  ;;  %v7432_v30 = vld [vmem:[#allocation8 + $0x14] ss:$8 sps:$4 sm:$0xff]  }
 0x350   : > { %v1490_v11 = vpack.c.bf16 %v1402_v9, %v1402_v9 }
 0x38c   : > { %v1440_v24 = vpop.f32.mrb[4].mxu0 }
 0x38d   : > { %v1441_v25 = vadd.f32 %v1440_v24, %v866_v23  ;;  %v1442_v7 = vpop.f32.mrb[5].mxu0 }
 0x38e   : > { %v1444_v27 = vpop.f32.mrb[6].mxu0  ;;  %v1443_v63 = vadd.f32 %v1442_v7, %v870_v60  ;;  %v7464_v60 = vld [vmem:[#allocation8 + $0xb0] ss:$8 sps:$4 sm:$0xff]  }
 0x38f   : > { %v1491_v28 = vpack.c.bf16 %v1441_v25, %v1441_v25  ;;  %v1445_v29 = vpop.f32.mrb[7].mxu0 }
 0x390   : > { %v1492_v6 = vpack.c.bf16 %v1443_v63, %v1443_v63  ;;  %v7431_v29 = vld [vmem:[#allocation8] ss:$8 sps:$4 sm:$0xff]  }
 0x391   : > { %7077 = vmatpush3.bf16.xpose.msra.mxu0 %v1491_v28  ;;  %v7429_v28 = vld [vmem:[#allocation8 + $0x4] ss:$8 sps:$4 sm:$0xff]   ;;  %v7467_v63 = vld [vmem:[#allocation8 + $0xc0] ss:$8 sps:$4 sm:$0xff]  }
 0x392   : > { %7082 = vmatprep.subr.bf16.mxu0 %v8285_v16  ;;  %1898 = vmatprep.subr.bf16.mxu1 %v7429_v28  ;;  %v7522_v28 = vld [vmem:[#allocation10 + $0x60] ss:$8 sps:$4 sm:$0xff]  }
 0x393   : > { %1899 = vmatpush1.bf16.msra.mxu1 %v7431_v29  ;;  %v7524_v29 = vld [vmem:[#allocation10 + $0x64] ss:$8 sps:$4 sm:$0xff]  }
 0x394   : > { %1900 = vmatprep.subr.bf16.mxu1 %v7432_v30  ;;  %v7528_v30 = vld [vmem:[#allocation10 + $0x70] ss:$8 sps:$4 sm:$0xff]  }
 0x398   : > { %7079 = vmatmul.mubr.bf16.vlgmr.msra.gmra.mrb[12].mxu0 %v1489_v31  ;;  %v7434_v31 = vld [vmem:[#allocation8 + $0x10] ss:$8 sps:$4 sm:$0xff]  }
 0x399   : > { %7084 = vmatprep.mubr.msk.bf16.mxu0 %vm8286_vm0, %v8285_v16  ;;  %1901 = vmatpush1.bf16.msra.mxu1 %v7434_v31  ;;  %v7530_v31 = vld [vmem:[#allocation10 + $0x74] ss:$8 sps:$4 sm:$0xff]  }
 0x3cc   : > { %v1481_v34 = vpop.f32.mrb[8].mxu0 }
 0x3cd   : > { %v1482_v35 = vadd.f32 %v1481_v34, %v874_v33  ;;  %v1483_v36 = vpop.f32.mrb[9].mxu0  ;;  %v7435_v33 = vld [vmem:[#allocation8 + $0x24] ss:$8 sps:$4 sm:$0xff]   ;;  %v7437_v34 = vld [vmem:[#allocation8 + $0x20] ss:$8 sps:$4 sm:$0xff]  }
 0x3ce   : > { %v1485_v37 = vpop.f32.mrb[10].mxu0  ;;  %v1484_v8 = vadd.f32 %v1483_v36, %v878_v0  ;;  %1902 = vmatprep.subr.bf16.mxu1 %v7435_v33  ;;  %v7440_v36 = vld [vmem:[#allocation8 + $0x30] ss:$8 sps:$4 sm:$0xff]   ;;  %v7468_v0 = vld [vmem:[#allocation8 + $0xd4] ss:$8 sps:$4 sm:$0xff]  }
 0x3cf   : > { %v1493_v38 = vpack.c.bf16 %v1482_v35, %v1482_v35  ;;  %v1486_v39 = vpop.f32.mrb[11].mxu0  ;;  %v7438_v35 = vld [vmem:[#allocation8 + $0x34] ss:$8 sps:$4 sm:$0xff]   ;;  %1903 = vmatpush1.bf16.msra.mxu1 %v7437_v34  ;;  %v7441_v37 = vld [vmem:[#allocation8 + $0x44] ss:$8 sps:$4 sm:$0xff]  }
 0x3d0   : > { %v1494_v10 = vpack.c.bf16 %v1484_v8, %v1484_v8  ;;  %1904 = vmatprep.subr.bf16.mxu1 %v7438_v35  ;;  %v7444_v39 = vld [vmem:[#allocation8 + $0x54] ss:$8 sps:$4 sm:$0xff]   ;;  %v7534_v33 = vld [vmem:[#allocation10 + $0x80] ss:$8 sps:$4 sm:$0xff]   ;;  %v7536_v34 = vld [vmem:[#allocation10 + $0x84] ss:$8 sps:$4 sm:$0xff]  }
 0x3d1   : > { %v1553_v40 = vsel %vm1551_vm1, %v1493_v38, 0  ;;  %v7443_v38 = vld [vmem:[#allocation8 + $0x40] ss:$8 sps:$4 sm:$0xff]   ;;  %v7540_v35 = vld [vmem:[#allocation10 + $0x90] ss:$8 sps:$4 sm:$0xff]  }
 0x3d2   : > { %7083 = vmatpush3.bf16.msra.mxu0 %v1553_v40  ;;  %v1651_v12 = vsel %vm1551_vm1, %v1494_v10, 0  ;;  %v7446_v40 = vld [vmem:[#allocation8 + $0x50] ss:$8 sps:$4 sm:$0xff]  }
 0x3d3   : > { %7088 = vmatprep.subr.bf16.mxu0 %v8285_v16  ;;  %1905 = vmatpush1.bf16.msra.mxu1 %v7440_v36  ;;  %v7542_v36 = vld [vmem:[#allocation10 + $0x94] ss:$8 sps:$4 sm:$0xff]  }
 0x3d4   : > { %1906 = vmatprep.subr.bf16.mxu1 %v7441_v37  ;;  %v7546_v37 = vld [vmem:[#allocation10 + $0xa0] ss:$8 sps:$4 sm:$0xff]  }
 0x3d7   : > { %1907 = vmatpush1.bf16.msra.mxu1 %v7443_v38  ;;  %v7548_v38 = vld [vmem:[#allocation10 + $0xa4] ss:$8 sps:$4 sm:$0xff]  }
 0x3d8   : > { %1908 = vmatprep.subr.bf16.mxu1 %v7444_v39  ;;  %v7552_v39 = vld [vmem:[#allocation10 + $0xb0] ss:$8 sps:$4 sm:$0xff]  }
 0x3db   : > { %1909 = vmatpush1.bf16.msra.mxu1 %v7446_v40  ;;  %v7554_v40 = vld [vmem:[#allocation10 + $0xb4] ss:$8 sps:$4 sm:$0xff]  }
 0x46b   : > { %v1529_v41 = vpop.f32.mrb[12].mxu0 }
 0x46c   : > { %v7080_v42 = vpop.f32.mrb[13].mxu0  ;;  %v1536_v43 = vsel %vm1535_vm2, %v1529_v41, -inf }
 0x46d   : > { %1537 = vmax.xlane.f32.xlu1 %v1536_v43  ;;  %v1532_v44 = vpop.f32.mrb[14].mxu0  ;;  %v7449_v42 = vld [vmem:[#allocation8 + $0x60] ss:$8 sps:$4 sm:$0xff]   ;;  %v7450_v43 = vld [vmem:[#allocation8 + $0x74] ss:$8 sps:$4 sm:$0xff]  }
 0x46e   : > { %v7081_v45 = vpop.f32.mrb[15].mxu0  ;;  %v7452_v44 = vld [vmem:[#allocation8 + $0x70] ss:$8 sps:$4 sm:$0xff]  }
 0x46f   : > { %v7453_v45 = vld [vmem:[#allocation8 + $0x84] ss:$8 sps:$4 sm:$0xff]  }
 0x4fa   : > { %v1538_v46 = vpop.xlane.xlu1 %1537 }
 0x4fb   : > { %v1539_v47 = vsub.f32 %v1529_v41, %v1538_v46  ;;  %v7447_v41 = vld [vmem:[#allocation8 + $0x64] ss:$8 sps:$4 sm:$0xff]   ;;  %v7455_v46 = vld [vmem:[#allocation8 + $0x80] ss:$8 sps:$4 sm:$0xff]  }
 0x4fc   : > { %1910 = vmatprep.subr.bf16.mxu1 %v7447_v41  ;;  %v7558_v41 = vld [vmem:[#allocation10 + $0xc0] ss:$8 sps:$4 sm:$0xff]  }
 0x4fd   : > { %v1540_v48 = vmul.f32 1.442695, %v1539_v47  ;;  %1911 = vmatpush1.bf16.msra.mxu1 %v7449_v42  ;;  %v7456_v47 = vld [vmem:[#allocation8 + $0x94] ss:$8 sps:$4 sm:$0xff]   ;;  %v7560_v42 = vld [vmem:[#allocation10 + $0xc4] ss:$8 sps:$4 sm:$0xff]  }
 0x4fe   : > { %1912 = vmatprep.subr.bf16.mxu1 %v7450_v43  ;;  %v7564_v43 = vld [vmem:[#allocation10 + $0xd0] ss:$8 sps:$4 sm:$0xff]  }
 0x4ff   : > { %7863 = vpow2.f32 %v1540_v48  ;;  %v7458_v48 = vld [vmem:[#allocation8 + $0x90] ss:$8 sps:$4 sm:$0xff]  }
 0x501   : > { %1913 = vmatpush1.bf16.msra.mxu1 %v7452_v44  ;;  %v7566_v44 = vld [vmem:[#allocation10 + $0xd4] ss:$8 sps:$4 sm:$0xff]  }
 0x502   : > { %1914 = vmatprep.subr.bf16.mxu1 %v7453_v45 }
 0x505   : > { %1915 = vmatpush1.bf16.msra.mxu1 %v7455_v46 }
 0x506   : > { %1916 = vmatprep.subr.bf16.mxu1 %v7456_v47 }
 0x509   : > { %v7864_v49 = vpop.eup %7863  ;;  %1917 = vmatpush1.bf16.msra.mxu1 %v7458_v48  ;;  %v7477_v48 = vld [vmem:[#allocation11] ss:$16 sps:$4 sm:$0xff]  }
 0x50a   : > { %v1542_v50 = vsel %vm1535_vm2, %v7864_v49, 0.0 }
 0x50b   : > { %1543 = vadd.xlane.f32.xlu1 %v1542_v50  ;;  %v7461_v50 = vld [vmem:[#allocation8 + $0xa0] ss:$8 sps:$4 sm:$0xff]  }
 0x598   : > { %v1544_v58 = vpop.xlane.xlu1 %1543 }
 0x599   : > { %7865 = vrcp.f32 %v1544_v58  ;;  %v7462_v58 = vld [vmem:[#allocation8 + $0xb4] ss:$8 sps:$4 sm:$0xff]  }
 0x5a3   : > { %v7866_v62 = vpop.eup %7865 }
 0x5a4   : > { %v1546_v1 = vmul.f32 %v7866_v62, %v7864_v49  ;;  %v7459_v49 = vld [vmem:[#allocation8 + $0xa4] ss:$8 sps:$4 sm:$0xff]  }
 0x5a5   : > { %1918 = vmatprep.subr.bf16.mxu1 %v7459_v49  ;;  %v7465_v62 = vld [vmem:[#allocation8 + $0xc4] ss:$8 sps:$4 sm:$0xff]  }
 0x5a6   : > { %v1547_v5 = vpack.c.bf16 %v1546_v1, %v1546_v1  ;;  %1919 = vmatpush1.bf16.msra.mxu1 %v7461_v50  ;;  %v7470_v1 = vld [vmem:[#allocation8 + $0xd0] ss:$8 sps:$4 sm:$0xff]  }
 0x5a7   : > { %1920 = vmatprep.subr.bf16.mxu1 %v7462_v58  ;;  %v7482_v58 = vld [vmem:[#allocation11 + $0x24] ss:$16 sps:$4 sm:$0xff]  }
 0x5a8   : > { %7085 = vmatmul.mubr.msk.bf16.vlgmr.msra.gmra.mrb[16].mxu0 %vm1535_vm2, %v1547_v5  ;;  %v7473_v5 = vld [vmem:[#allocation8 + $0xe0] ss:$8 sps:$4 sm:$0xff]  }
 0x5a9   : > { %7089 = vmatpush3.bf16.xpose.msra.mxu0 %v1492_v6  ;;  %7090 = vmatprep.mubr.msk.bf16.mxu0 %vm8286_vm0, %v8285_v16 }
 0x5aa   : > { %7094 = vmatprep.subr.bf16.mxu0 %v8285_v16  ;;  %1921 = vmatpush1.bf16.msra.mxu1 %v7464_v60 }
 0x5ab   : > { %1922 = vmatprep.subr.bf16.mxu1 %v7465_v62  ;;  %v7480_v62 = vld [vmem:[#allocation11 + $0x20] ss:$16 sps:$4 sm:$0xff]  }
 0x5ae   : > { %1923 = vmatpush1.bf16.msra.mxu1 %v7467_v63  ;;  %v7485_v63 = vld [vmem:[#allocation11 + $0x44] ss:$16 sps:$4 sm:$0xff]  }
 0x5af   : > { %1924 = vmatprep.subr.bf16.mxu1 %v7468_v0  ;;  %v7483_v0 = vld [vmem:[#allocation11 + $0x40] ss:$16 sps:$4 sm:$0xff]  }
 0x5b0   : > { %7091 = vmatmul.mubr.bf16.vlgmr.msra.gmra.mrb[20].mxu0 %v1490_v11  ;;  %v7474_v11 = vld [vmem:[#allocation8 + $0xf4] ss:$8 sps:$4 sm:$0xff]  }
 0x5b1   : > { %7095 = vmatpush3.bf16.msra.mxu0 %v1651_v12  ;;  %7096 = vmatprep.mubr.msk.bf16.mxu0 %vm8286_vm0, %v8285_v16  ;;  %v7476_v12 = vld [vmem:[#allocation8 + $0xf0] ss:$8 sps:$4 sm:$0xff]  }
 0x5b2   : > { %1925 = vmatpush1.bf16.msra.mxu1 %v7470_v1  ;;  %v7491_v1 = vld [vmem:[#allocation11 + $0x64] ss:$16 sps:$4 sm:$0xff]  }
 0x5b3   : > { %1926 = vmatprep.subr.bf16.mxu1 %v7471_v2  ;;  %v7489_v2 = vld [vmem:[#allocation11 + $0x60] ss:$16 sps:$4 sm:$0xff]  }
 0x5b6   : > { %1927 = vmatpush1.bf16.msra.mxu1 %v7473_v5  ;;  %v7497_v5 = vld [vmem:[#allocation11 + $0x84] ss:$16 sps:$4 sm:$0xff]  }
 0x5b7   : > { %1928 = vmatprep.subr.bf16.mxu1 %v7474_v11  ;;  %v7515_v11 = vld [vmem:[#allocation11 + $0xe4] ss:$16 sps:$4 sm:$0xff]  }
 0x5ba   : > { %1929 = vmatpush1.bf16.msra.mxu1 %v7476_v12  ;;  %v7513_v12 = vld [vmem:[#allocation11 + $0xe0] ss:$16 sps:$4 sm:$0xff]  }
 0x67b   : > { %v8833_v13 = vpop.f32.mrb[16].mxu0 }
 0x67c   : > { %v7086_v14 = vpop.f32.mrb[17].mxu0  ;;  %v1693_v49 = vpack.c.bf16 %v8833_v13, %v8833_v13  ;;  %v7503_v13 = vld [vmem:[#allocation11 + $0xa4] ss:$16 sps:$4 sm:$0xff]  }
 0x67d   : > { %v1592_v15 = vpop.f32.mrb[18].mxu0  ;;  %v7479_v14 = vld [vmem:[#allocation11 + $0x4] ss:$16 sps:$4 sm:$0xff]  }
 0x67e   : > { %v7087_v17 = vpop.f32.mrb[19].mxu0  ;;  %2609 = vmatprep.subr.bf16.mxu1 %v7479_v14  ;;  %v7486_v15 = vld [vmem:[#allocation10] ss:$8 sps:$4 sm:$0xff]   ;;  %v7521_v14 = vld [vmem:[#allocation11 + $0x104] ss:$16 sps:$4 sm:$0xff]  }
 0x67f   : > { %v7488_v17 = vld [vmem:[#allocation10 + $0x4] ss:$8 sps:$4 sm:$0xff]  }
 0x680   : > { %2158 = vmatprep.subr.bf16.mxu0 %v7488_v17  ;;  %v7527_v17 = vld [vmem:[#allocation11 + $0x124] ss:$16 sps:$4 sm:$0xff]  }
 0x683   : > { %v1629_v19 = vpop.f32.mrb[20].mxu0 }
 0x684   : > { %v7092_v20 = vpop.f32.mrb[21].mxu0  ;;  %v1635_v18 = vsel %vm1535_vm2, %v1629_v19, -inf }
 0x685   : > { %1636 = vmax.xlane.f32.xlu0 %v1635_v18  ;;  %v1632_v22 = vpop.f32.mrb[22].mxu0  ;;  %v7494_v20 = vld [vmem:[#allocation10 + $0x14] ss:$8 sps:$4 sm:$0xff]   ;;  %v7498_v18 = vld [vmem:[#allocation10 + $0x20] ss:$8 sps:$4 sm:$0xff]  }
 0x686   : > { %v7093_v23 = vpop.f32.mrb[23].mxu0  ;;  %v7500_v22 = vld [vmem:[#allocation10 + $0x24] ss:$8 sps:$4 sm:$0xff]  }
 0x687   : > { %v7504_v23 = vld [vmem:[#allocation10 + $0x30] ss:$8 sps:$4 sm:$0xff]  }
 0x712   : > { %v1637_v24 = vpop.xlane.xlu0 %1636 }
 0x713   : > { %v1638_v25 = vsub.f32 %v1629_v19, %v1637_v24  ;;  %v7492_v19 = vld [vmem:[#allocation10 + $0x10] ss:$8 sps:$4 sm:$0xff]   ;;  %v7506_v24 = vld [vmem:[#allocation10 + $0x34] ss:$8 sps:$4 sm:$0xff]  }
 0x715   : > { %v1639_v7 = vmul.f32 1.442695, %v1638_v25  ;;  %v7510_v25 = vld [vmem:[#allocation10 + $0x40] ss:$8 sps:$4 sm:$0xff]  }
 0x717   : > { %7867 = vpow2.f32 %v1639_v7  ;;  %v7512_v7 = vld [vmem:[#allocation10 + $0x44] ss:$8 sps:$4 sm:$0xff]  }
 0x721   : > { %v8836_v26 = vpop.eup %7867 }
 0x722   : > { %v1641_v27 = vsel %vm1535_vm2, %v8836_v26, 0.0 }
 0x723   : > { %1642 = vadd.xlane.f32.xlu1 %v1641_v27  ;;  %v7518_v27 = vld [vmem:[#allocation10 + $0x54] ss:$8 sps:$4 sm:$0xff]  }
 0x7b0   : > { %v1643_v6 = vpop.xlane.xlu1 %1642 }
 0x7b1   : > { %7869 = vrcp.f32 %v1643_v6  ;;  %v7495_v6 = vld [vmem:[#allocation11 + $0x80] ss:$16 sps:$4 sm:$0xff]  }
 0x7bb   : > { %v7870_v8 = vpop.eup %7869 }
 0x7bc   : > { %v1645_v9 = vmul.f32 %v7870_v8, %v8836_v26  ;;  %v7516_v26 = vld [vmem:[#allocation10 + $0x50] ss:$8 sps:$4 sm:$0xff]  }
 0x7bd   : > { %v7501_v8 = vld [vmem:[#allocation11 + $0xa0] ss:$16 sps:$4 sm:$0xff]  }
 0x7be   : > { %v1646_v10 = vpack.c.bf16 %v1645_v9, %v1645_v9  ;;  %v7509_v9 = vld [vmem:[#allocation11 + $0xc4] ss:$16 sps:$4 sm:$0xff]  }
 0x7c0   : > { %7097 = vmatmul.mubr.msk.bf16.vlgmr.msra.gmra.mrb[24].mxu0 %vm1535_vm2, %v1646_v10  ;;  %v7507_v10 = vld [vmem:[#allocation11 + $0xc0] ss:$16 sps:$4 sm:$0xff]  }
 0x7c1   : > { %2159 = vmatpush1.bf16.msra.mxu0 %v7486_v15  ;;  %v7519_v15 = vld [vmem:[#allocation11 + $0x100] ss:$16 sps:$4 sm:$0xff]  }
 0x7c2   : > { %2160 = vmatprep.subr.bf16.mxu0 %v7494_v20  ;;  %v7533_v20 = vld [vmem:[#allocation11 + $0x144] ss:$16 sps:$4 sm:$0xff]  }
 0x7c5   : > { %2161 = vmatpush1.bf16.msra.mxu0 %v7492_v19  ;;  %v7525_v19 = vld [vmem:[#allocation11 + $0x120] ss:$16 sps:$4 sm:$0xff]  }
 0x7c6   : > { %2162 = vmatprep.subr.bf16.mxu0 %v7500_v22  ;;  %v7539_v22 = vld [vmem:[#allocation11 + $0x164] ss:$16 sps:$4 sm:$0xff]  }
 0x7c9   : > { %2163 = vmatpush1.bf16.msra.mxu0 %v7498_v18  ;;  %v7531_v18 = vld [vmem:[#allocation11 + $0x140] ss:$16 sps:$4 sm:$0xff]  }
 0x7ca   : > { %2164 = vmatprep.subr.bf16.mxu0 %v7506_v24  ;;  %v7545_v24 = vld [vmem:[#allocation11 + $0x184] ss:$16 sps:$4 sm:$0xff]  }
 0x7cd   : > { %2165 = vmatpush1.bf16.msra.mxu0 %v7504_v23  ;;  %v7537_v23 = vld [vmem:[#allocation11 + $0x160] ss:$16 sps:$4 sm:$0xff]  }
 0x7ce   : > { %2166 = vmatprep.subr.bf16.mxu0 %v7512_v7  ;;  %v7551_v7 = vld [vmem:[#allocation11 + $0x1a4] ss:$16 sps:$4 sm:$0xff]  }
 0x7d1   : > { %2167 = vmatpush1.bf16.msra.mxu0 %v7510_v25  ;;  %v7543_v25 = vld [vmem:[#allocation11 + $0x180] ss:$16 sps:$4 sm:$0xff]  }
 0x7d2   : > { %2168 = vmatprep.subr.bf16.mxu0 %v7518_v27  ;;  %v7557_v27 = vld [vmem:[#allocation11 + $0x1c4] ss:$16 sps:$4 sm:$0xff]  }
 0x7d5   : > { %2169 = vmatpush1.bf16.msra.mxu0 %v7516_v26  ;;  %v7549_v26 = vld [vmem:[#allocation11 + $0x1a0] ss:$16 sps:$4 sm:$0xff]  }
 0x7d6   : > { %2170 = vmatprep.subr.bf16.mxu0 %v7524_v29  ;;  %v7563_v29 = vld [vmem:[#allocation11 + $0x1e4] ss:$16 sps:$4 sm:$0xff]  }
 0x7d9   : > { %2171 = vmatpush1.bf16.msra.mxu0 %v7522_v28  ;;  %v7555_v28 = vld [vmem:[#allocation11 + $0x1c0] ss:$16 sps:$4 sm:$0xff]  }
 0x7da   : > { %2172 = vmatprep.subr.bf16.mxu0 %v7530_v31  ;;  %v2200_v31 = vld [vmem:[%s8707_s16 + $0x8] sm:$0xff] }
 0x7dd   : > { %2173 = vmatpush1.bf16.msra.mxu0 %v7528_v30  ;;  %v7561_v30 = vld [vmem:[#allocation11 + $0x1e0] ss:$16 sps:$4 sm:$0xff]  }
 0x7de   : > { %2174 = vmatprep.subr.bf16.mxu0 %v7536_v34  ;;  %v2199_v34 = vld [vmem:[%s8707_s16] sm:$0xff]  ;;  %s9238_s16 = sld [smem:[#allocation37_spill]] }
 0x7e1   : > { %2175 = vmatpush1.bf16.msra.mxu0 %v7534_v33  ;;  %v2202_v33 = vpack.c.bf16 %v2200_v31, %v2200_v31  ;;  %v7588_v31 = vld [vmem:[#allocation11 + $0xa8] ss:$16 sps:$4 sm:$0xff]  }
 0x7e2   : > { %2176 = vmatprep.subr.bf16.mxu0 %v7542_v36  ;;  %v7569_v36 = vld [vmem:[#allocation10 + $0xe4] ss:$8 sps:$4 sm:$0xff]  }
 0x7e4   : > { %s9119_s13 = scalar_lea.hbm %s9238_s16, %s7059_s19 }
 0x7e5   : > { %2177 = vmatpush1.bf16.msra.mxu0 %v7540_v35  ;;  %v8847_v35 = vpack.c.bf16 %v2199_v34, %v2199_v34  ;;  %v7591_v34 = vld [vmem:[#allocation11 + $0xc8] ss:$16 sps:$4 sm:$0xff]  }
 0x7e6   : > { %2178 = vmatprep.subr.bf16.mxu0 %v7548_v38  ;;  %v7572_v38 = vld [vmem:[#allocation10 + $0xf4] ss:$8 sps:$4 sm:$0xff]  }
 0x7e9   : > { %2179 = vmatpush1.bf16.msra.mxu0 %v7546_v37  ;;  %v7567_v37 = vld [vmem:[#allocation10 + $0xe0] ss:$8 sps:$4 sm:$0xff]  }
 0x7ea   : > { %2180 = vmatprep.subr.bf16.mxu0 %v7554_v40  ;;  %v1488_v40 = vld [vmem:[%s9235_s9] ss:$4 sm:$0x3] }
 0x7ed   : > { %2181 = vmatpush1.bf16.msra.mxu0 %v7552_v39  ;;  %v7570_v39 = vld [vmem:[#allocation10 + $0xf0] ss:$8 sps:$4 sm:$0xff]  }
 0x7ee   : > { %2182 = vmatprep.subr.bf16.mxu0 %v7560_v42  ;;  %v1735_v42 = vrot.slane %v1488_v40, %v8764_v55 }
 0x7f1   : > { %2183 = vmatpush1.bf16.msra.mxu0 %v7558_v41  ;;  %v1731_v41 = vrot.slane %v1488_v40, %v8770_v57  ;;  %v7602_v40 = vld [vmem:[#allocation11 + $0x12c] ss:$16 sps:$4 sm:$0xff]  }
 0x7f2   : > { %2184 = vmatprep.subr.bf16.mxu0 %v7566_v44 }
 0x7f5   : > { %2185 = vmatpush1.bf16.msra.mxu0 %v7564_v43  ;;  %v1942_v43 = vrot.slane %v8754_v51, %v8802_v21 }
 0x7f6   : > { %2186 = vmatprep.subr.bf16.mxu0 %v7569_v36  ;;  %v7596_v36 = vld [vmem:[#allocation11 + $0xec] ss:$16 sps:$4 sm:$0xff]  }
 0x7f9   : > { %2187 = vmatpush1.bf16.msra.mxu0 %v7567_v37  ;;  %v7594_v37 = vld [vmem:[#allocation11 + $0xe8] ss:$16 sps:$4 sm:$0xff]  }
 0x7fa   : > { %2188 = vmatprep.subr.bf16.mxu0 %v7572_v38  ;;  %v7599_v38 = vld [vmem:[#allocation11 + $0x10c] ss:$16 sps:$4 sm:$0xff]  }
 0x7fd   : > { %2189 = vmatpush1.bf16.msra.mxu0 %v7570_v39  ;;  %v7597_v39 = vld [vmem:[#allocation11 + $0x108] ss:$16 sps:$4 sm:$0xff]  }
 0x893   : > { %v1687_v45 = vpop.f32.mrb[24].mxu0 }
 0x894   : > { %v7098_v46 = vpop.f32.mrb[25].mxu0  ;;  %v1694_v47 = vpack.c.bf16 %v1687_v45, %v1687_v45  ;;  %v1946_v45 = vrot.slane %v8756_v52, %v8802_v21 }
 0x895   : > { %v1690_v50 = vpop.f32.mrb[26].mxu0 }
 0x896   : > { %v7099_v60 = vpop.f32.mrb[27].mxu0  ;;  %1930 = vmatprep.mubr.bf16.mxu1 %v1694_v47 }
 0x897   : > { %1931 = vmatmul.mubr.bf16.vlgmr.msra.gmra.mrb[0].mxu1 %v1693_v49 }
 0x898   : > { %2610 = vmatpush1.bf16.msra.mxu1 %v7477_v48  ;;  %2641 = vmatprep.mubr.bf16.mxu1 %v2202_v33 }
 0x899   : > { %2611 = vmatprep.subr.bf16.mxu1 %v7482_v58 }
 0x89c   : > { %2612 = vmatpush1.bf16.msra.mxu1 %v7480_v62 }
 0x89d   : > { %2613 = vmatprep.subr.bf16.mxu1 %v7485_v63 }
 0x8a0   : > { %2614 = vmatpush1.bf16.msra.mxu1 %v7483_v0 }
 0x8a1   : > { %2615 = vmatprep.subr.bf16.mxu1 %v7491_v1 }
 0x8a4   : > { %2616 = vmatpush1.bf16.msra.mxu1 %v7489_v2  ;;  %v8874_v2 = vld [vmem:[%s9236_s25] sm:$0xf]  ;;  %s8287_s25 = smov [#allocation19]  }
 0x8a5   : > { %2617 = vmatprep.subr.bf16.mxu1 %v7497_v5  ;;  %s8183_s0 = sshll.u32 %s8287_s25, 4  ;;  %s8184_s0 = int_to_ptr.vmem [resolvable:$false] %s8183_s0 }
 0x8a6   : > { %s8185_s1 = scalar_lea.vmem %s8184_s0, 512  ;;  %p8186_p9 = scmp.lt.s32.totalorder %s9121_s5, %s8184_s0 }
 0x8a7   : > { %p8187_p4 = scmp.lt.s32.totalorder %s8185_s1, %s8179_s2 }
 0x8a8   : > { %2618 = vmatpush1.bf16.msra.mxu1 %v7495_v6 }
 0x8a9   : > { %2619 = vmatprep.subr.bf16.mxu1 %v7503_v13  ;;  %p8188_p8 = por %p8187_p4, %p8186_p9 }
 0x8ab   : > { %p8189_p0 = pnand %p8188_p8, %p8182_p6 }
 0x8ac   : > { %2620 = vmatpush1.bf16.msra.mxu1 %v7501_v8 }
 0x8ad   : > { %2621 = vmatprep.subr.bf16.mxu1 %v7509_v9 }
 0x8b0   : > { %2622 = vmatpush1.bf16.msra.mxu1 %v7507_v10  ;;  %v8884_v10 = vld [vmem:[%s9235_s9 + $0x1] ss:$4 sm:$0x3] }
 0x8b1   : > { %2623 = vmatprep.subr.bf16.mxu1 %v7515_v11  ;;  %v1991_v11 = vrot.slane %v8884_v10, %v8770_v57 }
 0x8b4   : > { %2624 = vmatpush1.bf16.msra.mxu1 %v7513_v12 }
 0x8b5   : > { %2625 = vmatprep.subr.bf16.mxu1 %v7521_v14 }
 0x8b8   : > { %2626 = vmatpush1.bf16.msra.mxu1 %v7519_v15 }
 0x8b9   : > { %2627 = vmatprep.subr.bf16.mxu1 %v7527_v17 }
 0x8bc   : > { %2628 = vmatpush1.bf16.msra.mxu1 %v7525_v19 }
 0x8bd   : > { %2629 = vmatprep.subr.bf16.mxu1 %v7533_v20 }
 0x8c0   : > { %2630 = vmatpush1.bf16.msra.mxu1 %v7531_v18  ;;  %v7573_v18 = vld [vmem:[#allocation11 + $0x8] ss:$16 sps:$4 sm:$0xff]  }
 0x8c1   : > { %2631 = vmatprep.subr.bf16.mxu1 %v7539_v22  ;;  %v7575_v22 = vld [vmem:[#allocation11 + $0xc] ss:$16 sps:$4 sm:$0xff]  }
 0x8c2   : > { %2650 = vmatprep.subr.bf16.mxu0 %v7575_v22 }
 0x8c4   : > { %2632 = vmatpush1.bf16.msra.mxu1 %v7537_v23  ;;  %v7578_v23 = vld [vmem:[#allocation11 + $0x2c] ss:$16 sps:$4 sm:$0xff]  }
 0x8c5   : > { %2633 = vmatprep.subr.bf16.mxu1 %v7545_v24  ;;  %v7576_v24 = vld [vmem:[#allocation11 + $0x28] ss:$16 sps:$4 sm:$0xff]  }
 0x8c8   : > { %2634 = vmatpush1.bf16.msra.mxu1 %v7543_v25  ;;  %v7581_v25 = vld [vmem:[#allocation11 + $0x4c] ss:$16 sps:$4 sm:$0xff]  }
 0x8c9   : > { %2635 = vmatprep.subr.bf16.mxu1 %v7551_v7  ;;  %v7579_v7 = vld [vmem:[#allocation11 + $0x48] ss:$16 sps:$4 sm:$0xff]  }
 0x8cc   : > { %2636 = vmatpush1.bf16.msra.mxu1 %v7549_v26  ;;  %v7584_v26 = vld [vmem:[#allocation11 + $0x6c] ss:$16 sps:$4 sm:$0xff]  }
 0x8cd   : > { %2637 = vmatprep.subr.bf16.mxu1 %v7557_v27  ;;  %v7582_v27 = vld [vmem:[#allocation11 + $0x68] ss:$16 sps:$4 sm:$0xff]  }
 0x8d0   : > { %2638 = vmatpush1.bf16.msra.mxu1 %v7555_v28  ;;  %v7587_v28 = vld [vmem:[#allocation11 + $0x8c] ss:$16 sps:$4 sm:$0xff]  }
 0x8d1   : > { %2639 = vmatprep.subr.bf16.mxu1 %v7563_v29  ;;  %v7585_v29 = vld [vmem:[#allocation11 + $0x88] ss:$16 sps:$4 sm:$0xff]  }
 0x8d4   : > { %2640 = vmatpush1.bf16.msra.mxu1 %v7561_v30  ;;  %v7590_v30 = vld [vmem:[#allocation11 + $0xac] ss:$16 sps:$4 sm:$0xff]  }
 0x8d5   : > { %7100 = vmatprep.subr.bf16.mxu1 %v8285_v16 }
 0x8d7   : > { %2642 = vmatmul.mubr.bf16.vlgmr.msra.gmra.mrb[4].mxu1 %v8847_v35 }
 0x8d8   : > { %7102 = vmatprep.mubr.msk.bf16.mxu1 %vm8286_vm0, %v8285_v16 }
 0x96a   : > { %v1932_v44 = vpop.f32.mrb[0].mxu1 }
 0x96b   : > { %v1933_v46 = vadd.f32 %v1932_v44, %v1731_v41  ;;  %v1934_v47 = vpop.f32.mrb[1].mxu1  ;;  %v7600_v41 = vld [vmem:[#allocation11 + $0x128] ss:$16 sps:$4 sm:$0xff]   ;;  %v7608_v44 = vld [vmem:[#allocation11 + $0x16c] ss:$16 sps:$4 sm:$0xff]  }
 0x96c   : > { %v1935_v48 = vadd.f32 %v1934_v47, %v1735_v42  ;;  %v1936_v49 = vpop.f32.mrb[2].mxu1  ;;  %v7605_v42 = vld [vmem:[#allocation11 + $0x14c] ss:$16 sps:$4 sm:$0xff]   ;;  %v7609_v47 = vld [vmem:[#allocation11 + $0x188] ss:$16 sps:$4 sm:$0xff]  }
 0x96d   : > { %v1947_v50 = vmul.f32 %v1942_v43, %v1933_v46  ;;  %v1937_v58 = vpop.f32.mrb[3].mxu1  ;;  %v7603_v43 = vld [vmem:[#allocation11 + $0x148] ss:$16 sps:$4 sm:$0xff]   ;;  %v7611_v46 = vld [vmem:[#allocation11 + $0x18c] ss:$16 sps:$4 sm:$0xff]  }
 0x96e   : > { %v1948_v60 = vmul.f32 %v1946_v45, %v1935_v48  ;;  %v7606_v45 = vld [vmem:[#allocation11 + $0x168] ss:$16 sps:$4 sm:$0xff]   ;;  %v7614_v48 = vld [vmem:[#allocation11 + $0x1ac] ss:$16 sps:$4 sm:$0xff]  }
 0x96f   : > { %v8862_v62 = vadd.f32 %v1947_v50, %v8782_v4  ;;  %v2272_v4 = vrot.slane %v8874_v2, %v8770_v57  ;;  %v7612_v49 = vld [vmem:[#allocation11 + $0x1a8] ss:$16 sps:$4 sm:$0xff]   ;;  %v7617_v50 = vld [vmem:[#allocation11 + $0x1cc] ss:$16 sps:$4 sm:$0xff]  }
 0x970   : > { %v8865_v63 = vadd.f32 %v1948_v60, %v8780_v3  ;;  %v7615_v58 = vld [vmem:[#allocation11 + $0x1c8] ss:$16 sps:$4 sm:$0xff]   ;;  %v7620_v60 = vld [vmem:[#allocation11 + $0x1ec] ss:$16 sps:$4 sm:$0xff]  }
 0x971   : > { %v1951_v1 = vpack.c.bf16 %v8862_v62, %v8862_v62 }
 0x972   : > { %v1952_v0 = vpack.c.bf16 %v8865_v63, %v8865_v63 }
 0x974   : > { %2190 = vmatprep.mubr.bf16.mxu0 %v1952_v0  ;;  %v7618_v0 = vld [vmem:[#allocation11 + $0x1e8] ss:$16 sps:$4 sm:$0xff]  }
 0x975   : > { %2191 = vmatmul.mubr.bf16.vlgmr.msra.gmra.mrb[28].mxu0 %v1951_v1 }
 0x976   : > { %2682 = vmatprep.mubr.bf16.mxu0 %v2202_v33  ;;  %2651 = vmatpush1.bf16.msra.mxu0 %v7573_v18  ;;  %v7593_v33 = vld [vmem:[#allocation11 + $0xcc] ss:$16 sps:$4 sm:$0xff]  }
 0x977   : > { %2652 = vmatprep.subr.bf16.mxu0 %v7578_v23 }
 0x97a   : > { %2653 = vmatpush1.bf16.msra.mxu0 %v7576_v24 }
 0x97b   : > { %2654 = vmatprep.subr.bf16.mxu0 %v7581_v25 }
 0x97e   : > { %2655 = vmatpush1.bf16.msra.mxu0 %v7579_v7  ;;  %v2276_v7 = vrot.slane %v8874_v2, %v8764_v55 }
 0x97f   : > { %2656 = vmatprep.subr.bf16.mxu0 %v7584_v26 }
 0x982   : > { %2657 = vmatpush1.bf16.msra.mxu0 %v7582_v27 }
 0x983   : > { %2658 = vmatprep.subr.bf16.mxu0 %v7587_v28  ;;  %v2284_v28 = vrot.slane %v8874_v2, %v8818_v59 }
 0x986   : > { %2659 = vmatpush1.bf16.msra.mxu0 %v7585_v29 }
 0x987   : > { %2660 = vmatprep.subr.bf16.mxu0 %v7590_v30  ;;  %v1995_v30 = vrot.slane %v8884_v10, %v8764_v55 }
 0x98a   : > { %2661 = vmatpush1.bf16.msra.mxu0 %v7588_v31 }
 0x98b   : > { %2662 = vmatprep.subr.bf16.mxu0 %v7593_v33 }
 0x98e   : > { %2663 = vmatpush1.bf16.msra.mxu0 %v7591_v34 }
 0x98f   : > { %2664 = vmatprep.subr.bf16.mxu0 %v7596_v36 }
 0x992   : > { %2665 = vmatpush1.bf16.msra.mxu0 %v7594_v37 }
 0x993   : > { %2666 = vmatprep.subr.bf16.mxu0 %v7599_v38 }
 0x996   : > { %2667 = vmatpush1.bf16.msra.mxu0 %v7597_v39 }
 0x997   : > { %2668 = vmatprep.subr.bf16.mxu0 %v7602_v40 }
 0x99a   : > { %2669 = vmatpush1.bf16.msra.mxu0 %v7600_v41 }
 0x99b   : > { %2670 = vmatprep.subr.bf16.mxu0 %v7605_v42 }
 0x99e   : > { %2671 = vmatpush1.bf16.msra.mxu0 %v7603_v43 }
 0x99f   : > { %2672 = vmatprep.subr.bf16.mxu0 %v7608_v44 }
 0x9a2   : > { %2673 = vmatpush1.bf16.msra.mxu0 %v7606_v45 }
 0x9a3   : > { %2674 = vmatprep.subr.bf16.mxu0 %v7611_v46 }
 0x9a6   : > { %2675 = vmatpush1.bf16.msra.mxu0 %v7609_v47 }
 0x9a7   : > { %2676 = vmatprep.subr.bf16.mxu0 %v7614_v48 }
 0x9aa   : > { %v2643_v5 = vpop.f32.mrb[4].mxu1  ;;  %2677 = vmatpush1.bf16.msra.mxu0 %v7612_v49  ;;  %v7621_v49 = vld [vmem:[#allocation13] ss:$8 sps:$4 sm:$0xff]  }
 0x9ab   : > { %v2644_v3 = vadd.f32 %v2643_v5, %v2272_v4  ;;  %v8878_v6 = vpop.f32.mrb[5].mxu1  ;;  %2678 = vmatprep.subr.bf16.mxu0 %v7617_v50  ;;  %v7623_v50 = vld [vmem:[#allocation13 + $0x4] ss:$8 sps:$4 sm:$0xff]  }
 0x9ac   : > { %v2647_v13 = vpop.f32.mrb[6].mxu1  ;;  %v2646_v27 = vadd.f32 %v8878_v6, %v2276_v7  ;;  %v7659_v7 = vld [vmem:[#allocation13 + $0xc4] ss:$8 sps:$4 sm:$0xff]  }
 0x9ad   : > { %v2695_v8 = vpack.c.bf16 %v2644_v3, %v2644_v3  ;;  %v2648_v9 = vpop.f32.mrb[7].mxu1 }
 0x9ae   : > { %2679 = vmatpush1.bf16.msra.mxu0 %v7615_v58  ;;  %v2696_v33 = vpack.c.bf16 %v2646_v27, %v2646_v27  ;;  %v7626_v58 = vld [vmem:[#allocation13 + $0x14] ss:$8 sps:$4 sm:$0xff]  }
 0x9af   : > { %7101 = vmatpush3.bf16.xpose.msra.mxu1 %v2695_v8  ;;  %2680 = vmatprep.subr.bf16.mxu0 %v7620_v60  ;;  %v7624_v60 = vld [vmem:[#allocation13 + $0x10] ss:$8 sps:$4 sm:$0xff]   ;;  %v7662_v27 = vld [vmem:[#allocation13 + $0xd4] ss:$8 sps:$4 sm:$0xff]  }
 0x9b0   : > { %7106 = vmatprep.subr.bf16.mxu1 %v8285_v16 }
 0x9b2   : > { %2681 = vmatpush1.bf16.msra.mxu0 %v7618_v0  ;;  %v7629_v0 = vld [vmem:[#allocation13 + $0x24] ss:$8 sps:$4 sm:$0xff]  }
 0x9b3   : > { %3100 = vmatprep.subr.bf16.mxu0 %v7623_v50 }
 0x9b5   : > { %2683 = vmatmul.mubr.bf16.vlgmr.msra.gmra.mrb[32].mxu0 %v8847_v35 }
 0x9b6   : > { %3101 = vmatpush1.bf16.msra.mxu0 %v7621_v49 }
 0x9b7   : > { %3102 = vmatprep.subr.bf16.mxu0 %v7626_v58 }
 0x9ba   : > { %3103 = vmatpush1.bf16.msra.mxu0 %v7624_v60  ;;  %v3181_v60 = vld [vmem:[#allocation14] sm:$0xff] }
 0x9bb   : > { %3104 = vmatprep.subr.bf16.mxu0 %v7629_v0  ;;  %v3185_v0 = vld [vmem:[#allocation14 + $0x20] sm:$0xff] }
 0xa48   : > { %v2192_v12 = vpop.f32.mrb[28].mxu0 }
 0xa49   : > { %v2193_v14 = vadd.f32 %v2192_v12, %v1991_v11  ;;  %v8888_v15 = vpop.f32.mrb[29].mxu0  ;;  %v2280_v12 = vrot.slane %v8874_v2, %v8802_v21 }
 0xa4a   : > { %v2196_v17 = vpop.f32.mrb[30].mxu0  ;;  %v2195_v36 = vadd.f32 %v8888_v15, %v1995_v30  ;;  %v7663_v30 = vld [vmem:[#allocation13 + $0xe0] ss:$8 sps:$4 sm:$0xff]  }
 0xa4b   : > { %v2693_v19 = vpack.c.bf16 %v2193_v14, %v2193_v14  ;;  %v2197_v20 = vpop.f32.mrb[31].mxu0 }
 0xa4c   : > { %v2694_v37 = vpack.c.bf16 %v2195_v36, %v2195_v36 }
 0xa4d   : > { %7103 = vmatmul.mubr.bf16.vlgmr.msra.gmra.mrb[8].mxu1 %v2693_v19 }
 0xa4e   : > { %7108 = vmatprep.mubr.msk.bf16.mxu1 %vm8286_vm0, %v8285_v16 }
 0xa88   : > { %v2684_v14 = vpop.f32.mrb[32].mxu0 }
 0xa89   : > { %v2685_v17 = vadd.f32 %v2684_v14, %v2280_v12  ;;  %v2686_v19 = vpop.f32.mrb[33].mxu0  ;;  %v7639_v12 = vld [vmem:[#allocation13 + $0x60] ss:$8 sps:$4 sm:$0xff]   ;;  %v7644_v14 = vld [vmem:[#allocation13 + $0x74] ss:$8 sps:$4 sm:$0xff]  }
 0xa8a   : > { %v2688_v20 = vpop.f32.mrb[34].mxu0  ;;  %v2687_v34 = vadd.f32 %v2686_v19, %v2284_v28  ;;  %v7647_v19 = vld [vmem:[#allocation13 + $0x84] ss:$8 sps:$4 sm:$0xff]   ;;  %v7660_v28 = vld [vmem:[#allocation13 + $0xd0] ss:$8 sps:$4 sm:$0xff]  }
 0xa8b   : > { %v2697_v18 = vpack.c.bf16 %v2685_v17, %v2685_v17  ;;  %v2689_v35 = vpop.f32.mrb[35].mxu0  ;;  %v7642_v17 = vld [vmem:[#allocation13 + $0x70] ss:$8 sps:$4 sm:$0xff]   ;;  %v7645_v20 = vld [vmem:[#allocation13 + $0x80] ss:$8 sps:$4 sm:$0xff]  }
 0xa8c   : > { %v2698_v6 = vpack.c.bf16 %v2687_v34, %v2687_v34  ;;  %v7648_v35 = vld [vmem:[#allocation13 + $0x90] ss:$8 sps:$4 sm:$0xff]  }
 0xa8d   : > { %v2755_v22 = vsel %vm1551_vm1, %v2697_v18, 0  ;;  %v7650_v18 = vld [vmem:[#allocation13 + $0x94] ss:$8 sps:$4 sm:$0xff]  }
 0xa8e   : > { %7107 = vmatpush3.bf16.msra.mxu1 %v2755_v22  ;;  %v2853_v2 = vsel %vm1551_vm1, %v2698_v6, 0  ;;  %v7653_v22 = vld [vmem:[#allocation13 + $0xa4] ss:$8 sps:$4 sm:$0xff]   ;;  %v7668_v6 = vld [vmem:[#allocation13 + $0xf4] ss:$8 sps:$4 sm:$0xff]  }
 0xa8f   : > { %7112 = vmatprep.subr.bf16.mxu1 %v8285_v16 }
 0xb20   : > { %v2733_v1 = vpop.f32.mrb[8].mxu1 }
 0xb21   : > { %v7104_v4 = vpop.f32.mrb[9].mxu1  ;;  %v2739_v5 = vsel %vm1535_vm2, %v2733_v1, -inf }
 0xb22   : > { %2740 = vmax.xlane.f32.xlu0 %v2739_v5  ;;  %v2736_v3 = vpop.f32.mrb[10].mxu1  ;;  %v7632_v4 = vld [vmem:[#allocation13 + $0x34] ss:$8 sps:$4 sm:$0xff]   ;;  %v7630_v5 = vld [vmem:[#allocation13 + $0x30] ss:$8 sps:$4 sm:$0xff]  }
 0xb23   : > { %v7105_v13 = vpop.f32.mrb[11].mxu1  ;;  %v7635_v3 = vld [vmem:[#allocation13 + $0x44] ss:$8 sps:$4 sm:$0xff]  }
 0xb24   : > { %v7633_v13 = vld [vmem:[#allocation13 + $0x40] ss:$8 sps:$4 sm:$0xff]  }
 0xbaf   : > { %v2741_v8 = vpop.xlane.xlu0 %2740 }
 0xbb0   : > { %v2742_v9 = vsub.f32 %v2733_v1, %v2741_v8  ;;  %v7627_v1 = vld [vmem:[#allocation13 + $0x20] ss:$8 sps:$4 sm:$0xff]   ;;  %v7638_v8 = vld [vmem:[#allocation13 + $0x54] ss:$8 sps:$4 sm:$0xff]  }
 0xbb1   : > { %3105 = vmatpush1.bf16.msra.mxu0 %v7627_v1  ;;  %v3182_v1 = vld [vmem:[#allocation14 + $0x8] sm:$0xff] }
 0xbb2   : > { %v2743_v11 = vmul.f32 1.442695, %v2742_v9  ;;  %3106 = vmatprep.subr.bf16.mxu0 %v7632_v4  ;;  %v7636_v9 = vld [vmem:[#allocation13 + $0x50] ss:$8 sps:$4 sm:$0xff]   ;;  %v6665_v4 = vcombine.low %v3181_v60, %v3185_v0 }
 0xbb4   : > { %7871 = vpow2.f32 %v2743_v11  ;;  %v7641_v11 = vld [vmem:[#allocation13 + $0x64] ss:$8 sps:$4 sm:$0xff]  }
 0xbb5   : > { %3107 = vmatpush1.bf16.msra.mxu0 %v7630_v5  ;;  %v6666_v5 = vcombine.high %v3181_v60, %v3185_v0 }
 0xbb6   : > { %3108 = vmatprep.subr.bf16.mxu0 %v7635_v3  ;;  %v3186_v3 = vld [vmem:[#allocation14 + $0x28] sm:$0xff] }
 0xbb9   : > { %3109 = vmatpush1.bf16.msra.mxu0 %v7633_v13  ;;  %v3189_v13 = vld [vmem:[#allocation14 + $0x40] sm:$0xff] }
 0xbba   : > { %3110 = vmatprep.subr.bf16.mxu0 %v7638_v8  ;;  %v3193_v8 = vld [vmem:[#allocation14 + $0x60] sm:$0xff] }
 0xbbd   : > { %3111 = vmatpush1.bf16.msra.mxu0 %v7636_v9  ;;  %v6667_v9 = vcombine.low %v3182_v1, %v3186_v3 }
 0xbbe   : > { %v7872_v23 = vpop.eup %7871  ;;  %3112 = vmatprep.subr.bf16.mxu0 %v7641_v11  ;;  %v6668_v11 = vcombine.high %v3182_v1, %v3186_v3  ;;  %v3238_v3 = vld [vmem:[#allocation14 + $0x1c8] sm:$0xff] }
 0xbbf   : > { %v2745_v24 = vsel %vm1535_vm2, %v7872_v23, 0.0 }
 0xbc0   : > { %2746 = vadd.xlane.f32.xlu1 %v2745_v24  ;;  %v7656_v24 = vld [vmem:[#allocation13 + $0xb4] ss:$8 sps:$4 sm:$0xff]  }
 0xbc1   : > { %3113 = vmatpush1.bf16.msra.mxu0 %v7639_v12  ;;  %v3190_v12 = vld [vmem:[#allocation14 + $0x48] sm:$0xff] }
 0xbc2   : > { %3114 = vmatprep.subr.bf16.mxu0 %v7644_v14  ;;  %v3194_v14 = vld [vmem:[#allocation14 + $0x68] sm:$0xff] }
 0xbc5   : > { %3115 = vmatpush1.bf16.msra.mxu0 %v7642_v17  ;;  %v3197_v17 = vld [vmem:[#allocation14 + $0x80] sm:$0xff] }
 0xbc6   : > { %3116 = vmatprep.subr.bf16.mxu0 %v7647_v19  ;;  %v3201_v19 = vld [vmem:[#allocation14 + $0xa0] sm:$0xff] }
 0xbc9   : > { %3117 = vmatpush1.bf16.msra.mxu0 %v7645_v20  ;;  %v3198_v20 = vld [vmem:[#allocation14 + $0x88] sm:$0xff] }
 0xbca   : > { %3118 = vmatprep.subr.bf16.mxu0 %v7650_v18  ;;  %v3202_v18 = vld [vmem:[#allocation14 + $0xa8] sm:$0xff] }
 0xbcd   : > { %3119 = vmatpush1.bf16.msra.mxu0 %v7648_v35  ;;  %v6673_v35 = vcombine.low %v3189_v13, %v3193_v8 }
 0xbce   : > { %3120 = vmatprep.subr.bf16.mxu0 %v7653_v22  ;;  %v6675_v22 = vcombine.low %v3190_v12, %v3194_v14 }
 0xc4d   : > { %v2747_v25 = vpop.xlane.xlu1 %2746 }
 0xc4e   : > { %7873 = vrcp.f32 %v2747_v25  ;;  %v7654_v25 = vld [vmem:[#allocation13 + $0xb0] ss:$8 sps:$4 sm:$0xff]  }
 0xc58   : > { %v7874_v26 = vpop.eup %7873 }
 0xc59   : > { %v2749_v29 = vmul.f32 %v7874_v26, %v7872_v23  ;;  %v7651_v23 = vld [vmem:[#allocation13 + $0xa0] ss:$8 sps:$4 sm:$0xff]  }
 0xc5a   : > { %3121 = vmatpush1.bf16.msra.mxu0 %v7651_v23  ;;  %v7657_v26 = vld [vmem:[#allocation13 + $0xc0] ss:$8 sps:$4 sm:$0xff]   ;;  %v6682_v23 = vcombine.high %v3197_v17, %v3201_v19 }
 0xc5b   : > { %v2750_v31 = vpack.c.bf16 %v2749_v29, %v2749_v29  ;;  %3122 = vmatprep.subr.bf16.mxu0 %v7656_v24  ;;  %v7665_v29 = vld [vmem:[#allocation13 + $0xe4] ss:$8 sps:$4 sm:$0xff]   ;;  %v6684_v24 = vcombine.high %v3198_v20, %v3202_v18 }
 0xc5d   : > { %7109 = vmatmul.mubr.msk.bf16.vlgmr.msra.gmra.mrb[12].mxu1 %vm1535_vm2, %v2750_v31 }
 0xc5e   : > { %7113 = vmatpush3.bf16.xpose.msra.mxu1 %v2696_v33  ;;  %7114 = vmatprep.mubr.msk.bf16.mxu1 %vm8286_vm0, %v8285_v16 }
 0xc5f   : > { %7118 = vmatprep.subr.bf16.mxu1 %v8285_v16  ;;  %3123 = vmatpush1.bf16.msra.mxu0 %v7654_v25  ;;  %v3205_v25 = vld [vmem:[#allocation14 + $0xc0] sm:$0xff] }
 0xc60   : > { %3124 = vmatprep.subr.bf16.mxu0 %v7659_v7  ;;  %v3209_v7 = vld [vmem:[#allocation14 + $0xe0] sm:$0xff] }
 0xc63   : > { %3125 = vmatpush1.bf16.msra.mxu0 %v7657_v26  ;;  %v3206_v26 = vld [vmem:[#allocation14 + $0xc8] sm:$0xff] }
 0xc64   : > { %3126 = vmatprep.subr.bf16.mxu0 %v7662_v27  ;;  %v3210_v27 = vld [vmem:[#allocation14 + $0xe8] sm:$0xff] }
 0xc65   : > { %7115 = vmatmul.mubr.bf16.vlgmr.msra.gmra.mrb[16].mxu1 %v2694_v37  ;;  %v7666_v37 = vld [vmem:[#allocation13 + $0xf0] ss:$8 sps:$4 sm:$0xff]  }
 0xc66   : > { %7119 = vmatpush3.bf16.msra.mxu1 %v2853_v2  ;;  %7120 = vmatprep.mubr.msk.bf16.mxu1 %vm8286_vm0, %v8285_v16 }
 0xc67   : > { %3127 = vmatpush1.bf16.msra.mxu0 %v7660_v28  ;;  %3991 = vmatprep.subr.bf16.mxu1 %v6666_v5  ;;  %v6681_v28 = vcombine.low %v3197_v17, %v3201_v19  ;;  %v3241_v5 = vld [vmem:[#allocation14 + $0x1e0] sm:$0xff]  ;;  %v3246_v17 = vld [vmem:[#allocation14 + $0x208] sm:$0xff] }
 0xc68   : > { %3128 = vmatprep.subr.bf16.mxu0 %v7665_v29  ;;  %v6683_v29 = vcombine.low %v3198_v20, %v3202_v18 }
 0xc6b   : > { %3129 = vmatpush1.bf16.msra.mxu0 %v7663_v30  ;;  %v6690_v30 = vcombine.high %v3205_v25, %v3209_v7 }
 0xc6c   : > { %3130 = vmatprep.subr.bf16.mxu0 %v7668_v6  ;;  %v3218_v6 = vld [vmem:[#allocation14 + $0x128] sm:$0xff] }
 0xc6f   : > { %3131 = vmatpush1.bf16.msra.mxu0 %v7666_v37  ;;  %v6689_v37 = vcombine.low %v3205_v25, %v3209_v7  ;;  %v3258_v25 = vld [vmem:[#allocation14 + $0x268] sm:$0xff] }
 0xc70   : > { %4032 = vmatprep.subr.bf16.mxu0 %v6668_v11 }
 0xd30   : > { %v8914_v10 = vpop.f32.mrb[12].mxu1 }
 0xd31   : > { %v7110_v38 = vpop.f32.mrb[13].mxu1 }
 0xd32   : > { %v2794_v39 = vpop.f32.mrb[14].mxu1 }
 0xd33   : > { %v7111_v40 = vpop.f32.mrb[15].mxu1 }
 0xd34   : > { %v2895_v40 = vpack.c.bf16 %v8914_v10, %v8914_v10 }
 0xd38   : > { %v2831_v41 = vpop.f32.mrb[16].mxu1 }
 0xd39   : > { %v7116_v42 = vpop.f32.mrb[17].mxu1  ;;  %v2837_v15 = vsel %vm1535_vm2, %v2831_v41, -inf }
 0xd3a   : > { %2838 = vmax.xlane.f32.xlu0 %v2837_v15  ;;  %v2834_v43 = vpop.f32.mrb[18].mxu1  ;;  %v6630_v15 = vld [vmem:[%s9235_s9 + $0x2] ss:$4 sm:$0x3] }
 0xd3b   : > { %v7117_v44 = vpop.f32.mrb[19].mxu1  ;;  %v2933_v43 = vrot.slane %v6630_v15, %v8770_v57 }
 0xd3c   : > { %v2937_v44 = vrot.slane %v6630_v15, %v8764_v55  ;;  %v3226_v15 = vld [vmem:[#allocation14 + $0x168] sm:$0xff] }
 0xdc7   : > { %v2839_v45 = vpop.xlane.xlu0 %2838 }
 0xdc8   : > { %v2840_v46 = vsub.f32 %v2831_v41, %v2839_v45 }
 0xdca   : > { %v2841_v47 = vmul.f32 1.442695, %v2840_v46 }
 0xdcc   : > { %7875 = vpow2.f32 %v2841_v47 }
 0xdd6   : > { %v8917_v48 = vpop.eup %7875 }
 0xdd7   : > { %v2843_v16 = vsel %vm1535_vm2, %v8917_v48, 0.0 }
 0xdd8   : > { %2844 = vadd.xlane.f32.xlu1 %v2843_v16 }
 0xe65   : > { %v2845_v31 = vpop.xlane.xlu1 %2844 }
 0xe66   : > { %7877 = vrcp.f32 %v2845_v31  ;;  %v6692_v31 = vcombine.high %v3206_v26, %v3210_v27 }
 0xe70   : > { %v7878_v33 = vpop.eup %7877 }
 0xe71   : > { %v2847_v34 = vmul.f32 %v7878_v33, %v8917_v48  ;;  %v3213_v33 = vld [vmem:[#allocation14 + $0x100] sm:$0xff] }
 0xe73   : > { %v2848_v36 = vpack.c.bf16 %v2847_v34, %v2847_v34  ;;  %v3217_v34 = vld [vmem:[#allocation14 + $0x120] sm:$0xff] }
 0xe75   : > { %7121 = vmatmul.mubr.msk.bf16.vlgmr.msra.gmra.mrb[20].mxu1 %vm1535_vm2, %v2848_v36  ;;  %v3214_v36 = vld [vmem:[#allocation14 + $0x108] sm:$0xff] }
 0xe76   : > { %3992 = vmatpush1.bf16.msra.mxu1 %v6665_v4  ;;  %v3237_v4 = vld [vmem:[#allocation14 + $0x1c0] sm:$0xff] }
 0xe77   : > { %v6722_v11 = vcombine.high %v3237_v4, %v3241_v5  ;;  %v6721_v19 = vcombine.low %v3237_v4, %v3241_v5  ;;  %v3282_v4 = vld [vmem:[#allocation14 + $0x328] sm:$0xff] }
 0xf48   : > { %v2889_v2 = vpop.f32.mrb[20].mxu1 }
 0xf49   : > { %v2896_v38 = vpack.c.bf16 %v2889_v2, %v2889_v2  ;;  %v7122_v39 = vpop.f32.mrb[21].mxu1  ;;  %v6691_v2 = vcombine.low %v3206_v26, %v3210_v27 }
 0xf4a   : > { %v2892_v41 = vpop.f32.mrb[22].mxu1  ;;  %v6700_v39 = vcombine.high %v3214_v36, %v3218_v6 }
 0xf4b   : > { %v7123_v42 = vpop.f32.mrb[23].mxu1  ;;  %3132 = vmatprep.mubr.bf16.mxu0 %v2896_v38  ;;  %v6698_v38 = vcombine.high %v3213_v33, %v3217_v34  ;;  %v3225_v41 = vld [vmem:[#allocation14 + $0x160] sm:$0xff] }
 0xf4c   : > { %3133 = vmatmul.mubr.bf16.vlgmr.msra.gmra.mrb[36].mxu0 %v2895_v40  ;;  %v3221_v40 = vld [vmem:[#allocation14 + $0x140] sm:$0xff]  ;;  %v3222_v42 = vld [vmem:[#allocation14 + $0x148] sm:$0xff] }
 0xf4d   : > { %4033 = vmatpush1.bf16.msra.mxu0 %v6667_v9  ;;  %v6707_v60 = vcombine.low %v3222_v42, %v3226_v15 }
0x101f   : > { %v3134_v45 = vpop.f32.mrb[36].mxu0 }
0x1020   : > { %v3135_v46 = vadd.f32 %v3134_v45, %v2933_v43  ;;  %v3136_v47 = vpop.f32.mrb[37].mxu0  ;;  %v6697_v43 = vcombine.low %v3213_v33, %v3217_v34  ;;  %v6706_v45 = vcombine.high %v3221_v40, %v3225_v41  ;;  %v3266_v33 = vld [vmem:[#allocation14 + $0x2a8] sm:$0xff] }
0x1021   : > { %v3137_v48 = vadd.f32 %v3136_v47, %v2937_v44  ;;  %v3138_v16 = vpop.f32.mrb[38].mxu0  ;;  %v6699_v44 = vcombine.low %v3214_v36, %v3218_v6  ;;  %v3229_v47 = vld [vmem:[#allocation14 + $0x180] sm:$0xff] }
0x1022   : > { %v8931_v49 = vadd.f32 %v3135_v46, %v8862_v62  ;;  %v3139_v10 = vpop.f32.mrb[39].mxu0  ;;  %v6674_v62 = vcombine.high %v3189_v13, %v3193_v8  ;;  %v6708_v46 = vcombine.high %v3222_v42, %v3226_v15  ;;  %v3230_v16 = vld [vmem:[#allocation14 + $0x188] sm:$0xff] }
0x1023   : > { %v8934_v50 = vadd.f32 %v3137_v48, %v8865_v63  ;;  %v6676_v63 = vcombine.high %v3190_v12, %v3194_v14  ;;  %v3233_v48 = vld [vmem:[#allocation14 + $0x1a0] sm:$0xff]  ;;  %v3234_v10 = vld [vmem:[#allocation14 + $0x1a8] sm:$0xff] }
0x1024   : > { %3993 = vmatprep.subr.bf16.mxu1 %v6674_v62  ;;  %v6714_v0 = vcombine.high %v3229_v47, %v3233_v48  ;;  %v6716_v1 = vcombine.high %v3230_v16, %v3234_v10  ;;  %v3242_v13 = vld [vmem:[#allocation14 + $0x1e8] sm:$0xff]  ;;  %v6713_v8 = vcombine.low %v3229_v47, %v3233_v48  ;;  %v6715_v9 = vcombine.low %v3230_v16, %v3234_v10  ;;  %v3245_v12 = vld [vmem:[#allocation14 + $0x200] sm:$0xff] }
0x1025   : > { %v3143_v58 = vadd.f32 %v8934_v50, %v8931_v49  ;;  %4034 = vmatprep.subr.bf16.mxu0 %v6676_v63  ;;  %3994 = vmatpush1.bf16.msra.mxu1 %v6673_v35  ;;  %v6724_v62 = vcombine.high %v3238_v3, %v3242_v13  ;;  %v3249_v14 = vld [vmem:[#allocation14 + $0x220] sm:$0xff]  ;;  %v3250_v63 = vld [vmem:[#allocation14 + $0x228] sm:$0xff]  ;;  %v6723_v20 = vcombine.low %v3238_v3, %v3242_v13 }
0x1026   : > { %4035 = vmatpush1.bf16.msra.mxu0 %v6675_v22  ;;  %3995 = vmatprep.subr.bf16.mxu1 %v6682_v23  ;;  %v6730_v18 = vcombine.high %v3245_v12, %v3249_v14  ;;  %v6732_v35 = vcombine.high %v3246_v17, %v3250_v63  ;;  %v3253_v22 = vld [vmem:[#allocation14 + $0x240] sm:$0xff]  ;;  %v6729_v7 = vcombine.low %v3245_v12, %v3249_v14  ;;  %v3270_v47 = vld [vmem:[#allocation14 + $0x2c8] sm:$0xff] }
0x1027   : > { %3144 = vadd.xlane.f32.xlu0 %v3143_v58  ;;  %4036 = vmatprep.subr.bf16.mxu0 %v6684_v24  ;;  %v6705_v58 = vcombine.low %v3221_v40, %v3225_v41  ;;  %v3257_v23 = vld [vmem:[#allocation14 + $0x260] sm:$0xff]  ;;  %v3254_v24 = vld [vmem:[#allocation14 + $0x248] sm:$0xff]  ;;  %v6731_v26 = vcombine.low %v3246_v17, %v3250_v63 }
0x1028   : > { %v6738_v27 = vcombine.high %v3253_v22, %v3257_v23  ;;  %v6737_v34 = vcombine.low %v3253_v22, %v3257_v23  ;;  %v6739_v36 = vcombine.low %v3254_v24, %v3258_v25  ;;  %v3274_v16 = vld [vmem:[#allocation14 + $0x2e8] sm:$0xff] }
0x1029   : > { %3996 = vmatpush1.bf16.msra.mxu1 %v6681_v28  ;;  %v6740_v28 = vcombine.high %v3254_v24, %v3258_v25  ;;  %v3290_v12 = vld [vmem:[#allocation14 + $0x368] sm:$0xff] }
0x102a   : > { %4037 = vmatpush1.bf16.msra.mxu0 %v6683_v29  ;;  %3997 = vmatprep.subr.bf16.mxu1 %v6690_v30  ;;  %v3261_v29 = vld [vmem:[#allocation14 + $0x280] sm:$0xff]  ;;  %v3298_v22 = vld [vmem:[#allocation14 + $0x3a8] sm:$0xff] }
0x102b   : > { %4038 = vmatprep.subr.bf16.mxu0 %v6692_v31  ;;  %v3265_v30 = vld [vmem:[#allocation14 + $0x2a0] sm:$0xff]  ;;  %v3262_v31 = vld [vmem:[#allocation14 + $0x288] sm:$0xff] }
0x102c   : > { %v6746_v6 = vcombine.high %v3261_v29, %v3265_v30 }
0x102d   : > { %3998 = vmatpush1.bf16.msra.mxu1 %v6689_v37  ;;  %v6748_v37 = vcombine.high %v3262_v31, %v3266_v33 }
0x102e   : > { %4039 = vmatpush1.bf16.msra.mxu0 %v6691_v2  ;;  %3999 = vmatprep.subr.bf16.mxu1 %v6698_v38  ;;  %v6745_v2 = vcombine.low %v3261_v29, %v3265_v30  ;;  %v6747_v38 = vcombine.low %v3262_v31, %v3266_v33  ;;  %v3306_v29 = vld [vmem:[#allocation14 + $0x3e8] sm:$0xff] }
0x102f   : > { %4040 = vmatprep.subr.bf16.mxu0 %v6700_v39 }
0x1031   : > { %4000 = vmatpush1.bf16.msra.mxu1 %v6697_v43 }
0x1032   : > { %4041 = vmatpush1.bf16.msra.mxu0 %v6699_v44  ;;  %4001 = vmatprep.subr.bf16.mxu1 %v6706_v45  ;;  %v3269_v45 = vld [vmem:[#allocation14 + $0x2c0] sm:$0xff] }
0x1033   : > { %4042 = vmatprep.subr.bf16.mxu0 %v6708_v46  ;;  %v3273_v46 = vld [vmem:[#allocation14 + $0x2e0] sm:$0xff] }
0x1034   : > { %v6754_v48 = vcombine.high %v3269_v45, %v3273_v46  ;;  %v6753_v10 = vcombine.low %v3269_v45, %v3273_v46  ;;  %v3166_v45 = vrot.slane %v8761_v54, %v8810_v32  ;;  %v3162_v46 = vrot.slane %v8767_v56, %v8810_v32  ;;  %v3191_v54 = vld [vmem:[#allocation14 + $0x50] sm:$0xff]  ;;  %v3192_v56 = vld [vmem:[#allocation14 + $0x58] sm:$0xff] }
0x1035   : > { %4002 = vmatpush1.bf16.msra.mxu1 %v6705_v58  ;;  %v6755_v58 = vcombine.low %v3270_v47, %v3274_v16 }
0x1036   : > { %4043 = vmatpush1.bf16.msra.mxu0 %v6707_v60  ;;  %4003 = vmatprep.subr.bf16.mxu1 %v6714_v0  ;;  %v3281_v60 = vld [vmem:[#allocation14 + $0x320] sm:$0xff]  ;;  %v3278_v0 = vld [vmem:[#allocation14 + $0x308] sm:$0xff] }
0x1037   : > { %4044 = vmatprep.subr.bf16.mxu0 %v6716_v1  ;;  %v6763_v3 = vcombine.low %v3278_v0, %v3282_v4  ;;  %v6764_v13 = vcombine.high %v3278_v0, %v3282_v4  ;;  %v3196_v4 = vld [vmem:[#allocation14 + $0x78] sm:$0xff] }
0x1039   : > { %4004 = vmatpush1.bf16.msra.mxu1 %v6713_v8  ;;  %v3285_v8 = vld [vmem:[#allocation14 + $0x340] sm:$0xff] }
0x103a   : > { %4045 = vmatpush1.bf16.msra.mxu0 %v6715_v9  ;;  %4005 = vmatprep.subr.bf16.mxu1 %v6722_v11  ;;  %v3289_v9 = vld [vmem:[#allocation14 + $0x360] sm:$0xff]  ;;  %v3286_v11 = vld [vmem:[#allocation14 + $0x348] sm:$0xff] }
0x103b   : > { %4046 = vmatprep.subr.bf16.mxu0 %v6724_v62  ;;  %v6770_v62 = vcombine.high %v3285_v8, %v3289_v9  ;;  %v6769_v14 = vcombine.low %v3285_v8, %v3289_v9  ;;  %v6771_v17 = vcombine.low %v3286_v11, %v3290_v12  ;;  %v6772_v63 = vcombine.high %v3286_v11, %v3290_v12  ;;  %v3203_v8 = vld [vmem:[#allocation14 + $0xb0] sm:$0xff]  ;;  %v3200_v9 = vld [vmem:[#allocation14 + $0x98] sm:$0xff] }
0x103c   : > { %v3204_v11 = vld [vmem:[#allocation14 + $0xb8] sm:$0xff]  ;;  %v6679_v12 = vcombine.low %v3192_v56, %v3196_v4 }
0x103d   : > { %4006 = vmatpush1.bf16.msra.mxu1 %v6721_v19  ;;  %v3293_v19 = vld [vmem:[#allocation14 + $0x380] sm:$0xff] }
0x103e   : > { %4047 = vmatpush1.bf16.msra.mxu0 %v6723_v20  ;;  %4007 = vmatprep.subr.bf16.mxu1 %v6730_v18  ;;  %v3297_v20 = vld [vmem:[#allocation14 + $0x3a0] sm:$0xff]  ;;  %v3294_v18 = vld [vmem:[#allocation14 + $0x388] sm:$0xff] }
0x103f   : > { %4048 = vmatprep.subr.bf16.mxu0 %v6732_v35  ;;  %v6778_v35 = vcombine.high %v3293_v19, %v3297_v20  ;;  %v6777_v23 = vcombine.low %v3293_v19, %v3297_v20  ;;  %v6779_v24 = vcombine.low %v3294_v18, %v3298_v22  ;;  %v6780_v25 = vcombine.high %v3294_v18, %v3298_v22  ;;  %v3211_v19 = vld [vmem:[#allocation14 + $0xf0] sm:$0xff]  ;;  %v3208_v20 = vld [vmem:[#allocation14 + $0xd8] sm:$0xff] }
0x1040   : > { %v3212_v18 = vld [vmem:[#allocation14 + $0xf8] sm:$0xff]  ;;  %v6687_v22 = vcombine.low %v3200_v9, %v3204_v11 }
0x1041   : > { %4008 = vmatpush1.bf16.msra.mxu1 %v6729_v7  ;;  %v3301_v7 = vld [vmem:[#allocation14 + $0x3c0] sm:$0xff] }
0x1042   : > { %4049 = vmatpush1.bf16.msra.mxu0 %v6731_v26  ;;  %4009 = vmatprep.subr.bf16.mxu1 %v6738_v27  ;;  %v3305_v26 = vld [vmem:[#allocation14 + $0x3e0] sm:$0xff]  ;;  %v3302_v27 = vld [vmem:[#allocation14 + $0x3c8] sm:$0xff] }
0x1043   : > { %4050 = vmatprep.subr.bf16.mxu0 %v6740_v28  ;;  %v6786_v28 = vcombine.high %v3301_v7, %v3305_v26  ;;  %v6785_v30 = vcombine.low %v3301_v7, %v3305_v26  ;;  %v6787_v31 = vcombine.low %v3302_v27, %v3306_v29  ;;  %v6788_v33 = vcombine.high %v3302_v27, %v3306_v29  ;;  %v3219_v7 = vld [vmem:[#allocation14 + $0x130] sm:$0xff]  ;;  %v3216_v26 = vld [vmem:[#allocation14 + $0x118] sm:$0xff] }
0x1044   : > { %v3220_v27 = vld [vmem:[#allocation14 + $0x138] sm:$0xff]  ;;  %v6695_v29 = vcombine.low %v3208_v20, %v3212_v18 }
0x1045   : > { %4010 = vmatpush1.bf16.msra.mxu1 %v6737_v34  ;;  %v3183_v34 = vld [vmem:[#allocation14 + $0x10] sm:$0xff] }
0x1046   : > { %4051 = vmatpush1.bf16.msra.mxu0 %v6739_v36  ;;  %4011 = vmatprep.subr.bf16.mxu1 %v6746_v6  ;;  %v3187_v36 = vld [vmem:[#allocation14 + $0x30] sm:$0xff]  ;;  %v3184_v6 = vld [vmem:[#allocation14 + $0x18] sm:$0xff] }
0x1047   : > { %4052 = vmatprep.subr.bf16.mxu0 %v6748_v37  ;;  %v6670_v37 = vcombine.high %v3183_v34, %v3187_v36 }
0x1049   : > { %4012 = vmatpush1.bf16.msra.mxu1 %v6745_v2  ;;  %v3188_v2 = vld [vmem:[#allocation14 + $0x38] sm:$0xff] }
0x104a   : > { %4053 = vmatpush1.bf16.msra.mxu0 %v6747_v38  ;;  %4013 = vmatprep.subr.bf16.mxu1 %v6754_v48  ;;  %v6669_v38 = vcombine.low %v3183_v34, %v3187_v36  ;;  %v3172_v48 = vrot.slane %v8754_v51, %v8818_v59  ;;  %v3227_v34 = vld [vmem:[#allocation14 + $0x170] sm:$0xff]  ;;  %v3224_v36 = vld [vmem:[#allocation14 + $0x158] sm:$0xff] }
0x104d   : > { %4014 = vmatpush1.bf16.msra.mxu1 %v6753_v10 }
0x10b4   : > { %v3145_v39 = vpop.xlane.xlu0 %3144 }
0x10b5   : > { %v3146_v40 = vmul.f32 0.00390625, %v3145_v39  ;;  %v6671_v39 = vcombine.low %v3184_v6, %v3188_v2 }
0x10b7   : > { %v8939_v41 = vsub.f32 %v8931_v49, %v3146_v40  ;;  %v8942_v42 = vsub.f32 %v8934_v50, %v3146_v40  ;;  %v6756_v49 = vcombine.high %v3270_v47, %v3274_v16  ;;  %v3277_v50 = vld [vmem:[#allocation14 + $0x300] sm:$0xff]  ;;  %v6672_v40 = vcombine.high %v3184_v6, %v3188_v2  ;;  %v3228_v6 = vld [vmem:[#allocation14 + $0x178] sm:$0xff] }
0x10b8   : > { %v6762_v1 = vcombine.high %v3277_v50, %v3281_v60  ;;  %v6761_v5 = vcombine.low %v3277_v50, %v3281_v60  ;;  %v3176_v16 = vrot.slane %v8756_v52, %v8818_v59  ;;  %v6703_v2 = vcombine.low %v3216_v26, %v3220_v27 }
0x10b9   : > { %v3149_v15 = vmul.f32 %v8939_v41, %v8939_v41  ;;  %v3150_v43 = vmul.f32 %v8942_v42, %v8942_v42  ;;  %4054 = vmatprep.subr.bf16.mxu0 %v6756_v49 }
0x10ba   : > { %4055 = vmatpush1.bf16.msra.mxu0 %v6755_v58  ;;  %4015 = vmatprep.subr.bf16.mxu1 %v6762_v1  ;;  %v3195_v1 = vld [vmem:[#allocation14 + $0x70] sm:$0xff] }
0x10bb   : > { %v3151_v44 = vadd.f32 %v3150_v43, %v3149_v15  ;;  %4056 = vmatprep.subr.bf16.mxu0 %v6764_v13  ;;  %4016 = vmatpush1.bf16.msra.mxu1 %v6761_v5  ;;  %v6680_v13 = vcombine.high %v3192_v56, %v3196_v4  ;;  %v3247_v4 = vld [vmem:[#allocation14 + $0x210] sm:$0xff] }
0x10bc   : > { %4017 = vmatprep.subr.bf16.mxu1 %v6770_v62  ;;  %v6677_v62 = vcombine.low %v3191_v54, %v3195_v1 }
0x10bd   : > { %3152 = vadd.xlane.f32.xlu1 %v3151_v44 }
0x10be   : > { %4057 = vmatpush1.bf16.msra.mxu0 %v6763_v3 }
0x10bf   : > { %4058 = vmatprep.subr.bf16.mxu0 %v6772_v63  ;;  %4018 = vmatpush1.bf16.msra.mxu1 %v6769_v14  ;;  %v3207_v63 = vld [vmem:[#allocation14 + $0xd0] sm:$0xff] }
0x10c0   : > { %4019 = vmatprep.subr.bf16.mxu1 %v6778_v35 }
0x10c2   : > { %4059 = vmatpush1.bf16.msra.mxu0 %v6771_v17  ;;  %v6688_v17 = vcombine.high %v3200_v9, %v3204_v11 }
0x10c3   : > { %4060 = vmatprep.subr.bf16.mxu0 %v6780_v25  ;;  %4020 = vmatpush1.bf16.msra.mxu1 %v6777_v23  ;;  %v6694_v23 = vcombine.high %v3207_v63, %v3211_v19  ;;  %v3215_v25 = vld [vmem:[#allocation14 + $0x110] sm:$0xff] }
0x10c4   : > { %4021 = vmatprep.subr.bf16.mxu1 %v6786_v28  ;;  %v6693_v28 = vcombine.low %v3207_v63, %v3211_v19  ;;  %v3260_v63 = vld [vmem:[#allocation14 + $0x278] sm:$0xff] }
0x10c6   : > { %4061 = vmatpush1.bf16.msra.mxu0 %v6779_v24  ;;  %v6696_v24 = vcombine.high %v3208_v20, %v3212_v18 }
0x10c7   : > { %4062 = vmatprep.subr.bf16.mxu0 %v6788_v33  ;;  %4022 = vmatpush1.bf16.msra.mxu1 %v6785_v30  ;;  %v6702_v30 = vcombine.high %v3215_v25, %v3219_v7  ;;  %v3223_v33 = vld [vmem:[#allocation14 + $0x150] sm:$0xff] }
0x10c8   : > { %4073 = vmatprep.subr.bf16.mxu1 %v6670_v37  ;;  %v6701_v37 = vcombine.low %v3215_v25, %v3219_v7  ;;  %v3268_v25 = vld [vmem:[#allocation14 + $0x2b8] sm:$0xff] }
0x10ca   : > { %4063 = vmatpush1.bf16.msra.mxu0 %v6787_v31  ;;  %v6704_v31 = vcombine.high %v3216_v26, %v3220_v27 }
0x10cb   : > { %4114 = vmatprep.subr.bf16.mxu0 %v6672_v40  ;;  %v3231_v40 = vld [vmem:[#allocation14 + $0x190] sm:$0xff] }
0x114a   : > { %v3153_v15 = vpop.xlane.xlu1 %3152 }
0x114b   : > { %v3154_v43 = vmul.f32 0.00390625, %v3153_v15  ;;  %v3235_v15 = vld [vmem:[#allocation14 + $0x1b0] sm:$0xff] }
0x114d   : > { %v3155_v44 = vadd.f32 1e-06, %v3154_v43  ;;  %v3232_v43 = vld [vmem:[#allocation14 + $0x198] sm:$0xff] }
0x114f   : > { %7879 = vrsqrt.f32 %v3155_v44  ;;  %v3236_v44 = vld [vmem:[#allocation14 + $0x1b8] sm:$0xff] }
0x1159   : > { %v7880_v47 = vpop.eup %7879 }
0x115a   : > { %v3157_v10 = vmul.f32 %v7880_v47, %v8939_v41  ;;  %v3158_v58 = vmul.f32 %v7880_v47, %v8942_v42  ;;  %v3199_v41 = vld [vmem:[#allocation14 + $0x90] sm:$0xff]  ;;  %v6678_v42 = vcombine.high %v3191_v54, %v3195_v1  ;;  %v6718_v47 = vcombine.high %v3231_v40, %v3235_v15 }
0x115b   : > { %v6686_v14 = vcombine.high %v3199_v41, %v3203_v8  ;;  %v6685_v35 = vcombine.low %v3199_v41, %v3203_v8  ;;  %v6719_v54 = vcombine.low %v3232_v43, %v3236_v44  ;;  %v3251_v41 = vld [vmem:[#allocation14 + $0x230] sm:$0xff] }
0x115c   : > { %v3167_v49 = vmul.f32 %v3162_v46, %v3157_v10  ;;  %v3168_v50 = vmul.f32 %v3166_v45, %v3158_v58  ;;  %v6709_v45 = vcombine.low %v3223_v33, %v3227_v34  ;;  %v6711_v46 = vcombine.low %v3224_v36, %v3228_v6  ;;  %v3243_v10 = vld [vmem:[#allocation14 + $0x1f0] sm:$0xff]  ;;  %v3240_v58 = vld [vmem:[#allocation14 + $0x1d8] sm:$0xff] }
0x115d   : > { %v6734_v11 = vcombine.high %v3247_v4, %v3251_v41  ;;  %v6733_v19 = vcombine.low %v3247_v4, %v3251_v41  ;;  %v3300_v4 = vld [vmem:[#allocation14 + $0x3b8] sm:$0xff] }
0x115e   : > { %v8958_v60 = vadd.f32 %v3172_v48, %v3167_v49  ;;  %v8960_v0 = vadd.f32 %v3176_v16, %v3168_v50  ;;  %v6720_v48 = vcombine.high %v3232_v43, %v3236_v44  ;;  %v3239_v16 = vld [vmem:[#allocation14 + $0x1d0] sm:$0xff]  ;;  %v3244_v49 = vld [vmem:[#allocation14 + $0x1f8] sm:$0xff]  ;;  %v6717_v50 = vcombine.low %v3231_v40, %v3235_v15 }
0x115f   : > { %v6726_v1 = vcombine.high %v3239_v16, %v3243_v10  ;;  %v6728_v56 = vcombine.high %v3240_v58, %v3244_v49  ;;  %v6725_v8 = vcombine.low %v3239_v16, %v3243_v10  ;;  %v6727_v9 = vcombine.low %v3240_v58, %v3244_v49  ;;  %v3284_v40 = vld [vmem:[#allocation14 + $0x338] sm:$0xff] }
0x1160   : > { %v8964_v5 = vpack.c.bf16 %v8958_v60, %v8958_v60  ;;  %v8968_v3 = vpack.c.bf16 %v8960_v0, %v8960_v0  ;;  %v3292_v16 = vld [vmem:[#allocation14 + $0x378] sm:$0xff] }
0x1162   : > { %4023 = vmatprep.mubr.bf16.mxu1 %v8968_v3  ;;  %4064 = vmatprep.mubr.bf16.mxu0 %v8968_v3 }
0x1163   : > { %4024 = vmatmul.mubr.bf16.vlgmr.msra.gmra.mrb[24].mxu1 %v8964_v5  ;;  %4065 = vmatmul.mubr.bf16.vlgmr.msra.gmra.mrb[40].mxu0 %v8964_v5 }
0x1164   : > { %4074 = vmatpush1.bf16.msra.mxu1 %v6669_v38  ;;  %4115 = vmatpush1.bf16.msra.mxu0 %v6671_v39  ;;  %v6710_v38 = vcombine.high %v3223_v33, %v3227_v34  ;;  %v6712_v39 = vcombine.high %v3224_v36, %v3228_v6  ;;  %v3276_v33 = vld [vmem:[#allocation14 + $0x2f8] sm:$0xff] }
0x1165   : > { %4105 = vmatprep.mubr.bf16.mxu1 %v8968_v3  ;;  %4146 = vmatprep.mubr.bf16.mxu0 %v8968_v3 }
0x1166   : > { %4075 = vmatprep.subr.bf16.mxu1 %v6678_v42  ;;  %4116 = vmatprep.subr.bf16.mxu0 %v6680_v13  ;;  %v3248_v42 = vld [vmem:[#allocation14 + $0x218] sm:$0xff] }
0x1167   : > { %v3252_v13 = vld [vmem:[#allocation14 + $0x238] sm:$0xff] }
0x1168   : > { %4076 = vmatpush1.bf16.msra.mxu1 %v6677_v62  ;;  %4117 = vmatpush1.bf16.msra.mxu0 %v6679_v12  ;;  %v6736_v62 = vcombine.high %v3248_v42, %v3252_v13  ;;  %v3255_v12 = vld [vmem:[#allocation14 + $0x250] sm:$0xff]  ;;  %v6735_v20 = vcombine.low %v3248_v42, %v3252_v13 }
0x1169   : > { %4077 = vmatprep.subr.bf16.mxu1 %v6686_v14  ;;  %4118 = vmatprep.subr.bf16.mxu0 %v6688_v17  ;;  %v3259_v14 = vld [vmem:[#allocation14 + $0x270] sm:$0xff]  ;;  %v3256_v17 = vld [vmem:[#allocation14 + $0x258] sm:$0xff] }
0x116a   : > { %v6742_v18 = vcombine.high %v3255_v12, %v3259_v14  ;;  %v6741_v7 = vcombine.low %v3255_v12, %v3259_v14  ;;  %v6743_v26 = vcombine.low %v3256_v17, %v3260_v63  ;;  %v3308_v12 = vld [vmem:[#allocation14 + $0x3f8] sm:$0xff] }
0x116c   : > { %4078 = vmatpush1.bf16.msra.mxu1 %v6685_v35  ;;  %4119 = vmatpush1.bf16.msra.mxu0 %v6687_v22  ;;  %v6744_v35 = vcombine.high %v3256_v17, %v3260_v63  ;;  %v3263_v22 = vld [vmem:[#allocation14 + $0x290] sm:$0xff] }
0x116d   : > { %4079 = vmatprep.subr.bf16.mxu1 %v6694_v23  ;;  %4120 = vmatprep.subr.bf16.mxu0 %v6696_v24  ;;  %v3267_v23 = vld [vmem:[#allocation14 + $0x2b0] sm:$0xff]  ;;  %v3264_v24 = vld [vmem:[#allocation14 + $0x298] sm:$0xff] }
0x116e   : > { %v6750_v27 = vcombine.high %v3263_v22, %v3267_v23  ;;  %v6749_v34 = vcombine.low %v3263_v22, %v3267_v23  ;;  %v6751_v36 = vcombine.low %v3264_v24, %v3268_v25  ;;  %v4160_v22 = vld [vmem:[#allocation16 + $0x28] sm:$0xff] }
0x1170   : > { %4080 = vmatpush1.bf16.msra.mxu1 %v6693_v28  ;;  %4121 = vmatpush1.bf16.msra.mxu0 %v6695_v29  ;;  %v6752_v28 = vcombine.high %v3264_v24, %v3268_v25  ;;  %v3271_v29 = vld [vmem:[#allocation14 + $0x2d0] sm:$0xff] }
0x1171   : > { %4081 = vmatprep.subr.bf16.mxu1 %v6702_v30  ;;  %4122 = vmatprep.subr.bf16.mxu0 %v6704_v31  ;;  %v3275_v30 = vld [vmem:[#allocation14 + $0x2f0] sm:$0xff]  ;;  %v3272_v31 = vld [vmem:[#allocation14 + $0x2d8] sm:$0xff] }
0x1172   : > { %v6758_v6 = vcombine.high %v3271_v29, %v3275_v30  ;;  %v6757_v15 = vcombine.low %v3271_v29, %v3275_v30  ;;  %v6759_v43 = vcombine.low %v3272_v31, %v3276_v33  ;;  %v4168_v29 = vld [vmem:[#allocation16 + $0x68] sm:$0xff] }
0x1174   : > { %4082 = vmatpush1.bf16.msra.mxu1 %v6701_v37  ;;  %4123 = vmatpush1.bf16.msra.mxu0 %v6703_v2  ;;  %v6760_v37 = vcombine.high %v3272_v31, %v3276_v33  ;;  %v3279_v2 = vld [vmem:[#allocation14 + $0x310] sm:$0xff] }
0x1175   : > { %4083 = vmatprep.subr.bf16.mxu1 %v6710_v38  ;;  %4124 = vmatprep.subr.bf16.mxu0 %v6712_v39  ;;  %v3283_v38 = vld [vmem:[#allocation14 + $0x330] sm:$0xff]  ;;  %v3280_v39 = vld [vmem:[#allocation14 + $0x318] sm:$0xff] }
0x1176   : > { %v6766_v44 = vcombine.high %v3279_v2, %v3283_v38  ;;  %v6765_v10 = vcombine.low %v3279_v2, %v3283_v38  ;;  %v6767_v58 = vcombine.low %v3280_v39, %v3284_v40  ;;  %v4176_v2 = vld [vmem:[#allocation16 + $0xa8] sm:$0xff] }
0x1178   : > { %4084 = vmatpush1.bf16.msra.mxu1 %v6709_v45  ;;  %4125 = vmatpush1.bf16.msra.mxu0 %v6711_v46  ;;  %v6768_v45 = vcombine.high %v3280_v39, %v3284_v40  ;;  %v3287_v46 = vld [vmem:[#allocation14 + $0x350] sm:$0xff] }
0x1179   : > { %4085 = vmatprep.subr.bf16.mxu1 %v6718_v47  ;;  %4126 = vmatprep.subr.bf16.mxu0 %v6720_v48  ;;  %v3291_v47 = vld [vmem:[#allocation14 + $0x370] sm:$0xff]  ;;  %v3288_v48 = vld [vmem:[#allocation14 + $0x358] sm:$0xff] }
0x117a   : > { %v6774_v49 = vcombine.high %v3287_v46, %v3291_v47  ;;  %v6773_v41 = vcombine.low %v3287_v46, %v3291_v47  ;;  %v6775_v42 = vcombine.low %v3288_v48, %v3292_v16  ;;  %v4184_v46 = vld [vmem:[#allocation16 + $0xe8] sm:$0xff] }
0x117c   : > { %4086 = vmatpush1.bf16.msra.mxu1 %v6717_v50  ;;  %4127 = vmatpush1.bf16.msra.mxu0 %v6719_v54  ;;  %v6776_v50 = vcombine.high %v3288_v48, %v3292_v16  ;;  %v3295_v54 = vld [vmem:[#allocation14 + $0x390] sm:$0xff] }
0x117d   : > { %4087 = vmatprep.subr.bf16.mxu1 %v6726_v1  ;;  %4128 = vmatprep.subr.bf16.mxu0 %v6728_v56  ;;  %v3299_v1 = vld [vmem:[#allocation14 + $0x3b0] sm:$0xff]  ;;  %v3296_v56 = vld [vmem:[#allocation14 + $0x398] sm:$0xff] }
0x117e   : > { %v6782_v13 = vcombine.high %v3295_v54, %v3299_v1  ;;  %v6781_v14 = vcombine.low %v3295_v54, %v3299_v1  ;;  %v6783_v17 = vcombine.low %v3296_v56, %v3300_v4  ;;  %v4192_v54 = vld [vmem:[#allocation16 + $0x128] sm:$0xff] }
0x1180   : > { %4088 = vmatpush1.bf16.msra.mxu1 %v6725_v8  ;;  %4129 = vmatpush1.bf16.msra.mxu0 %v6727_v9  ;;  %v6784_v8 = vcombine.high %v3296_v56, %v3300_v4  ;;  %v3303_v9 = vld [vmem:[#allocation14 + $0x3d0] sm:$0xff] }
0x1181   : > { %4089 = vmatprep.subr.bf16.mxu1 %v6734_v11  ;;  %4130 = vmatprep.subr.bf16.mxu0 %v6736_v62  ;;  %v3307_v11 = vld [vmem:[#allocation14 + $0x3f0] sm:$0xff]  ;;  %v3304_v62 = vld [vmem:[#allocation14 + $0x3d8] sm:$0xff] }
0x1182   : > { %v6790_v63 = vcombine.high %v3303_v9, %v3307_v11  ;;  %v6789_v23 = vcombine.low %v3303_v9, %v3307_v11  ;;  %v6791_v24 = vcombine.low %v3304_v62, %v3308_v12  ;;  %v4200_v9 = vld [vmem:[#allocation16 + $0x168] sm:$0xff] }
0x1184   : > { %4090 = vmatpush1.bf16.msra.mxu1 %v6733_v19  ;;  %4131 = vmatpush1.bf16.msra.mxu0 %v6735_v20  ;;  %v6792_v19 = vcombine.high %v3304_v62, %v3308_v12  ;;  %v4155_v20 = vld [vmem:[#allocation16] sm:$0xff] }
0x1185   : > { %4091 = vmatprep.subr.bf16.mxu1 %v6742_v18  ;;  %4132 = vmatprep.subr.bf16.mxu0 %v6744_v35  ;;  %v4159_v18 = vld [vmem:[#allocation16 + $0x20] sm:$0xff]  ;;  %v4156_v35 = vld [vmem:[#allocation16 + $0x8] sm:$0xff] }
0x1186   : > { %v6795_v25 = vcombine.high %v4155_v20, %v4159_v18  ;;  %v6794_v30 = vcombine.low %v4155_v20, %v4159_v18  ;;  %v6796_v31 = vcombine.low %v4156_v35, %v4160_v22  ;;  %v4208_v20 = vld [vmem:[#allocation16 + $0x1a8] sm:$0xff] }
0x1188   : > { %4092 = vmatpush1.bf16.msra.mxu1 %v6741_v7  ;;  %4133 = vmatpush1.bf16.msra.mxu0 %v6743_v26  ;;  %v6797_v7 = vcombine.high %v4156_v35, %v4160_v22  ;;  %v4163_v26 = vld [vmem:[#allocation16 + $0x40] sm:$0xff] }
0x1189   : > { %4093 = vmatprep.subr.bf16.mxu1 %v6750_v27  ;;  %4134 = vmatprep.subr.bf16.mxu0 %v6752_v28  ;;  %v4167_v27 = vld [vmem:[#allocation16 + $0x60] sm:$0xff]  ;;  %v4164_v28 = vld [vmem:[#allocation16 + $0x48] sm:$0xff] }
0x118a   : > { %v6803_v33 = vcombine.high %v4163_v26, %v4167_v27  ;;  %v6802_v38 = vcombine.low %v4163_v26, %v4167_v27  ;;  %v6804_v39 = vcombine.low %v4164_v28, %v4168_v29  ;;  %v4216_v26 = vld [vmem:[#allocation16 + $0x1e8] sm:$0xff] }
0x118c   : > { %4094 = vmatpush1.bf16.msra.mxu1 %v6749_v34  ;;  %4135 = vmatpush1.bf16.msra.mxu0 %v6751_v36  ;;  %v6805_v34 = vcombine.high %v4164_v28, %v4168_v29  ;;  %v4171_v36 = vld [vmem:[#allocation16 + $0x80] sm:$0xff] }
0x118d   : > { %4095 = vmatprep.subr.bf16.mxu1 %v6758_v6  ;;  %4136 = vmatprep.subr.bf16.mxu0 %v6760_v37  ;;  %v4175_v6 = vld [vmem:[#allocation16 + $0xa0] sm:$0xff]  ;;  %v4172_v37 = vld [vmem:[#allocation16 + $0x88] sm:$0xff] }
0x118e   : > { %v6811_v40 = vcombine.high %v4171_v36, %v4175_v6  ;;  %v6810_v47 = vcombine.low %v4171_v36, %v4175_v6  ;;  %v6812_v48 = vcombine.low %v4172_v37, %v4176_v2  ;;  %v4224_v36 = vld [vmem:[#allocation16 + $0x228] sm:$0xff] }
0x1190   : > { %4096 = vmatpush1.bf16.msra.mxu1 %v6757_v15  ;;  %4137 = vmatpush1.bf16.msra.mxu0 %v6759_v43  ;;  %v6813_v15 = vcombine.high %v4172_v37, %v4176_v2  ;;  %v4179_v43 = vld [vmem:[#allocation16 + $0xc0] sm:$0xff] }
0x1191   : > { %4097 = vmatprep.subr.bf16.mxu1 %v6766_v44  ;;  %4138 = vmatprep.subr.bf16.mxu0 %v6768_v45  ;;  %v4183_v44 = vld [vmem:[#allocation16 + $0xe0] sm:$0xff]  ;;  %v4180_v45 = vld [vmem:[#allocation16 + $0xc8] sm:$0xff] }
0x1192   : > { %v6819_v16 = vcombine.high %v4179_v43, %v4183_v44  ;;  %v6818_v1 = vcombine.low %v4179_v43, %v4183_v44  ;;  %v6820_v56 = vcombine.low %v4180_v45, %v4184_v46  ;;  %v4232_v43 = vld [vmem:[#allocation16 + $0x268] sm:$0xff] }
0x1194   : > { %4098 = vmatpush1.bf16.msra.mxu1 %v6765_v10  ;;  %4139 = vmatpush1.bf16.msra.mxu0 %v6767_v58  ;;  %v6821_v10 = vcombine.high %v4180_v45, %v4184_v46  ;;  %v4187_v58 = vld [vmem:[#allocation16 + $0x100] sm:$0xff] }
0x1195   : > { %4099 = vmatprep.subr.bf16.mxu1 %v6774_v49  ;;  %4140 = vmatprep.subr.bf16.mxu0 %v6776_v50  ;;  %v4191_v49 = vld [vmem:[#allocation16 + $0x120] sm:$0xff]  ;;  %v4188_v50 = vld [vmem:[#allocation16 + $0x108] sm:$0xff] }
0x1196   : > { %v6827_v4 = vcombine.high %v4187_v58, %v4191_v49  ;;  %v6826_v11 = vcombine.low %v4187_v58, %v4191_v49  ;;  %v6828_v62 = vcombine.low %v4188_v50, %v4192_v54  ;;  %v4240_v58 = vld [vmem:[#allocation16 + $0x2a8] sm:$0xff] }
0x1198   : > { %4100 = vmatpush1.bf16.msra.mxu1 %v6773_v41  ;;  %4141 = vmatpush1.bf16.msra.mxu0 %v6775_v42  ;;  %v6829_v41 = vcombine.high %v4188_v50, %v4192_v54  ;;  %v4195_v42 = vld [vmem:[#allocation16 + $0x140] sm:$0xff] }
0x1199   : > { %4101 = vmatprep.subr.bf16.mxu1 %v6782_v13  ;;  %4142 = vmatprep.subr.bf16.mxu0 %v6784_v8  ;;  %v4199_v13 = vld [vmem:[#allocation16 + $0x160] sm:$0xff]  ;;  %v4196_v8 = vld [vmem:[#allocation16 + $0x148] sm:$0xff] }
0x119a   : > { %v6835_v12 = vcombine.high %v4195_v42, %v4199_v13  ;;  %v6834_v18 = vcombine.low %v4195_v42, %v4199_v13  ;;  %v6836_v35 = vcombine.low %v4196_v8, %v4200_v9  ;;  %v4248_v42 = vld [vmem:[#allocation16 + $0x2e8] sm:$0xff] }
0x119c   : > { %4102 = vmatpush1.bf16.msra.mxu1 %v6781_v14  ;;  %4143 = vmatpush1.bf16.msra.mxu0 %v6783_v17  ;;  %v6837_v14 = vcombine.high %v4196_v8, %v4200_v9  ;;  %v4203_v17 = vld [vmem:[#allocation16 + $0x180] sm:$0xff] }
0x119d   : > { %4103 = vmatprep.subr.bf16.mxu1 %v6790_v63  ;;  %4144 = vmatprep.subr.bf16.mxu0 %v6792_v19  ;;  %v4207_v63 = vld [vmem:[#allocation16 + $0x1a0] sm:$0xff]  ;;  %v4204_v19 = vld [vmem:[#allocation16 + $0x188] sm:$0xff] }
0x119e   : > { %v6843_v22 = vcombine.high %v4203_v17, %v4207_v63  ;;  %v6842_v27 = vcombine.low %v4203_v17, %v4207_v63  ;;  %v6844_v28 = vcombine.low %v4204_v19, %v4208_v20  ;;  %v4256_v17 = vld [vmem:[#allocation16 + $0x328] sm:$0xff] }
0x11a0   : > { %4104 = vmatpush1.bf16.msra.mxu1 %v6789_v23  ;;  %4145 = vmatpush1.bf16.msra.mxu0 %v6791_v24  ;;  %v6845_v23 = vcombine.high %v4204_v19, %v4208_v20  ;;  %v4211_v24 = vld [vmem:[#allocation16 + $0x1c0] sm:$0xff] }
0x11a1   : > { %4966 = vmatprep.subr.bf16.mxu1 %v6795_v25  ;;  %5007 = vmatprep.subr.bf16.mxu0 %v6797_v7  ;;  %v4215_v25 = vld [vmem:[#allocation16 + $0x1e0] sm:$0xff]  ;;  %v4212_v7 = vld [vmem:[#allocation16 + $0x1c8] sm:$0xff] }
0x11a2   : > { %v6851_v29 = vcombine.high %v4211_v24, %v4215_v25  ;;  %v6850_v6 = vcombine.low %v4211_v24, %v4215_v25  ;;  %v6852_v37 = vcombine.low %v4212_v7, %v4216_v26  ;;  %v4264_v24 = vld [vmem:[#allocation16 + $0x368] sm:$0xff] }
0x11a3   : > { %4106 = vmatmul.mubr.bf16.vlgmr.msra.gmra.mrb[28].mxu1 %v8964_v5  ;;  %4147 = vmatmul.mubr.bf16.vlgmr.msra.gmra.mrb[44].mxu0 %v8964_v5 }
0x11a4   : > { %4967 = vmatpush1.bf16.msra.mxu1 %v6794_v30  ;;  %4998 = vmatprep.mubr.bf16.mxu1 %v8968_v3  ;;  %v6853_v30 = vcombine.high %v4212_v7, %v4216_v26 }
0x11a5   : > { %5008 = vmatpush1.bf16.msra.mxu0 %v6796_v31  ;;  %5039 = vmatprep.mubr.bf16.mxu0 %v8968_v3  ;;  %v4219_v31 = vld [vmem:[#allocation16 + $0x200] sm:$0xff] }
0x11a6   : > { %4968 = vmatprep.subr.bf16.mxu1 %v6803_v33  ;;  %5009 = vmatprep.subr.bf16.mxu0 %v6805_v34  ;;  %v4223_v33 = vld [vmem:[#allocation16 + $0x220] sm:$0xff]  ;;  %v4220_v34 = vld [vmem:[#allocation16 + $0x208] sm:$0xff] }
0x11a7   : > { %v6859_v2 = vcombine.high %v4219_v31, %v4223_v33  ;;  %v6858_v44 = vcombine.low %v4219_v31, %v4223_v33  ;;  %v6860_v45 = vcombine.low %v4220_v34, %v4224_v36  ;;  %v4272_v31 = vld [vmem:[#allocation16 + $0x3a8] sm:$0xff] }
0x11a8   : > { %4969 = vmatpush1.bf16.msra.mxu1 %v6802_v38  ;;  %v6861_v38 = vcombine.high %v4220_v34, %v4224_v36 }
0x11a9   : > { %5010 = vmatpush1.bf16.msra.mxu0 %v6804_v39  ;;  %4970 = vmatprep.subr.bf16.mxu1 %v6811_v40  ;;  %v4227_v39 = vld [vmem:[#allocation16 + $0x240] sm:$0xff] }
0x11aa   : > { %5011 = vmatprep.subr.bf16.mxu0 %v6813_v15  ;;  %v4231_v40 = vld [vmem:[#allocation16 + $0x260] sm:$0xff]  ;;  %v4228_v15 = vld [vmem:[#allocation16 + $0x248] sm:$0xff] }
0x11ab   : > { %v6867_v46 = vcombine.high %v4227_v39, %v4231_v40  ;;  %v6866_v49 = vcombine.low %v4227_v39, %v4231_v40  ;;  %v6868_v50 = vcombine.low %v4228_v15, %v4232_v43  ;;  %v4280_v39 = vld [vmem:[#allocation16 + $0x3e8] sm:$0xff] }
0x11ac   : > { %4971 = vmatpush1.bf16.msra.mxu1 %v6810_v47  ;;  %v6869_v47 = vcombine.high %v4228_v15, %v4232_v43 }
0x11ad   : > { %5012 = vmatpush1.bf16.msra.mxu0 %v6812_v48  ;;  %4972 = vmatprep.subr.bf16.mxu1 %v6819_v16  ;;  %v4235_v48 = vld [vmem:[#allocation16 + $0x280] sm:$0xff] }
0x11ae   : > { %5013 = vmatprep.subr.bf16.mxu0 %v6821_v10  ;;  %v4239_v16 = vld [vmem:[#allocation16 + $0x2a0] sm:$0xff]  ;;  %v4236_v10 = vld [vmem:[#allocation16 + $0x288] sm:$0xff] }
0x11af   : > { %v6875_v54 = vcombine.high %v4235_v48, %v4239_v16  ;;  %v6874_v13 = vcombine.low %v4235_v48, %v4239_v16  ;;  %v6876_v8 = vcombine.low %v4236_v10, %v4240_v58  ;;  %v4162_v48 = vld [vmem:[#allocation16 + $0x38] sm:$0xff] }
0x11b0   : > { %4973 = vmatpush1.bf16.msra.mxu1 %v6818_v1  ;;  %v6877_v1 = vcombine.high %v4236_v10, %v4240_v58 }
0x11b1   : > { %5014 = vmatpush1.bf16.msra.mxu0 %v6820_v56  ;;  %4974 = vmatprep.subr.bf16.mxu1 %v6827_v4  ;;  %v4243_v56 = vld [vmem:[#allocation16 + $0x2c0] sm:$0xff] }
0x11b2   : > { %5015 = vmatprep.subr.bf16.mxu0 %v6829_v41  ;;  %v4247_v4 = vld [vmem:[#allocation16 + $0x2e0] sm:$0xff]  ;;  %v4244_v41 = vld [vmem:[#allocation16 + $0x2c8] sm:$0xff] }
0x11b3   : > { %v6883_v9 = vcombine.high %v4243_v56, %v4247_v4  ;;  %v6882_v63 = vcombine.low %v4243_v56, %v4247_v4  ;;  %v6884_v19 = vcombine.low %v4244_v41, %v4248_v42  ;;  %v4166_v56 = vld [vmem:[#allocation16 + $0x58] sm:$0xff] }
0x11b4   : > { %4975 = vmatpush1.bf16.msra.mxu1 %v6826_v11  ;;  %v6885_v11 = vcombine.high %v4244_v41, %v4248_v42  ;;  %v4170_v4 = vld [vmem:[#allocation16 + $0x78] sm:$0xff] }
0x11b5   : > { %5016 = vmatpush1.bf16.msra.mxu0 %v6828_v62  ;;  %4976 = vmatprep.subr.bf16.mxu1 %v6835_v12  ;;  %v4251_v62 = vld [vmem:[#allocation16 + $0x300] sm:$0xff] }
0x11b6   : > { %5017 = vmatprep.subr.bf16.mxu0 %v6837_v14  ;;  %v4255_v12 = vld [vmem:[#allocation16 + $0x320] sm:$0xff]  ;;  %v4252_v14 = vld [vmem:[#allocation16 + $0x308] sm:$0xff] }
0x11b7   : > { %v6891_v20 = vcombine.high %v4251_v62, %v4255_v12  ;;  %v6890_v25 = vcombine.low %v4251_v62, %v4255_v12  ;;  %v6892_v7 = vcombine.low %v4252_v14, %v4256_v17  ;;  %v4178_v62 = vld [vmem:[#allocation16 + $0xb8] sm:$0xff] }
0x11b8   : > { %4977 = vmatpush1.bf16.msra.mxu1 %v6834_v18  ;;  %v6893_v18 = vcombine.high %v4252_v14, %v4256_v17  ;;  %v6808_v14 = vcombine.low %v4166_v56, %v4170_v4 }
0x11b9   : > { %5018 = vmatpush1.bf16.msra.mxu0 %v6836_v35  ;;  %4978 = vmatprep.subr.bf16.mxu1 %v6843_v22  ;;  %v4259_v35 = vld [vmem:[#allocation16 + $0x340] sm:$0xff] }
0x11ba   : > { %5019 = vmatprep.subr.bf16.mxu0 %v6845_v23  ;;  %v4263_v22 = vld [vmem:[#allocation16 + $0x360] sm:$0xff]  ;;  %v4260_v23 = vld [vmem:[#allocation16 + $0x348] sm:$0xff] }
0x11bb   : > { %v6899_v26 = vcombine.high %v4259_v35, %v4263_v22  ;;  %v6898_v33 = vcombine.low %v4259_v35, %v4263_v22  ;;  %v6900_v34 = vcombine.low %v4260_v23, %v4264_v24  ;;  %v4186_v35 = vld [vmem:[#allocation16 + $0xf8] sm:$0xff] }
0x11bc   : > { %4979 = vmatpush1.bf16.msra.mxu1 %v6842_v27  ;;  %v6901_v27 = vcombine.high %v4260_v23, %v4264_v24 }
0x11bd   : > { %5020 = vmatpush1.bf16.msra.mxu0 %v6844_v28  ;;  %4980 = vmatprep.subr.bf16.mxu1 %v6851_v29  ;;  %v4267_v28 = vld [vmem:[#allocation16 + $0x380] sm:$0xff] }
0x11be   : > { %5021 = vmatprep.subr.bf16.mxu0 %v6853_v30  ;;  %v4271_v29 = vld [vmem:[#allocation16 + $0x3a0] sm:$0xff]  ;;  %v4268_v30 = vld [vmem:[#allocation16 + $0x388] sm:$0xff] }
0x11bf   : > { %v6907_v36 = vcombine.high %v4267_v28, %v4271_v29  ;;  %v6906_v40 = vcombine.low %v4267_v28, %v4271_v29  ;;  %v6908_v15 = vcombine.low %v4268_v30, %v4272_v31  ;;  %v4194_v28 = vld [vmem:[#allocation16 + $0x138] sm:$0xff] }
0x11c0   : > { %4981 = vmatpush1.bf16.msra.mxu1 %v6850_v6  ;;  %v6909_v6 = vcombine.high %v4268_v30, %v4272_v31 }
0x11c1   : > { %5022 = vmatpush1.bf16.msra.mxu0 %v6852_v37  ;;  %4982 = vmatprep.subr.bf16.mxu1 %v6859_v2  ;;  %v4275_v37 = vld [vmem:[#allocation16 + $0x3c0] sm:$0xff] }
0x11c2   : > { %5023 = vmatprep.subr.bf16.mxu0 %v6861_v38  ;;  %v4279_v2 = vld [vmem:[#allocation16 + $0x3e0] sm:$0xff]  ;;  %v4276_v38 = vld [vmem:[#allocation16 + $0x3c8] sm:$0xff] }
0x11c3   : > { %v6915_v43 = vcombine.high %v4275_v37, %v4279_v2  ;;  %v6914_v16 = vcombine.low %v4275_v37, %v4279_v2  ;;  %v6916_v10 = vcombine.low %v4276_v38, %v4280_v39 }
0x11c4   : > { %4983 = vmatpush1.bf16.msra.mxu1 %v6858_v44  ;;  %v6917_v44 = vcombine.high %v4276_v38, %v4280_v39 }
0x11c5   : > { %5024 = vmatpush1.bf16.msra.mxu0 %v6860_v45  ;;  %4984 = vmatprep.subr.bf16.mxu1 %v6867_v46  ;;  %v4157_v45 = vld [vmem:[#allocation16 + $0x10] sm:$0xff] }
0x11c6   : > { %5025 = vmatprep.subr.bf16.mxu0 %v6869_v47  ;;  %v4161_v46 = vld [vmem:[#allocation16 + $0x30] sm:$0xff]  ;;  %v4158_v47 = vld [vmem:[#allocation16 + $0x18] sm:$0xff] }
0x11c7   : > { %v6799_v58 = vcombine.high %v4157_v45, %v4161_v46  ;;  %v6800_v41 = vcombine.low %v4158_v47, %v4162_v48 }
0x11c8   : > { %4985 = vmatpush1.bf16.msra.mxu1 %v6866_v49  ;;  %v6801_v49 = vcombine.high %v4158_v47, %v4162_v48 }
0x11c9   : > { %5026 = vmatpush1.bf16.msra.mxu0 %v6868_v50  ;;  %4986 = vmatprep.subr.bf16.mxu1 %v6875_v54  ;;  %v4165_v50 = vld [vmem:[#allocation16 + $0x50] sm:$0xff] }
0x11ca   : > { %5027 = vmatprep.subr.bf16.mxu0 %v6877_v1  ;;  %v4169_v54 = vld [vmem:[#allocation16 + $0x70] sm:$0xff]  ;;  %v6798_v1 = vcombine.low %v4157_v45, %v4161_v46 }
0x11cb   : > { %v6807_v42 = vcombine.high %v4165_v50, %v4169_v54  ;;  %v6806_v12 = vcombine.low %v4165_v50, %v4169_v54 }
0x11cc   : > { %4987 = vmatpush1.bf16.msra.mxu1 %v6874_v13  ;;  %v4173_v13 = vld [vmem:[#allocation16 + $0x90] sm:$0xff] }
0x11cd   : > { %5028 = vmatpush1.bf16.msra.mxu0 %v6876_v8  ;;  %4988 = vmatprep.subr.bf16.mxu1 %v6883_v9  ;;  %v4177_v8 = vld [vmem:[#allocation16 + $0xb0] sm:$0xff]  ;;  %v6809_v9 = vcombine.high %v4166_v56, %v4170_v4 }
0x11ce   : > { %5029 = vmatprep.subr.bf16.mxu0 %v6885_v11  ;;  %v4174_v11 = vld [vmem:[#allocation16 + $0x98] sm:$0xff]  ;;  %v6815_v17 = vcombine.high %v4173_v13, %v4177_v8  ;;  %v6814_v22 = vcombine.low %v4173_v13, %v4177_v8  ;;  %v4221_v4 = vld [vmem:[#allocation16 + $0x210] sm:$0xff] }
0x11cf   : > { %v6816_v23 = vcombine.low %v4174_v11, %v4178_v62  ;;  %v4226_v13 = vld [vmem:[#allocation16 + $0x238] sm:$0xff] }
0x11d0   : > { %4989 = vmatpush1.bf16.msra.mxu1 %v6882_v63  ;;  %v6817_v63 = vcombine.high %v4174_v11, %v4178_v62 }
0x11d1   : > { %5030 = vmatpush1.bf16.msra.mxu0 %v6884_v19  ;;  %4990 = vmatprep.subr.bf16.mxu1 %v6891_v20  ;;  %v4181_v19 = vld [vmem:[#allocation16 + $0xd0] sm:$0xff] }
0x11d2   : > { %5031 = vmatprep.subr.bf16.mxu0 %v6893_v18  ;;  %v4185_v20 = vld [vmem:[#allocation16 + $0xf0] sm:$0xff]  ;;  %v4182_v18 = vld [vmem:[#allocation16 + $0xd8] sm:$0xff] }
0x11d3   : > { %v6823_v24 = vcombine.high %v4181_v19, %v4185_v20  ;;  %v6824_v29 = vcombine.low %v4182_v18, %v4186_v35 }
0x11d4   : > { %4991 = vmatpush1.bf16.msra.mxu1 %v6890_v25  ;;  %v6825_v25 = vcombine.high %v4182_v18, %v4186_v35 }
0x11d5   : > { %5032 = vmatpush1.bf16.msra.mxu0 %v6892_v7  ;;  %4992 = vmatprep.subr.bf16.mxu1 %v6899_v26  ;;  %v4189_v7 = vld [vmem:[#allocation16 + $0x110] sm:$0xff] }
0x11d6   : > { %5033 = vmatprep.subr.bf16.mxu0 %v6901_v27  ;;  %v4193_v26 = vld [vmem:[#allocation16 + $0x130] sm:$0xff]  ;;  %v4190_v27 = vld [vmem:[#allocation16 + $0x118] sm:$0xff] }
0x11d7   : > { %v6831_v30 = vcombine.high %v4189_v7, %v4193_v26  ;;  %v6833_v31 = vcombine.high %v4190_v27, %v4194_v28  ;;  %v6830_v37 = vcombine.low %v4189_v7, %v4193_v26  ;;  %v6832_v2 = vcombine.low %v4190_v27, %v4194_v28 }
0x11d8   : > { %4993 = vmatpush1.bf16.msra.mxu1 %v6898_v33  ;;  %v4197_v33 = vld [vmem:[#allocation16 + $0x150] sm:$0xff] }
0x11d9   : > { %5034 = vmatpush1.bf16.msra.mxu0 %v6900_v34  ;;  %4994 = vmatprep.subr.bf16.mxu1 %v6907_v36  ;;  %v4201_v34 = vld [vmem:[#allocation16 + $0x170] sm:$0xff]  ;;  %v4198_v36 = vld [vmem:[#allocation16 + $0x158] sm:$0xff] }
0x11da   : > { %5035 = vmatprep.subr.bf16.mxu0 %v6909_v6  ;;  %v4202_v6 = vld [vmem:[#allocation16 + $0x178] sm:$0xff]  ;;  %v6839_v38 = vcombine.high %v4197_v33, %v4201_v34  ;;  %v6838_v45 = vcombine.low %v4197_v33, %v4201_v34 }
0x11db   : > { %v6841_v39 = vcombine.high %v4198_v36, %v4202_v6  ;;  %v6840_v46 = vcombine.low %v4198_v36, %v4202_v6 }
0x11dc   : > { %4995 = vmatpush1.bf16.msra.mxu1 %v6906_v40  ;;  %v4205_v40 = vld [vmem:[#allocation16 + $0x190] sm:$0xff] }
0x11dd   : > { %5036 = vmatpush1.bf16.msra.mxu0 %v6908_v15  ;;  %4996 = vmatprep.subr.bf16.mxu1 %v6915_v43  ;;  %v4209_v15 = vld [vmem:[#allocation16 + $0x1b0] sm:$0xff]  ;;  %v4206_v43 = vld [vmem:[#allocation16 + $0x198] sm:$0xff] }
0x11de   : > { %5037 = vmatprep.subr.bf16.mxu0 %v6917_v44  ;;  %v4210_v44 = vld [vmem:[#allocation16 + $0x1b8] sm:$0xff]  ;;  %v6847_v47 = vcombine.high %v4205_v40, %v4209_v15  ;;  %v6846_v50 = vcombine.low %v4205_v40, %v4209_v15 }
0x11df   : > { %v6849_v48 = vcombine.high %v4206_v43, %v4210_v44  ;;  %v6848_v54 = vcombine.low %v4206_v43, %v4210_v44 }
0x11e0   : > { %4997 = vmatpush1.bf16.msra.mxu1 %v6914_v16  ;;  %v4213_v16 = vld [vmem:[#allocation16 + $0x1d0] sm:$0xff] }
0x11e1   : > { %5038 = vmatpush1.bf16.msra.mxu0 %v6916_v10  ;;  %5048 = vmatprep.subr.bf16.mxu1 %v6799_v58  ;;  %v4217_v10 = vld [vmem:[#allocation16 + $0x1f0] sm:$0xff]  ;;  %v4214_v58 = vld [vmem:[#allocation16 + $0x1d8] sm:$0xff] }
0x11e2   : > { %5089 = vmatprep.subr.bf16.mxu0 %v6801_v49  ;;  %v4218_v49 = vld [vmem:[#allocation16 + $0x1f8] sm:$0xff]  ;;  %v6854_v8 = vcombine.low %v4213_v16, %v4217_v10 }
0x11e3   : > { %4999 = vmatmul.mubr.bf16.vlgmr.msra.gmra.mrb[32].mxu1 %v8964_v5  ;;  %v6857_v56 = vcombine.high %v4214_v58, %v4218_v49 }
0x11e4   : > { %5040 = vmatmul.mubr.bf16.vlgmr.msra.gmra.mrb[48].mxu0 %v8964_v5  ;;  %5049 = vmatpush1.bf16.msra.mxu1 %v6798_v1  ;;  %v6855_v1 = vcombine.high %v4213_v16, %v4217_v10 }
0x11e5   : > { %5080 = vmatprep.mubr.bf16.mxu1 %v8968_v3  ;;  %5090 = vmatpush1.bf16.msra.mxu0 %v6800_v41  ;;  %v4225_v41 = vld [vmem:[#allocation16 + $0x230] sm:$0xff] }
0x11e6   : > { %5121 = vmatprep.mubr.bf16.mxu0 %v8968_v3  ;;  %5050 = vmatprep.subr.bf16.mxu1 %v6807_v42  ;;  %v6822_v3 = vcombine.low %v4181_v19, %v4185_v20  ;;  %v4222_v42 = vld [vmem:[#allocation16 + $0x218] sm:$0xff]  ;;  %v6863_v11 = vcombine.high %v4221_v4, %v4225_v41  ;;  %v6862_v19 = vcombine.low %v4221_v4, %v4225_v41 }
0x11e7   : > { %5091 = vmatprep.subr.bf16.mxu0 %v6809_v9  ;;  %v6856_v9 = vcombine.low %v4214_v58, %v4218_v49  ;;  %v6865_v62 = vcombine.high %v4222_v42, %v4226_v13  ;;  %v6864_v20 = vcombine.low %v4222_v42, %v4226_v13 }
0x11e8   : > { %5051 = vmatpush1.bf16.msra.mxu1 %v6806_v12  ;;  %v4229_v12 = vld [vmem:[#allocation16 + $0x250] sm:$0xff] }
0x11e9   : > { %5092 = vmatpush1.bf16.msra.mxu0 %v6808_v14  ;;  %5052 = vmatprep.subr.bf16.mxu1 %v6815_v17  ;;  %v4233_v14 = vld [vmem:[#allocation16 + $0x270] sm:$0xff]  ;;  %v4230_v17 = vld [vmem:[#allocation16 + $0x258] sm:$0xff] }
0x11ea   : > { %5093 = vmatprep.subr.bf16.mxu0 %v6817_v63  ;;  %v4234_v63 = vld [vmem:[#allocation16 + $0x278] sm:$0xff]  ;;  %v6871_v18 = vcombine.high %v4229_v12, %v4233_v14  ;;  %v6870_v7 = vcombine.low %v4229_v12, %v4233_v14 }
0x11eb   : > { %v6873_v35 = vcombine.high %v4230_v17, %v4234_v63  ;;  %v6872_v26 = vcombine.low %v4230_v17, %v4234_v63 }
0x11ec   : > { %5053 = vmatpush1.bf16.msra.mxu1 %v6814_v22  ;;  %v4237_v22 = vld [vmem:[#allocation16 + $0x290] sm:$0xff] }
0x11ed   : > { %5094 = vmatpush1.bf16.msra.mxu0 %v6816_v23  ;;  %5054 = vmatprep.subr.bf16.mxu1 %v6823_v24  ;;  %v4241_v23 = vld [vmem:[#allocation16 + $0x2b0] sm:$0xff]  ;;  %v4238_v24 = vld [vmem:[#allocation16 + $0x298] sm:$0xff] }
0x11ee   : > { %5095 = vmatprep.subr.bf16.mxu0 %v6825_v25  ;;  %v4242_v25 = vld [vmem:[#allocation16 + $0x2b8] sm:$0xff]  ;;  %v6879_v27 = vcombine.high %v4237_v22, %v4241_v23  ;;  %v6878_v33 = vcombine.low %v4237_v22, %v4241_v23 }
0x11ef   : > { %v6881_v28 = vcombine.high %v4238_v24, %v4242_v25  ;;  %v6880_v34 = vcombine.low %v4238_v24, %v4242_v25  ;;  %v7674_v22 = vld [vmem:[#allocation17 + $0x14] ss:$8 sps:$4 sm:$0xff]   ;;  %v7672_v23 = vld [vmem:[#allocation17 + $0x10] ss:$8 sps:$4 sm:$0xff]   ;;  %v7677_v24 = vld [vmem:[#allocation17 + $0x24] ss:$8 sps:$4 sm:$0xff]  }
0x11f0   : > { %5055 = vmatpush1.bf16.msra.mxu1 %v6822_v3  ;;  %v4245_v3 = vld [vmem:[#allocation16 + $0x2d0] sm:$0xff]  ;;  %v7675_v25 = vld [vmem:[#allocation17 + $0x20] ss:$8 sps:$4 sm:$0xff]  }
0x11f1   : > { %5096 = vmatpush1.bf16.msra.mxu0 %v6824_v29  ;;  %5056 = vmatprep.subr.bf16.mxu1 %v6831_v30  ;;  %v4249_v29 = vld [vmem:[#allocation16 + $0x2f0] sm:$0xff]  ;;  %v4246_v30 = vld [vmem:[#allocation16 + $0x2d8] sm:$0xff] }
0x11f2   : > { %5097 = vmatprep.subr.bf16.mxu0 %v6833_v31  ;;  %v4250_v31 = vld [vmem:[#allocation16 + $0x2f8] sm:$0xff]  ;;  %v6887_v36 = vcombine.high %v4245_v3, %v4249_v29  ;;  %v6886_v40 = vcombine.low %v4245_v3, %v4249_v29 }
0x11f3   : > { %v6889_v6 = vcombine.high %v4246_v30, %v4250_v31  ;;  %v6888_v15 = vcombine.low %v4246_v30, %v4250_v31  ;;  %v7686_v3 = vld [vmem:[#allocation17 + $0x54] ss:$8 sps:$4 sm:$0xff]   ;;  %v7684_v29 = vld [vmem:[#allocation17 + $0x50] ss:$8 sps:$4 sm:$0xff]  }
0x11f4   : > { %5057 = vmatpush1.bf16.msra.mxu1 %v6830_v37  ;;  %v4253_v37 = vld [vmem:[#allocation16 + $0x310] sm:$0xff] }
0x11f5   : > { %5098 = vmatpush1.bf16.msra.mxu0 %v6832_v2  ;;  %5058 = vmatprep.subr.bf16.mxu1 %v6839_v38  ;;  %v4257_v2 = vld [vmem:[#allocation16 + $0x330] sm:$0xff]  ;;  %v4254_v38 = vld [vmem:[#allocation16 + $0x318] sm:$0xff] }
0x11f6   : > { %5099 = vmatprep.subr.bf16.mxu0 %v6841_v39  ;;  %v4258_v39 = vld [vmem:[#allocation16 + $0x338] sm:$0xff]  ;;  %v6895_v43 = vcombine.high %v4253_v37, %v4257_v2  ;;  %v6894_v16 = vcombine.low %v4253_v37, %v4257_v2  ;;  %v7687_v37 = vld [vmem:[#allocation17 + $0x60] ss:$8 sps:$4 sm:$0xff]  }
0x11f7   : > { %v6897_v44 = vcombine.high %v4254_v38, %v4258_v39  ;;  %v6896_v10 = vcombine.low %v4254_v38, %v4258_v39  ;;  %v7692_v39 = vld [vmem:[#allocation17 + $0x74] ss:$8 sps:$4 sm:$0xff]  }
0x11f8   : > { %5059 = vmatpush1.bf16.msra.mxu1 %v6838_v45  ;;  %v4261_v45 = vld [vmem:[#allocation16 + $0x350] sm:$0xff] }
0x11f9   : > { %5100 = vmatpush1.bf16.msra.mxu0 %v6840_v46  ;;  %5060 = vmatprep.subr.bf16.mxu1 %v6847_v47  ;;  %v4265_v46 = vld [vmem:[#allocation16 + $0x370] sm:$0xff]  ;;  %v4262_v47 = vld [vmem:[#allocation16 + $0x358] sm:$0xff] }
0x11fa   : > { %5101 = vmatprep.subr.bf16.mxu0 %v6849_v48  ;;  %v4266_v48 = vld [vmem:[#allocation16 + $0x378] sm:$0xff]  ;;  %v6903_v58 = vcombine.high %v4261_v45, %v4265_v46  ;;  %v6902_v4 = vcombine.low %v4261_v45, %v4265_v46  ;;  %v7701_v46 = vld [vmem:[#allocation17 + $0xa4] ss:$8 sps:$4 sm:$0xff]  }
0x11fb   : > { %v6905_v49 = vcombine.high %v4262_v47, %v4266_v48  ;;  %v6904_v41 = vcombine.low %v4262_v47, %v4266_v48  ;;  %v7696_v45 = vld [vmem:[#allocation17 + $0x90] ss:$8 sps:$4 sm:$0xff]   ;;  %v7699_v47 = vld [vmem:[#allocation17 + $0xa0] ss:$8 sps:$4 sm:$0xff]   ;;  %v7704_v48 = vld [vmem:[#allocation17 + $0xb4] ss:$8 sps:$4 sm:$0xff]  }
0x11fc   : > { %5061 = vmatpush1.bf16.msra.mxu1 %v6846_v50  ;;  %v4269_v50 = vld [vmem:[#allocation16 + $0x390] sm:$0xff] }
0x11fd   : > { %5102 = vmatpush1.bf16.msra.mxu0 %v6848_v54  ;;  %5062 = vmatprep.subr.bf16.mxu1 %v6855_v1  ;;  %v4273_v54 = vld [vmem:[#allocation16 + $0x3b0] sm:$0xff]  ;;  %v4270_v1 = vld [vmem:[#allocation16 + $0x398] sm:$0xff] }
0x11fe   : > { %5103 = vmatprep.subr.bf16.mxu0 %v6857_v56  ;;  %v4274_v56 = vld [vmem:[#allocation16 + $0x3b8] sm:$0xff]  ;;  %v6911_v42 = vcombine.high %v4269_v50, %v4273_v54  ;;  %v6910_v12 = vcombine.low %v4269_v50, %v4273_v54  ;;  %v7713_v54 = vld [vmem:[#allocation17 + $0xe4] ss:$8 sps:$4 sm:$0xff]  }
0x11ff   : > { %v6913_v13 = vcombine.high %v4270_v1, %v4274_v56  ;;  %v6912_v14 = vcombine.low %v4270_v1, %v4274_v56  ;;  %v7708_v50 = vld [vmem:[#allocation17 + $0xd0] ss:$8 sps:$4 sm:$0xff]   ;;  %v7711_v1 = vld [vmem:[#allocation17 + $0xe0] ss:$8 sps:$4 sm:$0xff]   ;;  %v7716_v56 = vld [vmem:[#allocation17 + $0xf4] ss:$8 sps:$4 sm:$0xff]  }
0x1200   : > { %5063 = vmatpush1.bf16.msra.mxu1 %v6854_v8  ;;  %v4277_v8 = vld [vmem:[#allocation16 + $0x3d0] sm:$0xff] }
0x1201   : > { %5104 = vmatpush1.bf16.msra.mxu0 %v6856_v9  ;;  %5064 = vmatprep.subr.bf16.mxu1 %v6863_v11  ;;  %v4281_v9 = vld [vmem:[#allocation16 + $0x3f0] sm:$0xff]  ;;  %v4278_v11 = vld [vmem:[#allocation16 + $0x3d8] sm:$0xff] }
0x1202   : > { %5105 = vmatprep.subr.bf16.mxu0 %v6865_v62  ;;  %v4282_v62 = vld [vmem:[#allocation16 + $0x3f8] sm:$0xff]  ;;  %v6919_v17 = vcombine.high %v4277_v8, %v4281_v9 }
0x1203   : > { %v6921_v63 = vcombine.high %v4278_v11, %v4282_v62 }
0x1204   : > { %5065 = vmatpush1.bf16.msra.mxu1 %v6862_v19  ;;  %v6918_v19 = vcombine.low %v4277_v8, %v4281_v9 }
0x1205   : > { %5106 = vmatpush1.bf16.msra.mxu0 %v6864_v20  ;;  %5066 = vmatprep.subr.bf16.mxu1 %v6871_v18  ;;  %v6920_v20 = vcombine.low %v4278_v11, %v4282_v62  ;;  %v7671_v18 = vld [vmem:[#allocation17 + $0x4] ss:$8 sps:$4 sm:$0xff]  }
0x1206   : > { %5107 = vmatprep.subr.bf16.mxu0 %v6873_v35  ;;  %v7669_v35 = vld [vmem:[#allocation17] ss:$8 sps:$4 sm:$0xff]  }
0x1208   : > { %5067 = vmatpush1.bf16.msra.mxu1 %v6870_v7  ;;  %v7680_v7 = vld [vmem:[#allocation17 + $0x34] ss:$8 sps:$4 sm:$0xff]  }
0x1209   : > { %5108 = vmatpush1.bf16.msra.mxu0 %v6872_v26  ;;  %5068 = vmatprep.subr.bf16.mxu1 %v6879_v27  ;;  %v7678_v26 = vld [vmem:[#allocation17 + $0x30] ss:$8 sps:$4 sm:$0xff]   ;;  %v7683_v27 = vld [vmem:[#allocation17 + $0x44] ss:$8 sps:$4 sm:$0xff]  }
0x120a   : > { %5109 = vmatprep.subr.bf16.mxu0 %v6881_v28  ;;  %v7681_v28 = vld [vmem:[#allocation17 + $0x40] ss:$8 sps:$4 sm:$0xff]  }
0x120c   : > { %5069 = vmatpush1.bf16.msra.mxu1 %v6878_v33 }
0x120d   : > { %5110 = vmatpush1.bf16.msra.mxu0 %v6880_v34  ;;  %5070 = vmatprep.subr.bf16.mxu1 %v6887_v36 }
0x120e   : > { %5111 = vmatprep.subr.bf16.mxu0 %v6889_v6 }
0x1210   : > { %5071 = vmatpush1.bf16.msra.mxu1 %v6886_v40  ;;  %v7690_v40 = vld [vmem:[#allocation17 + $0x70] ss:$8 sps:$4 sm:$0xff]  }
0x1211   : > { %5112 = vmatpush1.bf16.msra.mxu0 %v6888_v15  ;;  %5072 = vmatprep.subr.bf16.mxu1 %v6895_v43  ;;  %v7695_v15 = vld [vmem:[#allocation17 + $0x84] ss:$8 sps:$4 sm:$0xff]   ;;  %v7693_v43 = vld [vmem:[#allocation17 + $0x80] ss:$8 sps:$4 sm:$0xff]  }
0x1212   : > { %5113 = vmatprep.subr.bf16.mxu0 %v6897_v44  ;;  %v7698_v44 = vld [vmem:[#allocation17 + $0x94] ss:$8 sps:$4 sm:$0xff]  }
0x1214   : > { %5073 = vmatpush1.bf16.msra.mxu1 %v6894_v16  ;;  %v7702_v16 = vld [vmem:[#allocation17 + $0xb0] ss:$8 sps:$4 sm:$0xff]  }
0x1215   : > { %5114 = vmatpush1.bf16.msra.mxu0 %v6896_v10  ;;  %5074 = vmatprep.subr.bf16.mxu1 %v6903_v58  ;;  %v7707_v10 = vld [vmem:[#allocation17 + $0xc4] ss:$8 sps:$4 sm:$0xff]   ;;  %v7705_v58 = vld [vmem:[#allocation17 + $0xc0] ss:$8 sps:$4 sm:$0xff]  }
0x1216   : > { %5115 = vmatprep.subr.bf16.mxu0 %v6905_v49  ;;  %v7710_v49 = vld [vmem:[#allocation17 + $0xd4] ss:$8 sps:$4 sm:$0xff]  }
0x1218   : > { %5075 = vmatpush1.bf16.msra.mxu1 %v6902_v4  ;;  %v7714_v4 = vld [vmem:[#allocation17 + $0xf0] ss:$8 sps:$4 sm:$0xff]  }
0x1219   : > { %5116 = vmatpush1.bf16.msra.mxu0 %v6904_v41  ;;  %5076 = vmatprep.subr.bf16.mxu1 %v6911_v42  ;;  %v7719_v41 = vld [vmem:[#allocation17 + $0x104] ss:$8 sps:$4 sm:$0xff]  }
0x121a   : > { %5117 = vmatprep.subr.bf16.mxu0 %v6913_v13 }
0x121c   : > { %5077 = vmatpush1.bf16.msra.mxu1 %v6910_v12 }
0x121d   : > { %5118 = vmatpush1.bf16.msra.mxu0 %v6912_v14  ;;  %5078 = vmatprep.subr.bf16.mxu1 %v6919_v17  ;;  %v9005_v17 = vld [vmem:[%s9237_s20 + $0x1] ss:$2 sm:$0xff] }
0x121e   : > { %5119 = vmatprep.subr.bf16.mxu0 %v6921_v63  ;;  %v4289_v63 = vrot.slane %v9005_v17, %v8770_v57 }
0x1220   : > { %5079 = vmatpush1.bf16.msra.mxu1 %v6918_v19  ;;  %v4297_v19 = vrot.slane %v9005_v17, %v8802_v21 }
0x1221   : > { %5120 = vmatpush1.bf16.msra.mxu0 %v6920_v20  ;;  %5999 = vmatprep.subr.bf16.mxu1 %v7671_v18  ;;  %v4293_v20 = vrot.slane %v9005_v17, %v8764_v55  ;;  %v4301_v18 = vrot.slane %v9005_v17, %v8818_v59 }
0x1223   : > { %5081 = vmatmul.mubr.bf16.vlgmr.msra.gmra.mrb[36].mxu1 %v8964_v5 }
0x1224   : > { %5122 = vmatmul.mubr.bf16.vlgmr.msra.gmra.mrb[52].mxu0 %v8964_v5  ;;  %6000 = vmatpush1.bf16.msra.mxu1 %v7669_v35  ;;  %v7689_v5 = vld [vmem:[#allocation17 + $0x64] ss:$8 sps:$4 sm:$0xff]  }
0x1225   : > { %6001 = vmatprep.subr.bf16.mxu1 %v7674_v22 }
0x1228   : > { %6002 = vmatpush1.bf16.msra.mxu1 %v7672_v23 }
0x1229   : > { %6003 = vmatprep.subr.bf16.mxu1 %v7677_v24 }
0x122c   : > { %6004 = vmatpush1.bf16.msra.mxu1 %v7675_v25 }
0x122d   : > { %6005 = vmatprep.subr.bf16.mxu1 %v7680_v7 }
0x1230   : > { %6006 = vmatpush1.bf16.msra.mxu1 %v7678_v26 }
0x1231   : > { %6007 = vmatprep.subr.bf16.mxu1 %v7683_v27 }
0x1234   : > { %6008 = vmatpush1.bf16.msra.mxu1 %v7681_v28 }
0x1235   : > { %6009 = vmatprep.subr.bf16.mxu1 %v7686_v3 }
0x1236   : > { %v8986_v30 = vpop.f32.mrb[24].mxu1  ;;  %v8988_v31 = vpop.f32.mrb[40].mxu0 }
0x1237   : > { %v8990_v33 = vpop.f32.mrb[25].mxu1  ;;  %v8992_v34 = vpop.f32.mrb[41].mxu0 }
0x1238   : > { %v4029_v36 = vpop.f32.mrb[26].mxu1  ;;  %v4070_v6 = vpop.f32.mrb[42].mxu0  ;;  %6010 = vmatpush1.bf16.msra.mxu1 %v7684_v29 }
0x1239   : > { %v4030_v2 = vpop.f32.mrb[27].mxu1  ;;  %v4071_v38 = vpop.f32.mrb[43].mxu0  ;;  %6011 = vmatprep.subr.bf16.mxu1 %v7689_v5 }
0x123c   : > { %6012 = vmatpush1.bf16.msra.mxu1 %v7687_v37 }
0x123d   : > { %6013 = vmatprep.subr.bf16.mxu1 %v7692_v39 }
0x1240   : > { %6014 = vmatpush1.bf16.msra.mxu1 %v7690_v40 }
0x1241   : > { %6015 = vmatprep.subr.bf16.mxu1 %v7695_v15 }
0x1244   : > { %6016 = vmatpush1.bf16.msra.mxu1 %v7693_v43 }
0x1245   : > { %6017 = vmatprep.subr.bf16.mxu1 %v7698_v44 }
0x1248   : > { %6018 = vmatpush1.bf16.msra.mxu1 %v7696_v45 }
0x1249   : > { %6019 = vmatprep.subr.bf16.mxu1 %v7701_v46 }
0x124c   : > { %6020 = vmatpush1.bf16.msra.mxu1 %v7699_v47 }
0x124d   : > { %6021 = vmatprep.subr.bf16.mxu1 %v7704_v48 }
0x1250   : > { %6022 = vmatpush1.bf16.msra.mxu1 %v7702_v16 }
0x1251   : > { %6023 = vmatprep.subr.bf16.mxu1 %v7707_v10 }
0x1254   : > { %6024 = vmatpush1.bf16.msra.mxu1 %v7705_v58 }
0x1255   : > { %6025 = vmatprep.subr.bf16.mxu1 %v7710_v49 }
0x1258   : > { %6026 = vmatpush1.bf16.msra.mxu1 %v7708_v50 }
0x1259   : > { %6027 = vmatprep.subr.bf16.mxu1 %v7713_v54 }
0x125c   : > { %6028 = vmatpush1.bf16.msra.mxu1 %v7711_v1  ;;  %v9018_v1 = vld [vmem:[%s9237_s20] ss:$2 sm:$0xff] }
0x125d   : > { %6029 = vmatprep.subr.bf16.mxu1 %v7716_v56  ;;  %v3314_v56 = vrot.slane %v9018_v1, %v8770_v57 }
0x1260   : > { %6030 = vmatpush1.bf16.msra.mxu1 %v7714_v4 }
0x1261   : > { %6040 = vmatprep.subr.bf16.mxu1 %v7719_v41  ;;  %v3322_v41 = vrot.slane %v9018_v1, %v8802_v21 }
0x1263   : > { %v4067_v21 = vadd.f32 %v8988_v31, %v3322_v41  ;;  %v4309_v41 = vrot.slane %v9005_v17, %v8822_v61 }
0x1276   : > { %v8994_v42 = vpop.f32.mrb[28].mxu1  ;;  %v8996_v13 = vpop.f32.mrb[44].mxu0 }
0x1277   : > { %v8998_v8 = vpop.f32.mrb[29].mxu1  ;;  %v9000_v9 = vpop.f32.mrb[45].mxu0 }
0x1278   : > { %v4111_v11 = vpop.f32.mrb[30].mxu1  ;;  %v4152_v62 = vpop.f32.mrb[46].mxu0 }
0x1279   : > { %v4112_v12 = vpop.f32.mrb[31].mxu1  ;;  %v4153_v14 = vpop.f32.mrb[47].mxu0  ;;  %v3318_v62 = vrot.slane %v9018_v1, %v8764_v55 }
0x12b6   : > { %v5000_v35 = vpop.f32.mrb[32].mxu1 }
0x12b7   : > { %v5001_v22 = vadd.f32 %v5000_v35, %v4289_v63  ;;  %v5041_v23 = vpop.f32.mrb[48].mxu0  ;;  %v5002_v24 = vpop.f32.mrb[33].mxu1 }
0x12b8   : > { %v5042_v25 = vadd.f32 %v5041_v23, %v4297_v19  ;;  %v5003_v7 = vadd.f32 %v5002_v24, %v4293_v20  ;;  %v5043_v26 = vpop.f32.mrb[49].mxu0  ;;  %v5004_v27 = vpop.f32.mrb[34].mxu1  ;;  %v3326_v19 = vrot.slane %v9018_v1, %v8818_v59  ;;  %v4026_v23 = vadd.f32 %v8986_v30, %v3314_v56  ;;  %v7743_v56 = vld [vmem:[#allocation17 + $0x184] ss:$8 sps:$4 sm:$0xff]  }
0x12b9   : > { %v5138_v28 = vmul.f32 0.044715, %v5001_v22  ;;  %v5044_v3 = vadd.f32 %v5043_v26, %v4301_v18  ;;  %v5045_v29 = vpop.f32.mrb[50].mxu0  ;;  %v5005_v5 = vpop.f32.mrb[35].mxu1  ;;  %v5130_v12 = vmul.f32 0.5, %v5001_v22 }
0x12ba   : > { %v5140_v36 = vmul.f32 0.044715, %v5042_v25  ;;  %v5139_v6 = vmul.f32 0.044715, %v5003_v7  ;;  %v5046_v37 = vpop.f32.mrb[51].mxu0  ;;  %v5132_v20 = vmul.f32 0.5, %v5042_v25 }
0x12bb   : > { %v5146_v2 = vmul.f32 %v5138_v28, %v5001_v22  ;;  %v5141_v38 = vmul.f32 0.044715, %v5044_v3  ;;  %v5131_v24 = vmul.f32 0.5, %v5003_v7  ;;  %v5133_v28 = vmul.f32 0.5, %v5044_v3 }
0x12bc   : > { %v5148_v39 = vmul.f32 %v5140_v36, %v5042_v25  ;;  %v5147_v40 = vmul.f32 %v5139_v6, %v5003_v7  ;;  %v4069_v37 = vadd.f32 %v8992_v34, %v3326_v19  ;;  %v7728_v34 = vld [vmem:[#allocation17 + $0x134] ss:$8 sps:$4 sm:$0xff]  }
0x12bd   : > { %v5154_v15 = vmul.f32 %v5146_v2, %v5001_v22  ;;  %v5149_v43 = vmul.f32 %v5141_v38, %v5044_v3 }
0x12be   : > { %v5156_v44 = vmul.f32 %v5148_v39, %v5042_v25  ;;  %v5155_v45 = vmul.f32 %v5147_v40, %v5003_v7  ;;  %v7722_v40 = vld [vmem:[#allocation17 + $0x114] ss:$8 sps:$4 sm:$0xff]  }
0x12bf   : > { %v5162_v46 = vadd.f32 %v5154_v15, %v5001_v22  ;;  %v5157_v47 = vmul.f32 %v5149_v43, %v5044_v3  ;;  %v4028_v22 = vadd.f32 %v8990_v33, %v3318_v62  ;;  %v7725_v33 = vld [vmem:[#allocation17 + $0x124] ss:$8 sps:$4 sm:$0xff]   ;;  %v7723_v15 = vld [vmem:[#allocation17 + $0x120] ss:$8 sps:$4 sm:$0xff]   ;;  %v7726_v43 = vld [vmem:[#allocation17 + $0x130] ss:$8 sps:$4 sm:$0xff]  }
0x12c0   : > { %v5164_v48 = vadd.f32 %v5156_v44, %v5042_v25  ;;  %v5163_v16 = vadd.f32 %v5155_v45, %v5003_v7  ;;  %v7717_v7 = vld [vmem:[#allocation17 + $0x100] ss:$8 sps:$4 sm:$0xff]   ;;  %v7731_v44 = vld [vmem:[#allocation17 + $0x144] ss:$8 sps:$4 sm:$0xff]  }
0x12c1   : > { %v5170_v10 = vmul.f32 0.7978846, %v5162_v46  ;;  %v5165_v58 = vadd.f32 %v5157_v47, %v5044_v3  ;;  %v7720_v3 = vld [vmem:[#allocation17 + $0x110] ss:$8 sps:$4 sm:$0xff]   ;;  %v7729_v45 = vld [vmem:[#allocation17 + $0x140] ss:$8 sps:$4 sm:$0xff]  }
0x12c2   : > { %v5172_v49 = vmul.f32 0.7978846, %v5164_v48  ;;  %v5171_v50 = vmul.f32 0.7978846, %v5163_v16  ;;  %v7734_v46 = vld [vmem:[#allocation17 + $0x154] ss:$8 sps:$4 sm:$0xff]  }
0x12c3   : > { %7881 = vtanh.f32 %v5170_v10  ;;  %v5173_v54 = vmul.f32 0.7978846, %v5165_v58  ;;  %v7732_v47 = vld [vmem:[#allocation17 + $0x150] ss:$8 sps:$4 sm:$0xff]   ;;  %v7737_v48 = vld [vmem:[#allocation17 + $0x164] ss:$8 sps:$4 sm:$0xff]  }
0x12c4   : > { %7883 = vtanh.f32 %v5172_v49  ;;  %v7735_v16 = vld [vmem:[#allocation17 + $0x160] ss:$8 sps:$4 sm:$0xff]   ;;  %v7740_v10 = vld [vmem:[#allocation17 + $0x174] ss:$8 sps:$4 sm:$0xff]   ;;  %v3337_v58 = vsub.s32 6, %v8758_v53 }
0x12c5   : > { %7885 = vtanh.f32 %v5171_v50  ;;  %v7738_v49 = vld [vmem:[#allocation17 + $0x170] ss:$8 sps:$4 sm:$0xff]   ;;  %v3341_v50 = vsub.s32 7, %v8758_v53 }
0x12c6   : > { %7887 = vtanh.f32 %v5173_v54  ;;  %v4305_v54 = vrot.slane %v9005_v17, %v8810_v32 }
0x12cd   : > { %v7882_v4 = vpop.eup %7881 }
0x12ce   : > { %v7884_v11 = vpop.eup %7883  ;;  %v5186_v14 = vadd.f32 1.0, %v7882_v4  ;;  %v4313_v4 = vrot.slane %v9005_v17, %v3337_v58 }
0x12cf   : > { %v7886_v63 = vpop.eup %7885  ;;  %v5188_v18 = vadd.f32 1.0, %v7884_v11  ;;  %v4317_v11 = vrot.slane %v9005_v17, %v3341_v50 }
0x12d0   : > { %v7888_v35 = vpop.eup %7887  ;;  %v5187_v26 = vadd.f32 1.0, %v7886_v63  ;;  %v5194_v27 = vmul.f32 %v5186_v14, %v5130_v12  ;;  %v7741_v12 = vld [vmem:[#allocation17 + $0x180] ss:$8 sps:$4 sm:$0xff]  }
0x12d1   : > { %v5189_v29 = vadd.f32 1.0, %v7888_v35  ;;  %v5196_v5 = vmul.f32 %v5188_v18, %v5132_v20  ;;  %v7746_v20 = vld [vmem:[#allocation17 + $0x194] ss:$8 sps:$4 sm:$0xff]  }
0x12d2   : > { %v5195_v36 = vmul.f32 %v5187_v26, %v5131_v24  ;;  %v5202_v6 = vmul.f32 %v5194_v27, %v4026_v23 }
0x12d3   : > { %v5197_v59 = vmul.f32 %v5189_v29, %v5133_v28  ;;  %v9032_v25 = vmul.f32 %v5196_v5, %v4067_v21  ;;  %v7744_v28 = vld [vmem:[#allocation17 + $0x190] ss:$8 sps:$4 sm:$0xff]  }
0x12d4   : > { %v5203_v2 = vmul.f32 %v5195_v36, %v4028_v22  ;;  %v5210_v39 = vpack.c.bf16 %v5202_v6, %v5202_v6 }
0x12d5   : > { %v5205_v38 = vmul.f32 %v5197_v59, %v4069_v37  ;;  %v7749_v37 = vld [vmem:[#allocation17 + $0x1a4] ss:$8 sps:$4 sm:$0xff]  }
0x12d6   : > { %v5211_v30 = vpack.c.bf16 %v5203_v2, %v5203_v2 }
0x12d7   : > { %v5213_v31 = vpack.c.bf16 %v5205_v38, %v5205_v38 }
0x12d8   : > { %6031 = vmatprep.mubr.bf16.mxu1 %v5211_v30 }
0x12d9   : > { %6032 = vmatmul.mubr.bf16.vlgmr.msra.gmra.mrb[40].mxu1 %v5210_v39 }
0x12da   : > { %6041 = vmatpush1.bf16.msra.mxu1 %v7717_v7  ;;  %6072 = vmatprep.mubr.bf16.mxu1 %v5213_v31 }
0x12db   : > { %6042 = vmatprep.subr.bf16.mxu1 %v7722_v40  ;;  %v7747_v40 = vld [vmem:[#allocation17 + $0x1a0] ss:$8 sps:$4 sm:$0xff]  }
0x12de   : > { %6043 = vmatpush1.bf16.msra.mxu1 %v7720_v3 }
0x12df   : > { %6044 = vmatprep.subr.bf16.mxu1 %v7725_v33  ;;  %v7752_v33 = vld [vmem:[#allocation17 + $0x1b4] ss:$8 sps:$4 sm:$0xff]  }
0x12e2   : > { %6045 = vmatpush1.bf16.msra.mxu1 %v7723_v15 }
0x12e3   : > { %6046 = vmatprep.subr.bf16.mxu1 %v7728_v34 }
0x12e6   : > { %6047 = vmatpush1.bf16.msra.mxu1 %v7726_v43 }
0x12e7   : > { %6048 = vmatprep.subr.bf16.mxu1 %v7731_v44 }
0x12ea   : > { %6049 = vmatpush1.bf16.msra.mxu1 %v7729_v45 }
0x12eb   : > { %6050 = vmatprep.subr.bf16.mxu1 %v7734_v46  ;;  %v7750_v46 = vld [vmem:[#allocation17 + $0x1b0] ss:$8 sps:$4 sm:$0xff]  }
0x12ee   : > { %6051 = vmatpush1.bf16.msra.mxu1 %v7732_v47 }
0x12ef   : > { %6052 = vmatprep.subr.bf16.mxu1 %v7737_v48  ;;  %v7755_v48 = vld [vmem:[#allocation17 + $0x1c4] ss:$8 sps:$4 sm:$0xff]  }
0x12f2   : > { %6053 = vmatpush1.bf16.msra.mxu1 %v7735_v16 }
0x12f3   : > { %6054 = vmatprep.subr.bf16.mxu1 %v7740_v10  ;;  %v7753_v10 = vld [vmem:[#allocation17 + $0x1c0] ss:$8 sps:$4 sm:$0xff]  }
0x12f6   : > { %6055 = vmatpush1.bf16.msra.mxu1 %v7738_v49  ;;  %v5082_v62 = vpop.f32.mrb[36].mxu1  ;;  %v7758_v49 = vld [vmem:[#allocation17 + $0x1d4] ss:$8 sps:$4 sm:$0xff]  }
0x12f7   : > { %v9046_v14 = vadd.f32 %v5082_v62, %v4305_v54  ;;  %v5123_v63 = vpop.f32.mrb[52].mxu0  ;;  %v5084_v19 = vpop.f32.mrb[37].mxu1  ;;  %6056 = vmatprep.subr.bf16.mxu1 %v7743_v56  ;;  %v7756_v54 = vld [vmem:[#allocation17 + $0x1d0] ss:$8 sps:$4 sm:$0xff]   ;;  %v7761_v56 = vld [vmem:[#allocation17 + $0x1e4] ss:$8 sps:$4 sm:$0xff]  }
0x12f8   : > { %v9048_v18 = vadd.f32 %v5123_v63, %v4313_v4  ;;  %v9050_v35 = vadd.f32 %v5084_v19, %v4309_v41  ;;  %v5125_v23 = vpop.f32.mrb[53].mxu0  ;;  %v5086_v24 = vpop.f32.mrb[38].mxu1  ;;  %v3330_v4 = vrot.slane %v9018_v1, %v8810_v32  ;;  %v7759_v63 = vld [vmem:[#allocation17 + $0x1e0] ss:$8 sps:$4 sm:$0xff]   ;;  %v7764_v32 = vld [vmem:[#allocation17 + $0x1f4] ss:$8 sps:$4 sm:$0xff]  }
0x12f9   : > { %v5142_v26 = vmul.f32 0.044715, %v9046_v14  ;;  %v9053_v27 = vadd.f32 %v5125_v23, %v4317_v11  ;;  %v5127_v17 = vpop.f32.mrb[54].mxu0  ;;  %v5087_v21 = vpop.f32.mrb[39].mxu1  ;;  %v3338_v11 = vrot.slane %v9018_v1, %v3337_v58  ;;  %v5134_v19 = vmul.f32 0.5, %v9046_v14 }
0x12fa   : > { %v5144_v29 = vmul.f32 0.044715, %v9048_v18  ;;  %v5143_v5 = vmul.f32 0.044715, %v9050_v35  ;;  %6057 = vmatpush1.bf16.msra.mxu1 %v7741_v12  ;;  %v5128_v22 = vpop.f32.mrb[55].mxu0  ;;  %v3334_v12 = vrot.slane %v9018_v1, %v8822_v61  ;;  %v3342_v24 = vrot.slane %v9018_v1, %v3341_v50 }
0x12fb   : > { %v5150_v36 = vmul.f32 %v5142_v26, %v9046_v14  ;;  %v5145_v6 = vmul.f32 0.044715, %v9053_v27  ;;  %6058 = vmatprep.subr.bf16.mxu1 %v7746_v20  ;;  %v5136_v26 = vmul.f32 0.5, %v9048_v18  ;;  %v4108_v21 = vadd.f32 %v8994_v42, %v3330_v4  ;;  %v7762_v50 = vld [vmem:[#allocation17 + $0x1f0] ss:$8 sps:$4 sm:$0xff]  }
0x12fc   : > { %v5152_v59 = vmul.f32 %v5144_v29, %v9048_v18  ;;  %v5151_v2 = vmul.f32 %v5143_v5, %v9050_v35  ;;  %v5137_v22 = vmul.f32 0.5, %v9053_v27  ;;  %v4110_v1 = vadd.f32 %v8998_v8, %v3334_v12  ;;  %v7767_v42 = vld [vmem:[#allocation17 + $0x204] ss:$8 sps:$4 sm:$0xff]  }
0x12fd   : > { %v5158_v38 = vmul.f32 %v5150_v36, %v9046_v14  ;;  %v5153_v30 = vmul.f32 %v5145_v6, %v9053_v27  ;;  %v5212_v8 = vpack.c.bf16 %v9032_v25, %v9032_v25  ;;  %v7782_v25 = vld [vmem:[#allocation17 + $0x254] ss:$8 sps:$4 sm:$0xff]   ;;  %v7803_v4 = vld [vmem:[#allocation17 + $0x2c4] ss:$8 sps:$4 sm:$0xff]  }
0x12fe   : > { %v5160_v7 = vmul.f32 %v5152_v59, %v9048_v18  ;;  %v5159_v39 = vmul.f32 %v5151_v2, %v9050_v35  ;;  %6059 = vmatpush1.bf16.msra.mxu1 %v7744_v28  ;;  %v5135_v28 = vmul.f32 0.5, %v9050_v35  ;;  %v7809_v12 = vld [vmem:[#allocation17 + $0x2e4] ss:$8 sps:$4 sm:$0xff]  }
0x12ff   : > { %v5166_v31 = vadd.f32 %v5158_v38, %v9046_v14  ;;  %v5161_v3 = vmul.f32 %v5153_v30, %v9053_v27  ;;  %6060 = vmatprep.subr.bf16.mxu1 %v7749_v37  ;;  %v4149_v14 = vadd.f32 %v8996_v13, %v3338_v11  ;;  %v4151_v37 = vadd.f32 %v9000_v9, %v3342_v24  ;;  %v7770_v30 = vld [vmem:[#allocation17 + $0x214] ss:$8 sps:$4 sm:$0xff]   ;;  %v7768_v9 = vld [vmem:[#allocation17 + $0x210] ss:$8 sps:$4 sm:$0xff]   ;;  %v7813_v24 = vld [vmem:[#allocation17 + $0x300] ss:$8 sps:$4 sm:$0xff]  }
0x1300   : > { %v5168_v15 = vadd.f32 %v5160_v7, %v9048_v18  ;;  %v5167_v34 = vadd.f32 %v5159_v39, %v9050_v35  ;;  %v7773_v7 = vld [vmem:[#allocation17 + $0x224] ss:$8 sps:$4 sm:$0xff]   ;;  %v7771_v39 = vld [vmem:[#allocation17 + $0x220] ss:$8 sps:$4 sm:$0xff]   ;;  %v7806_v11 = vld [vmem:[#allocation17 + $0x2d4] ss:$8 sps:$4 sm:$0xff]  }
0x1301   : > { %v5174_v43 = vmul.f32 0.7978846, %v5166_v31  ;;  %v5169_v44 = vadd.f32 %v5161_v3, %v9053_v27  ;;  %v7765_v27 = vld [vmem:[#allocation17 + $0x200] ss:$8 sps:$4 sm:$0xff]   ;;  %v7774_v31 = vld [vmem:[#allocation17 + $0x230] ss:$8 sps:$4 sm:$0xff]  }
0x1302   : > { %v5176_v45 = vmul.f32 0.7978846, %v5168_v15  ;;  %6061 = vmatpush1.bf16.msra.mxu1 %v7747_v40  ;;  %v5175_v47 = vmul.f32 0.7978846, %v5167_v34  ;;  %v7776_v40 = vld [vmem:[#allocation17 + $0x234] ss:$8 sps:$4 sm:$0xff]  }
0x1303   : > { %7889 = vtanh.f32 %v5174_v43  ;;  %6062 = vmatprep.subr.bf16.mxu1 %v7752_v33  ;;  %v5177_v16 = vmul.f32 0.7978846, %v5169_v44  ;;  %v7779_v3 = vld [vmem:[#allocation17 + $0x244] ss:$8 sps:$4 sm:$0xff]   ;;  %v7777_v33 = vld [vmem:[#allocation17 + $0x240] ss:$8 sps:$4 sm:$0xff]  }
0x1304   : > { %7891 = vtanh.f32 %v5176_v45  ;;  %v7780_v15 = vld [vmem:[#allocation17 + $0x250] ss:$8 sps:$4 sm:$0xff]   ;;  %v7785_v34 = vld [vmem:[#allocation17 + $0x264] ss:$8 sps:$4 sm:$0xff]   ;;  %v7783_v43 = vld [vmem:[#allocation17 + $0x260] ss:$8 sps:$4 sm:$0xff]  }
0x1305   : > { %7893 = vtanh.f32 %v5175_v47  ;;  %v7788_v44 = vld [vmem:[#allocation17 + $0x274] ss:$8 sps:$4 sm:$0xff]   ;;  %v7786_v45 = vld [vmem:[#allocation17 + $0x270] ss:$8 sps:$4 sm:$0xff]   ;;  %v7789_v47 = vld [vmem:[#allocation17 + $0x280] ss:$8 sps:$4 sm:$0xff]  }
0x1306   : > { %6063 = vmatpush1.bf16.msra.mxu1 %v7750_v46  ;;  %7895 = vtanh.f32 %v5177_v16  ;;  %v7791_v46 = vld [vmem:[#allocation17 + $0x284] ss:$8 sps:$4 sm:$0xff]   ;;  %v7792_v16 = vld [vmem:[#allocation17 + $0x290] ss:$8 sps:$4 sm:$0xff]  }
0x1307   : > { %6064 = vmatprep.subr.bf16.mxu1 %v7755_v48  ;;  %v7794_v48 = vld [vmem:[#allocation17 + $0x294] ss:$8 sps:$4 sm:$0xff]  }
0x130a   : > { %6065 = vmatpush1.bf16.msra.mxu1 %v7753_v10  ;;  %v7797_v10 = vld [vmem:[#allocation17 + $0x2a4] ss:$8 sps:$4 sm:$0xff]  }
0x130b   : > { %6066 = vmatprep.subr.bf16.mxu1 %v7758_v49  ;;  %v7795_v49 = vld [vmem:[#allocation17 + $0x2a0] ss:$8 sps:$4 sm:$0xff]  }
0x130d   : > { %v7890_v41 = vpop.eup %7889 }
0x130e   : > { %v7892_v62 = vpop.eup %7891  ;;  %6067 = vmatpush1.bf16.msra.mxu1 %v7756_v54  ;;  %v5190_v20 = vadd.f32 1.0, %v7890_v41  ;;  %v7800_v54 = vld [vmem:[#allocation17 + $0x2b4] ss:$8 sps:$4 sm:$0xff]   ;;  %v7801_v41 = vld [vmem:[#allocation17 + $0x2c0] ss:$8 sps:$4 sm:$0xff]  }
0x130f   : > { %v7894_v23 = vpop.eup %7893  ;;  %6068 = vmatprep.subr.bf16.mxu1 %v7761_v56  ;;  %v5192_v17 = vadd.f32 1.0, %v7892_v62  ;;  %v7798_v56 = vld [vmem:[#allocation17 + $0x2b0] ss:$8 sps:$4 sm:$0xff]  }
0x1310   : > { %v7896_v58 = vpop.eup %7895  ;;  %v5191_v29 = vadd.f32 1.0, %v7894_v23  ;;  %v5198_v5 = vmul.f32 %v5190_v20, %v5134_v19  ;;  %v7804_v62 = vld [vmem:[#allocation17 + $0x2d0] ss:$8 sps:$4 sm:$0xff]   ;;  %v7812_v19 = vld [vmem:[#allocation17 + $0x2f4] ss:$8 sps:$4 sm:$0xff]  }
0x1311   : > { %v5193_v36 = vadd.f32 1.0, %v7896_v58  ;;  %v5200_v53 = vmul.f32 %v5192_v17, %v5136_v26  ;;  %v7810_v20 = vld [vmem:[#allocation17 + $0x2f0] ss:$8 sps:$4 sm:$0xff]   ;;  %v7815_v23 = vld [vmem:[#allocation17 + $0x304] ss:$8 sps:$4 sm:$0xff]  }
0x1312   : > { %6069 = vmatpush1.bf16.msra.mxu1 %v7759_v63  ;;  %v5199_v6 = vmul.f32 %v5191_v29, %v5135_v28  ;;  %v9087_v18 = vmul.f32 %v5198_v5, %v4108_v21  ;;  %v7807_v63 = vld [vmem:[#allocation17 + $0x2e0] ss:$8 sps:$4 sm:$0xff]   ;;  %v7818_v26 = vld [vmem:[#allocation17 + $0x314] ss:$8 sps:$4 sm:$0xff]   ;;  %v7816_v58 = vld [vmem:[#allocation17 + $0x310] ss:$8 sps:$4 sm:$0xff]  }
0x1313   : > { %6070 = vmatprep.subr.bf16.mxu1 %v7764_v32  ;;  %v5201_v35 = vmul.f32 %v5193_v36, %v5137_v22  ;;  %v9090_v59 = vmul.f32 %v5200_v53, %v4149_v14  ;;  %v7821_v21 = vld [vmem:[#allocation17 + $0x324] ss:$8 sps:$4 sm:$0xff]   ;;  %v7819_v28 = vld [vmem:[#allocation17 + $0x320] ss:$8 sps:$4 sm:$0xff]   ;;  %v7824_v29 = vld [vmem:[#allocation17 + $0x334] ss:$8 sps:$4 sm:$0xff]  }
0x1314   : > { %v5207_v2 = vmul.f32 %v5199_v6, %v4110_v1  ;;  %v5214_v32 = vpack.c.bf16 %v9087_v18, %v9087_v18  ;;  %v7822_v5 = vld [vmem:[#allocation17 + $0x330] ss:$8 sps:$4 sm:$0xff]   ;;  %v7827_v14 = vld [vmem:[#allocation17 + $0x344] ss:$8 sps:$4 sm:$0xff]   ;;  %v7825_v22 = vld [vmem:[#allocation17 + $0x340] ss:$8 sps:$4 sm:$0xff]  }
0x1315   : > { %v9092_v13 = vmul.f32 %v5201_v35, %v4151_v37  ;;  %v7830_v36 = vld [vmem:[#allocation17 + $0x354] ss:$8 sps:$4 sm:$0xff]   ;;  %v7828_v53 = vld [vmem:[#allocation17 + $0x350] ss:$8 sps:$4 sm:$0xff]   ;;  %v7833_v1 = vld [vmem:[#allocation17 + $0x364] ss:$8 sps:$4 sm:$0xff]  }
0x1316   : > { %6071 = vmatpush1.bf16.msra.mxu1 %v7762_v50  ;;  %v5215_v38 = vpack.c.bf16 %v5207_v2, %v5207_v2  ;;  %v7831_v50 = vld [vmem:[#allocation17 + $0x360] ss:$8 sps:$4 sm:$0xff]   ;;  %v7836_v6 = vld [vmem:[#allocation17 + $0x374] ss:$8 sps:$4 sm:$0xff]   ;;  %v7834_v18 = vld [vmem:[#allocation17 + $0x370] ss:$8 sps:$4 sm:$0xff]  }
0x1317   : > { %6081 = vmatprep.subr.bf16.mxu1 %v7767_v42  ;;  %v5217_v17 = vpack.c.bf16 %v9092_v13, %v9092_v13  ;;  %v7839_v37 = vld [vmem:[#allocation17 + $0x384] ss:$8 sps:$4 sm:$0xff]   ;;  %v7837_v42 = vld [vmem:[#allocation17 + $0x380] ss:$8 sps:$4 sm:$0xff]   ;;  %v7842_v35 = vld [vmem:[#allocation17 + $0x394] ss:$8 sps:$4 sm:$0xff]  }
0x1318   : > { %v7840_v2 = vld [vmem:[#allocation17 + $0x390] ss:$8 sps:$4 sm:$0xff]   ;;  %v7845_v13 = vld [vmem:[#allocation17 + $0x3a4] ss:$8 sps:$4 sm:$0xff]  }
0x1319   : > { %6073 = vmatmul.mubr.bf16.vlgmr.msra.gmra.mrb[40].mxu1 %v5212_v8  ;;  %v7846_v8 = vld [vmem:[#allocation17 + $0x3b0] ss:$8 sps:$4 sm:$0xff]  }
0x131a   : > { %6082 = vmatpush1.bf16.msra.mxu1 %v7765_v27  ;;  %6113 = vmatprep.mubr.bf16.mxu1 %v5215_v38  ;;  %v7843_v27 = vld [vmem:[#allocation17 + $0x3a0] ss:$8 sps:$4 sm:$0xff]   ;;  %v7848_v38 = vld [vmem:[#allocation17 + $0x3b4] ss:$8 sps:$4 sm:$0xff]  }
0x131b   : > { %6083 = vmatprep.subr.bf16.mxu1 %v7770_v30  ;;  %v7851_v30 = vld [vmem:[#allocation17 + $0x3c4] ss:$8 sps:$4 sm:$0xff]  }
0x131e   : > { %6084 = vmatpush1.bf16.msra.mxu1 %v7768_v9  ;;  %v7849_v9 = vld [vmem:[#allocation17 + $0x3c0] ss:$8 sps:$4 sm:$0xff]  }
0x131f   : > { %6085 = vmatprep.subr.bf16.mxu1 %v7773_v7  ;;  %v7854_v7 = vld [vmem:[#allocation17 + $0x3d4] ss:$8 sps:$4 sm:$0xff]  }
0x1322   : > { %6086 = vmatpush1.bf16.msra.mxu1 %v7771_v39  ;;  %v7852_v39 = vld [vmem:[#allocation17 + $0x3d0] ss:$8 sps:$4 sm:$0xff]  }
0x1323   : > { %6087 = vmatprep.subr.bf16.mxu1 %v7776_v40  ;;  %v7857_v40 = vld [vmem:[#allocation17 + $0x3e4] ss:$8 sps:$4 sm:$0xff]  }
0x1326   : > { %6088 = vmatpush1.bf16.msra.mxu1 %v7774_v31  ;;  %v7855_v31 = vld [vmem:[#allocation17 + $0x3e0] ss:$8 sps:$4 sm:$0xff]  }
0x1327   : > { %6089 = vmatprep.subr.bf16.mxu1 %v7779_v3  ;;  %v7860_v3 = vld [vmem:[#allocation17 + $0x3f4] ss:$8 sps:$4 sm:$0xff]  }
0x132a   : > { %6090 = vmatpush1.bf16.msra.mxu1 %v7777_v33  ;;  %v7858_v33 = vld [vmem:[#allocation17 + $0x3f0] ss:$8 sps:$4 sm:$0xff]  }
0x132b   : > { %6091 = vmatprep.subr.bf16.mxu1 %v7782_v25  ;;  %v5216_v25 = vpack.c.bf16 %v9090_v59, %v9090_v59 }
0x132e   : > { %6092 = vmatpush1.bf16.msra.mxu1 %v7780_v15  ;;  %v6922_v15 = vld [vmem:[%s9235_s9 + $0x3] ss:$4 sm:$0x3] }
0x132f   : > { %6093 = vmatprep.subr.bf16.mxu1 %v7785_v34  ;;  %v5352_v34 = vrot.slane %v6922_v15, %v8770_v57 }
0x1332   : > { %6094 = vmatpush1.bf16.msra.mxu1 %v7783_v43  ;;  %v5356_v43 = vrot.slane %v6922_v15, %v8764_v55 }
0x1333   : > { %6095 = vmatprep.subr.bf16.mxu1 %v7788_v44  ;;  %v6166_v44 = vrot.slane %v8754_v51, %v8822_v61 }
0x1336   : > { %6096 = vmatpush1.bf16.msra.mxu1 %v7786_v45 }
0x1337   : > { %6097 = vmatprep.subr.bf16.mxu1 %v7791_v46  ;;  %v6170_v46 = vrot.slane %v8756_v52, %v8822_v61 }
0x133a   : > { %6098 = vmatpush1.bf16.msra.mxu1 %v7789_v47 }
0x133b   : > { %6099 = vmatprep.subr.bf16.mxu1 %v7794_v48 }
0x133e   : > { %6100 = vmatpush1.bf16.msra.mxu1 %v7792_v16 }
0x133f   : > { %6101 = vmatprep.subr.bf16.mxu1 %v7797_v10 }
0x1342   : > { %6102 = vmatpush1.bf16.msra.mxu1 %v7795_v49 }
0x1343   : > { %6103 = vmatprep.subr.bf16.mxu1 %v7800_v54 }
0x1346   : > { %6104 = vmatpush1.bf16.msra.mxu1 %v7798_v56 }
0x1347   : > { %6105 = vmatprep.subr.bf16.mxu1 %v7803_v4 }
0x134a   : > { %6106 = vmatpush1.bf16.msra.mxu1 %v7801_v41 }
0x134b   : > { %6107 = vmatprep.subr.bf16.mxu1 %v7806_v11 }
0x134e   : > { %6108 = vmatpush1.bf16.msra.mxu1 %v7804_v62 }
0x134f   : > { %6109 = vmatprep.subr.bf16.mxu1 %v7809_v12 }
0x1352   : > { %6110 = vmatpush1.bf16.msra.mxu1 %v7807_v63 }
0x1353   : > { %6111 = vmatprep.subr.bf16.mxu1 %v7812_v19 }
0x1356   : > { %6112 = vmatpush1.bf16.msra.mxu1 %v7810_v20 }
0x1357   : > { %6122 = vmatprep.subr.bf16.mxu1 %v7815_v23 }
0x1359   : > { %6114 = vmatmul.mubr.bf16.vlgmr.msra.gmra.mrb[40].mxu1 %v5214_v32 }
0x135a   : > { %6123 = vmatpush1.bf16.msra.mxu1 %v7813_v24  ;;  %6154 = vmatprep.mubr.bf16.mxu1 %v5217_v17 }
0x135b   : > { %6124 = vmatprep.subr.bf16.mxu1 %v7818_v26 }
0x135e   : > { %6125 = vmatpush1.bf16.msra.mxu1 %v7816_v58 }
0x135f   : > { %6126 = vmatprep.subr.bf16.mxu1 %v7821_v21 }
0x1362   : > { %6127 = vmatpush1.bf16.msra.mxu1 %v7819_v28 }
0x1363   : > { %6128 = vmatprep.subr.bf16.mxu1 %v7824_v29 }
0x1366   : > { %6129 = vmatpush1.bf16.msra.mxu1 %v7822_v5 }
0x1367   : > { %6130 = vmatprep.subr.bf16.mxu1 %v7827_v14 }
0x136a   : > { %6131 = vmatpush1.bf16.msra.mxu1 %v7825_v22 }
0x136b   : > { %6132 = vmatprep.subr.bf16.mxu1 %v7830_v36 }
0x136e   : > { %6133 = vmatpush1.bf16.msra.mxu1 %v7828_v53 }
0x136f   : > { %6134 = vmatprep.subr.bf16.mxu1 %v7833_v1 }
0x1372   : > { %6135 = vmatpush1.bf16.msra.mxu1 %v7831_v50 }
0x1373   : > { %6136 = vmatprep.subr.bf16.mxu1 %v7836_v6 }
0x1376   : > { %6137 = vmatpush1.bf16.msra.mxu1 %v7834_v18 }
0x1377   : > { %6138 = vmatprep.subr.bf16.mxu1 %v7839_v37 }
0x137a   : > { %6139 = vmatpush1.bf16.msra.mxu1 %v7837_v42 }
0x137b   : > { %6140 = vmatprep.subr.bf16.mxu1 %v7842_v35 }
0x137e   : > { %6141 = vmatpush1.bf16.msra.mxu1 %v7840_v2 }
0x137f   : > { %6142 = vmatprep.subr.bf16.mxu1 %v7845_v13 }
0x1382   : > { %6143 = vmatpush1.bf16.msra.mxu1 %v7843_v27 }
0x1383   : > { %6144 = vmatprep.subr.bf16.mxu1 %v7848_v38 }
0x1386   : > { %6145 = vmatpush1.bf16.msra.mxu1 %v7846_v8 }
0x1387   : > { %6146 = vmatprep.subr.bf16.mxu1 %v7851_v30 }
0x138a   : > { %6147 = vmatpush1.bf16.msra.mxu1 %v7849_v9 }
0x138b   : > { %6148 = vmatprep.subr.bf16.mxu1 %v7854_v7 }
0x138e   : > { %6149 = vmatpush1.bf16.msra.mxu1 %v7852_v39 }
0x138f   : > { %6150 = vmatprep.subr.bf16.mxu1 %v7857_v40 }
0x1392   : > { %6151 = vmatpush1.bf16.msra.mxu1 %v7855_v31 }
0x1393   : > { %6152 = vmatprep.subr.bf16.mxu1 %v7860_v3 }
0x1396   : > { %6153 = vmatpush1.bf16.msra.mxu1 %v7858_v33 }
0x1399   : > { %6155 = vmatmul.mubr.bf16.vlgmr.msra.gmra.mrb[40].mxu1 %v5216_v25 }
0x146c   : > { %v6156_v45 = vpop.f32.mrb[40].mxu1 }
0x146d   : > { %v7124_v47 = vadd.f32 %v6156_v45, %v5352_v34  ;;  %v6158_v48 = vpop.f32.mrb[41].mxu1 }
0x146e   : > { %v7125_v59 = vadd.f32 %v6158_v48, %v5356_v43  ;;  %v6160_v16 = vpop.f32.mrb[42].mxu1 }
0x146f   : > { %v6171_v10 = vmul.f32 %v7124_v47, %v6166_v44  ;;  %v6161_v49 = vpop.f32.mrb[43].mxu1 }
0x1470   : > { %v6172_v55 = vmul.f32 %v7125_v59, %v6170_v46 }
0x1471   : > { %v6173_v57 = vadd.f32 %v6171_v10, %v8958_v60 }
0x1472   : > { %v6174_v51 = vadd.f32 %v6172_v55, %v8960_v0 }
0x1473   : > { %6175 = vst [vmem:[%s696_s18] sm:$0xff] %v6173_v57 }
0x1474   : > { %6176 = vst [vmem:[%s696_s18 + $0x8] sm:$0xff] %v6174_v51 }
0x1475   : > { %8192 = shalt.err (!%p8189_p0)
}
0x1476   : > { %s8193_s30 = scalar_lea.hbm %s9119_s13, 256  ;;  %s8197_s28 = scalar_lea.hbm %s9238_s16, 512 }
0x1477   : > { %p8194_p5 = scmp.ne.s32.totalorder %s9119_s13, %s8193_s30  ;;  %p8198_p10 = scmp.lt.u32.totalorder %s9119_s13, %s9238_s16 }
0x1478   : > { %p8199_p1 = scmp.lt.u32.totalorder %s8197_s28, %s8193_s30  ;;  %p8201_p12 = scmp.lt.u32.totalorder %s8193_s30, %s9119_s13 }
0x1479   : > { %p8195_p2 = pnand %p8194_p5, %p9239_p13 }
0x147a   : > { %p8200_p11 = por %p8199_p1, %p8198_p10 }
0x147b   : > { %p8196_p7 = pneg %p8195_p2 }
0x147c   : > { %p8202_p3 = por %p8201_p12, %p8200_p11 }
0x147e   : > { %p8203_p6 = pnand %p8202_p3, %p8196_p7 }
0x1480   : > { %8206 = shalt.err (!%p8203_p6)
}
0x1481   : > { %7176 = dma.vmem_to_hbm [thread:$0]  (%p9239_p13), %s9121_s5, 256, %s9119_s13, %s6178_s27  }
0x1482 PF: > { %s6204_s1 = sand.u32 1, %s8253_s21   ;;  %p9240_p9 = scmp.ne.s32.totalorder %s9217_s26, 0 }
0x1483   : > { %p9241_p4 = scmp.ge.s32.totalorder %s8265_s24, 2  ;;  %s6205_s2 = scalar_lea.sflag [#allocation4], %s6204_s1 }
0x1485   : > { %p7211_p8 = pnand %p9241_p4, %p9240_p9 }
0x1487   : > { %8248 = dma.done.wait (!%p7211_p8), %s6205_s2, 256  }
0x1488   : > { %8250 = vsyncadd (!%p7211_p8), %s6205_s2, 4294967040  ;;  %p34_p0 = scmp.ge.s32.totalorder %s8631_s29, 4   ;;  %s9242_s21 = smov %s8257_s22 }
0x1489   : > { %s9243_s22 = smov %s8261_s23  ;;  %s9244_s23 = smov %s8643_s15 }
0x148a   : > { %s9245_s24 = smov %s8631_s29  ;;  %36 = sbr.rel (!%p34_p0) target bundleno = 21 (0x15), region = 175 }
0x1491   :  { %6210 = vsyncpa [#allocation3], 1 }
0x1492   :  { %6212 = vsyncpa [#allocation3 + $0x1], 1 }
0x1493   :  { %6213 = vsyncpa [#allocation6], 1 }
0x1494   :  { %6214 = vsyncpa [#allocation9], 1 }
0x1495   :  { %6215 = vsyncpa [#allocation12], 1 }
0x1496   :  { %6216 = vsyncpa [#allocation15], 1 }
0x1497   :  { %6217 = vsyncpa [#allocation18], 1 }
0x1498   :  { %6218 = vsyncpa [#allocation4], 1 }
0x1499   :  { %6220 = vsyncpa [#allocation4 + $0x1], 1 }

</bundles_post_ra>
